<compile_context>
chip_gen: v5e
topology: v5e:2x2
jax: 0.10.0
libtpu: 0.0.40
codegen_flags: <defaults>
</compile_context>

<pallas_src>
import functools

import jax
import jax.numpy as jnp
from jax import lax
from jax.experimental import pallas as pl
from jax.experimental.pallas import tpu as pltpu

MXU_DTYPE = jnp.float32   # jnp.bfloat16 on v6e/v7x for ~2x MXU throughput


# ---------------------------------------------------------------------------
# helpers
# ---------------------------------------------------------------------------
def _round_up(x, m):
    return (x + m - 1) // m * m


def _vmem_bytes(tt, bp, in_dim, hp, on, itemsize=4):
    """Rough VMEM footprint of one layer kernel (double-buffered blocks +
    resident weights + scratch)."""
    four_hp = 4 * hp
    pipelined = 2 * (tt * bp * in_dim + tt * bp * hp + bp * on)
    resident = 2 * (in_dim * four_hp + hp * four_hp + hp * on + four_hp + on)
    scratch = tt * bp * four_hp + 2 * bp * hp
    return (pipelined + resident + scratch) * itemsize


def _choose_tt(T, bp, in_dim, hp, on, budget=48 << 20):
    """Largest power-of-two time-block that fits the VMEM budget (v7x-safe)."""
    tt = 1
    for c in (32, 16, 8, 4, 2, 1):
        if _vmem_bytes(c, bp, in_dim, hp, on) <= budget:
            tt = c
            break
    # don't pad a short sequence far past its length
    while tt > 1 and tt >= 2 * T:
        tt //= 2
    return tt


# ---------------------------------------------------------------------------
# Fused per-layer kernel: input projection + recurrence + (last step) Linear
# ---------------------------------------------------------------------------
def _lstm_layer_kernel(xseq_ref, wih_ref, whh_ref, b_ref, lw_ref, lb_ref,
                       hseq_ref, out_ref,
                       gates_sc, h_sc, c_sc,
                       *, tt, bp, hp, in_dim, t_real, masked_tail, unroll):
    tb = pl.program_id(0)
    nblk = pl.num_programs(0)

    @pl.when(tb == 0)
    def _():
        h_sc[...] = jnp.zeros_like(h_sc)
        c_sc[...] = jnp.zeros_like(c_sc)

    # Fused input projection for the whole time block: one big MXU matmul
    # instead of materializing xproj in HBM or a per-step x@W_ih.
    xin = xseq_ref[...].astype(MXU_DTYPE).reshape(tt * bp, in_dim)
    proj = jnp.dot(xin, wih_ref[...], preferred_element_type=jnp.float32)
    gates_sc[...] = (proj + b_ref[...]).reshape(tt, bp, 4 * hp)

    # Resident recurrent weight, read once per block (not once per step).
    whh = whh_ref[...]
    t0 = tb * tt

    def step(i, carry):
        h, c = carry
        gates = gates_sc[i] + jnp.dot(h.astype(MXU_DTYPE), whh,
                                      preferred_element_type=jnp.float32)
        # gates packed [i, f, o, g]: one tanh-sigmoid covers all three sigmoids
        sig = 0.5 * (1.0 + jnp.tanh(0.5 * gates[:, 0:3 * hp]))
        i_g = sig[:, 0 * hp:1 * hp]
        f_g = sig[:, 1 * hp:2 * hp]
        o_g = sig[:, 2 * hp:3 * hp]
        g_g = jnp.tanh(gates[:, 3 * hp:4 * hp])
        c_new = f_g * c + i_g * g_g
        h_new = o_g * jnp.tanh(c_new)
        if masked_tail:                      # static: only when T was padded
            valid = (t0 + i) < t_real
            h_new = jnp.where(valid, h_new, h)
            c_new = jnp.where(valid, c_new, c)
        hseq_ref[i] = h_new.astype(hseq_ref.dtype)
        return h_new, c_new

    h_f, c_f = lax.fori_loop(0, tt, step, (h_sc[...], c_sc[...]), unroll=unroll)
    h_sc[...] = h_f
    c_sc[...] = c_f

    # Fused final Linear on this layer's h_T (PyTorch returns linear(hidden)).
    @pl.when(tb == nblk - 1)
    def _():
        out_ref[...] = (jnp.dot(h_f.astype(MXU_DTYPE), lw_ref[...],
                                preferred_element_type=jnp.float32)
                        + lb_ref[...]).astype(out_ref.dtype)


def _run_layer(xseq, wih_p, whh_p, b_p, lin_w_p, lin_b_p, *, tt, hp, t_real):
    """xseq: (T_pad, Bp, In). Returns (hseq (T_pad,Bp,Hp), out_l (Bp,On))."""
    t_pad, bp, in_dim = xseq.shape
    on = lin_w_p.shape[1]
    four_hp = 4 * hp
    nblk = t_pad // tt
    masked_tail = (t_pad != t_real)
    unroll = min(tt, 8)

    kernel = functools.partial(
        _lstm_layer_kernel, tt=tt, bp=bp, hp=hp, in_dim=in_dim,
        t_real=t_real, masked_tail=masked_tail, unroll=unroll)

    vmem_need = _vmem_bytes(tt, bp, in_dim, hp, on)
    vmem_limit = int(min(128 << 20, max(32 << 20, vmem_need * 3 // 2)))

    hseq, out_l = pl.pallas_call(
        kernel,
        out_shape=(jax.ShapeDtypeStruct((t_pad, bp, hp), xseq.dtype),
                   jax.ShapeDtypeStruct((bp, on), xseq.dtype)),
        grid_spec=pltpu.PrefetchScalarGridSpec(
            num_scalar_prefetch=0,
            grid=(nblk,),
            in_specs=[
                pl.BlockSpec((tt, bp, in_dim), lambda tb: (tb, 0, 0)),   # x block
                pl.BlockSpec((in_dim, four_hp), lambda tb: (0, 0)),      # W_ih (resident)
                pl.BlockSpec((hp, four_hp), lambda tb: (0, 0)),          # W_hh (resident)
                pl.BlockSpec((1, four_hp), lambda tb: (0, 0)),           # bias
                pl.BlockSpec((hp, on), lambda tb: (0, 0)),               # Linear W
                pl.BlockSpec((1, on), lambda tb: (0, 0)),                # Linear b
            ],
            out_specs=(
                pl.BlockSpec((tt, bp, hp), lambda tb: (tb, 0, 0)),       # h sequence
                pl.BlockSpec((bp, on), lambda tb: (0, 0)),               # Linear(h_T)
            ),
            scratch_shapes=[
                pltpu.VMEM((tt, bp, four_hp), jnp.float32),   # gates_pre block
                pltpu.VMEM((bp, hp), jnp.float32),            # h carry
                pltpu.VMEM((bp, hp), jnp.float32),            # c carry
            ],
        ),
        compiler_params=pltpu.CompilerParams(
            dimension_semantics=("arbitrary",),
            vmem_limit_bytes=vmem_limit),
    )(xseq, wih_p, whh_p, b_p.reshape(1, four_hp), lin_w_p,
      lin_b_p.reshape(1, on))
    return hseq, out_l


@functools.partial(jax.jit, static_argnames=("num_layers", "output_size"))
def lstm_model_forward(x, packed_layers, lin_w_p, lin_b_p, *,
                       num_layers, output_size):
    """x: (B, T, input_size) batch_first.  Returns (num_layers, B, output_size)."""
    B, T, I = x.shape
    bp = _round_up(B, 8)
    hp = lin_w_p.shape[0]                      # padded hidden size
    on = lin_w_p.shape[1]                      # padded output size
    ip = packed_layers[0][0].shape[0]          # padded layer-0 input features

    tt = _choose_tt(T, bp, max(ip, hp), hp, on)
    t_pad = _round_up(T, tt)

    x_tm = jnp.transpose(x, (1, 0, 2))                                   # (T, B, I)
    seq = jnp.pad(x_tm, ((0, t_pad - T), (0, bp - B), (0, ip - I)))      # (Tp, Bp, Ip)

    finals = []
    for l in range(num_layers):
        wih_p, whh_p, b_p = packed_layers[l]
        hseq, out_l = _run_layer(seq, wih_p, whh_p, b_p, lin_w_p, lin_b_p,
                                 tt=tt, hp=hp, t_real=T)
        finals.append(out_l)                   # Linear(h_T) of this layer
        seq = hseq
    out_p = jnp.stack(finals, axis=0)          # (L, Bp, On)
    return out_p[:, :B, :output_size]


# ---------------------------------------------------------------------------
# Parameter construction & packing (PyTorch layouts -> padded kernel layouts)
# ---------------------------------------------------------------------------
def init_params(key, input_size, hidden_size, num_layers, output_size):
    """Raw parameters in PyTorch layout: w_ih (4H, in), w_hh (4H, H), biases (4H,)."""
    bound = 1.0 / jnp.sqrt(jnp.float32(hidden_size))
    raw_layers = []
    for l in range(num_layers):
        in_sz = input_size if l == 0 else hidden_size
        key, k1, k2, k3, k4 = jax.random.split(key, 5)
        w_ih = jax.random.uniform(k1, (4 * hidden_size, in_sz), jnp.float32,
                                  -bound, bound)
        w_hh = jax.random.uniform(k2, (4 * hidden_size, hidden_size), jnp.float32,
                                  -bound, bound)
        b_ih = jax.random.uniform(k3, (4 * hidden_size,), jnp.float32, -bound, bound)
        b_hh = jax.random.uniform(k4, (4 * hidden_size,), jnp.float32, -bound, bound)
        raw_layers.append((w_ih, w_hh, b_ih, b_hh))
    key, k5, k6 = jax.random.split(key, 3)
    lin_w = jax.random.uniform(k5, (output_size, hidden_size), jnp.float32,
                               -bound, bound)
    lin_b = jax.random.uniform(k6, (output_size,), jnp.float32, -bound, bound)
    return raw_layers, lin_w, lin_b


def _pack_layer(w_ih, w_hh, b_ih, b_hh, in_p, hp):
    four_h, in_sz = w_ih.shape
    h = four_h // 4
    perm = jnp.array([0, 1, 3, 2])   # PyTorch [i,f,g,o] -> kernel [i,f,o,g]
    # Wih_p[in, g*hp + hout] = w_ih[perm[g]*h + hout, in]; padded entries zero.
    w_ih_g = jnp.pad(w_ih.reshape(4, h, in_sz)[perm],
                     ((0, 0), (0, hp - h), (0, in_p - in_sz)))
    wih_p = jnp.transpose(w_ih_g, (2, 0, 1)).reshape(in_p, 4 * hp)
    w_hh_g = jnp.pad(w_hh.reshape(4, h, h)[perm],
                     ((0, 0), (0, hp - h), (0, hp - h)))
    whh_p = jnp.transpose(w_hh_g, (2, 0, 1)).reshape(hp, 4 * hp)
    b_p = jnp.pad((b_ih + b_hh).reshape(4, h)[perm],
                  ((0, 0), (0, hp - h))).reshape(4 * hp)
    return wih_p.astype(MXU_DTYPE), whh_p.astype(MXU_DTYPE), b_p


def pack_params(raw_layers, lin_w, lin_b, hidden_size):
    hp = _round_up(hidden_size, 128)
    packed = []
    for l, (w_ih, w_hh, b_ih, b_hh) in enumerate(raw_layers):
        in_p = _round_up(w_ih.shape[1], 8) if l == 0 else hp
        packed.append(_pack_layer(w_ih, w_hh, b_ih, b_hh, in_p, hp))
    o, h = lin_w.shape
    on = _round_up(o, 128)
    lin_w_p = jnp.zeros((hp, on), jnp.float32).at[:h, :o].set(lin_w.T)
    lin_b_p = jnp.zeros((on,), jnp.float32).at[:o].set(lin_b)
    return tuple(packed), lin_w_p.astype(MXU_DTYPE), lin_b_p


# ---------------------------------------------------------------------------
# Pure-JAX reference (for correctness check)
# ---------------------------------------------------------------------------
def lstm_model_ref(x, raw_layers, lin_w, lin_b):
    B = x.shape[0]
    h_seq = jnp.transpose(x, (1, 0, 2))
    finals = []
    for (w_ih, w_hh, b_ih, b_hh) in raw_layers:
        H = w_hh.shape[1]

        def step(carry, xt):
            h, c = carry
            gates = xt @ w_ih.T + h @ w_hh.T + b_ih + b_hh
            i = jax.nn.sigmoid(gates[:, 0 * H:1 * H])
            f = jax.nn.sigmoid(gates[:, 1 * H:2 * H])
            g = jnp.tanh(gates[:, 2 * H:3 * H])
            o = jax.nn.sigmoid(gates[:, 3 * H:4 * H])
            c_new = f * c + i * g
            h_new = o * jnp.tanh(c_new)
            return (h_new, c_new), h_new

        init = (jnp.zeros((B, H), jnp.float32), jnp.zeros((B, H), jnp.float32))
        (h_T, _), hs = lax.scan(step, init, h_seq)
        h_seq = hs
        finals.append(h_T)
    hidden = jnp.stack(finals, axis=0)
    return hidden @ lin_w.T + lin_b


# ---------------------------------------------------------------------------
if __name__ == "__main__":
    batch, seq_len = 2, 8
    input_size, hidden_size, num_layers, output_size = 16, 32, 2, 8

    key = jax.random.PRNGKey(0)
    key, kx = jax.random.split(key)
    x = jax.random.normal(kx, (batch, seq_len, input_size), jnp.float32)

    raw_layers, lin_w, lin_b = init_params(
        key, input_size, hidden_size, num_layers, output_size)
    packed_layers, lin_w_p, lin_b_p = pack_params(
        raw_layers, lin_w, lin_b, hidden_size)

    out = lstm_model_forward(x, packed_layers, lin_w_p, lin_b_p,
                             num_layers=num_layers, output_size=output_size)
    out = jax.block_until_ready(out)

    ref = lstm_model_ref(x, raw_layers, lin_w, lin_b)
    assert out.shape == (num_layers, batch, output_size), out.shape
    err = float(jnp.max(jnp.abs(out - ref)))
    assert jnp.allclose(out, ref, rtol=3e-5, atol=3e-5), err

    print("KERNEL_OK")
</pallas_src>

<mosaic_0001>
module attributes {stable_mosaic.version = 11 : i64} {
  func.func @_lstm_layer_kernel(%arg0: i32, %arg1: memref<8x8x16xf32, #tpu.memory_space<vmem>>, %arg2: memref<16x512xf32, #tpu.memory_space<vmem>>, %arg3: memref<128x512xf32, #tpu.memory_space<vmem>>, %arg4: memref<1x512xf32, #tpu.memory_space<vmem>>, %arg5: memref<128x128xf32, #tpu.memory_space<vmem>>, %arg6: memref<1x128xf32, #tpu.memory_space<vmem>>, %arg7: memref<8x8x128xf32, #tpu.memory_space<vmem>>, %arg8: memref<8x128xf32, #tpu.memory_space<vmem>>, %arg9: memref<8x8x512xf32, #tpu.memory_space<vmem>>, %arg10: memref<8x128xf32, #tpu.memory_space<vmem>>, %arg11: memref<8x128xf32, #tpu.memory_space<vmem>>) attributes {dimension_semantics = [#tpu.dimension_semantics<arbitrary>], iteration_bounds = array<i64: 1>, scalar_prefetch = 0 : i64, scratch_operands = 3 : i64, tpu.core_type = #tpu.core_type<tc>, window_params = [{transform_indices = @transform_0, window_bounds = array<i64: 8, 8, 16>}, {pipeline_mode = #tpu.pipeline_mode<synchronous>, transform_indices = @transform_1, window_bounds = array<i64: 16, 512>}, {pipeline_mode = #tpu.pipeline_mode<synchronous>, transform_indices = @transform_2, window_bounds = array<i64: 128, 512>}, {pipeline_mode = #tpu.pipeline_mode<synchronous>, transform_indices = @transform_3, window_bounds = array<i64: 1, 512>}, {pipeline_mode = #tpu.pipeline_mode<synchronous>, transform_indices = @transform_4, window_bounds = array<i64: 128, 128>}, {pipeline_mode = #tpu.pipeline_mode<synchronous>, transform_indices = @transform_5, window_bounds = array<i64: 1, 128>}, {transform_indices = @transform_6, window_bounds = array<i64: 8, 8, 128>}, {pipeline_mode = #tpu.pipeline_mode<synchronous>, transform_indices = @transform_7, window_bounds = array<i64: 8, 128>}]} {
    %c0_i32 = arith.constant 0 : i32
    %0 = arith.cmpi eq, %arg0, %c0_i32 : i32
    %1 = arith.extui %0 : i1 to i32
    %c0_i32_0 = arith.constant 0 : i32
    %2 = arith.cmpi ne, %1, %c0_i32_0 : i32
    scf.if %2 {
      %cst_87 = arith.constant 0.000000e+00 : f32
      %236 = vector.broadcast %cst_87 : f32 to vector<8x128xf32>
      %c0_88 = arith.constant 0 : index
      %c0_89 = arith.constant 0 : index
      %237 = vector.load %arg10[%c0_88, %c0_89] : memref<8x128xf32, #tpu.memory_space<vmem>>, vector<8x128xf32>
      tpu.vector_store %arg10[%c0_88, %c0_89], %236 {strides = array<i32>} : memref<8x128xf32, #tpu.memory_space<vmem>>, vector<8x128xf32>,
      %cst_90 = arith.constant 0.000000e+00 : f32
      %238 = vector.broadcast %cst_90 : f32 to vector<8x128xf32>
      %c0_91 = arith.constant 0 : index
      %c0_92 = arith.constant 0 : index
      %239 = vector.load %arg11[%c0_91, %c0_92] : memref<8x128xf32, #tpu.memory_space<vmem>>, vector<8x128xf32>
      tpu.vector_store %arg11[%c0_91, %c0_92], %238 {strides = array<i32>} : memref<8x128xf32, #tpu.memory_space<vmem>>, vector<8x128xf32>,
    } else {
    }
    %c0 = arith.constant 0 : index
    %c0_1 = arith.constant 0 : index
    %c0_2 = arith.constant 0 : index
    %3 = vector.load %arg1[%c0, %c0_1, %c0_2] : memref<8x8x16xf32, #tpu.memory_space<vmem>>, vector<8x8x16xf32>
    %4 = vector.shape_cast %3 : vector<8x8x16xf32> to vector<64x16xf32>
    %c0_3 = arith.constant 0 : index
    %c0_4 = arith.constant 0 : index
    %5 = vector.load %arg2[%c0_3, %c0_4] : memref<16x512xf32, #tpu.memory_space<vmem>>, vector<16x512xf32>
    %cst = arith.constant dense<0.000000e+00> : vector<64x512xf32>
    %6 = tpu.matmul %4, %5, %cst {dimension_numbers = #tpu.dot_dimension_numbers<[1], [0], [0], [1], [0, 0, 1, 1], [], []>} : vector<64x16xf32>, vector<16x512xf32>, vector<64x512xf32> -> vector<64x512xf32>
    %c0_5 = arith.constant 0 : index
    %c0_6 = arith.constant 0 : index
    %7 = vector.load %arg4[%c0_5, %c0_6] : memref<1x512xf32, #tpu.memory_space<vmem>>, vector<1x512xf32>
    %8 = vector.broadcast %7 : vector<1x512xf32> to vector<64x512xf32>
    %9 = arith.addf %6, %8 : vector<64x512xf32>
    %10 = vector.shape_cast %9 : vector<64x512xf32> to vector<8x8x512xf32>
    %c0_7 = arith.constant 0 : index
    %c0_8 = arith.constant 0 : index
    %c0_9 = arith.constant 0 : index
    %11 = vector.load %arg9[%c0_7, %c0_8, %c0_9] : memref<8x8x512xf32, #tpu.memory_space<vmem>>, vector<8x8x512xf32>
    tpu.vector_store %arg9[%c0_7, %c0_8, %c0_9], %10 {strides = array<i32>} : memref<8x8x512xf32, #tpu.memory_space<vmem>>, vector<8x8x512xf32>,
    %c0_10 = arith.constant 0 : index
    %c0_11 = arith.constant 0 : index
    %12 = vector.load %arg3[%c0_10, %c0_11] : memref<128x512xf32, #tpu.memory_space<vmem>>, vector<128x512xf32>
    %c0_12 = arith.constant 0 : index
    %c0_13 = arith.constant 0 : index
    %13 = vector.load %arg10[%c0_12, %c0_13] : memref<8x128xf32, #tpu.memory_space<vmem>>, vector<8x128xf32>
    %c0_14 = arith.constant 0 : index
    %c0_15 = arith.constant 0 : index
    %14 = vector.load %arg11[%c0_14, %c0_15] : memref<8x128xf32, #tpu.memory_space<vmem>>, vector<8x128xf32>
    %c0_i32_16 = arith.constant 0 : i32
    %15 = arith.index_cast %c0_i32_16 : i32 to index
    %c0_17 = arith.constant 0 : index
    %c0_18 = arith.constant 0 : index
    %16 = vector.load %arg9[%15, %c0_17, %c0_18] : memref<8x8x512xf32, #tpu.memory_space<vmem>>, vector<1x8x512xf32>
    %17 = vector.shape_cast %16 : vector<1x8x512xf32> to vector<8x512xf32>
    %cst_19 = arith.constant dense<0.000000e+00> : vector<8x512xf32>
    %18 = tpu.matmul %13, %12, %cst_19 {dimension_numbers = #tpu.dot_dimension_numbers<[1], [0], [0], [1], [0, 0, 1, 1], [], []>} : vector<8x128xf32>, vector<128x512xf32>, vector<8x512xf32> -> vector<8x512xf32>
    %19 = arith.addf %17, %18 : vector<8x512xf32>
    %20 = vector.extract_strided_slice %19 {offsets = [0, 0], sizes = [8, 384], strides = [1, 1]} : vector<8x512xf32> to vector<8x384xf32>
    %cst_20 = arith.constant 5.000000e-01 : f32
    %21 = vector.broadcast %cst_20 : f32 to vector<8x384xf32>
    %22 = arith.mulf %21, %20 : vector<8x384xf32>
    %23 = math.tanh %22 : vector<8x384xf32>
    %cst_21 = arith.constant 1.000000e+00 : f32
    %24 = vector.broadcast %cst_21 : f32 to vector<8x384xf32>
    %25 = arith.addf %24, %23 : vector<8x384xf32>
    %cst_22 = arith.constant 5.000000e-01 : f32
    %26 = vector.broadcast %cst_22 : f32 to vector<8x384xf32>
    %27 = arith.mulf %26, %25 : vector<8x384xf32>
    %28 = vector.extract_strided_slice %27 {offsets = [0, 0], sizes = [8, 128], strides = [1, 1]} : vector<8x384xf32> to vector<8x128xf32>
    %29 = vector.extract_strided_slice %27 {offsets = [0, 128], sizes = [8, 128], strides = [1, 1]} : vector<8x384xf32> to vector<8x128xf32>
    %30 = vector.extract_strided_slice %27 {offsets = [0, 256], sizes = [8, 128], strides = [1, 1]} : vector<8x384xf32> to vector<8x128xf32>
    %31 = vector.extract_strided_slice %19 {offsets = [0, 384], sizes = [8, 128], strides = [1, 1]} : vector<8x512xf32> to vector<8x128xf32>
    %32 = math.tanh %31 : vector<8x128xf32>
    %33 = arith.mulf %29, %14 : vector<8x128xf32>
    %34 = arith.mulf %28, %32 : vector<8x128xf32>
    %35 = arith.addf %33, %34 : vector<8x128xf32>
    %36 = math.tanh %35 : vector<8x128xf32>
    %37 = arith.mulf %30, %36 : vector<8x128xf32>
    %38 = arith.index_cast %c0_i32_16 : i32 to index
    %c0_23 = arith.constant 0 : index
    %c0_24 = arith.constant 0 : index
    %39 = vector.load %arg7[%38, %c0_23, %c0_24] : memref<8x8x128xf32, #tpu.memory_space<vmem>>, vector<1x8x128xf32>
    %40 = vector.shape_cast %39 : vector<1x8x128xf32> to vector<8x128xf32>
    %41 = vector.shape_cast %37 : vector<8x128xf32> to vector<1x8x128xf32>
    tpu.vector_store %arg7[%38, %c0_23, %c0_24], %41 {strides = array<i32>} : memref<8x8x128xf32, #tpu.memory_space<vmem>>, vector<1x8x128xf32>,
    %c1_i32 = arith.constant 1 : i32
    %42 = arith.index_cast %c1_i32 : i32 to index
    %c0_25 = arith.constant 0 : index
    %c0_26 = arith.constant 0 : index
    %43 = vector.load %arg9[%42, %c0_25, %c0_26] : memref<8x8x512xf32, #tpu.memory_space<vmem>>, vector<1x8x512xf32>
    %44 = vector.shape_cast %43 : vector<1x8x512xf32> to vector<8x512xf32>
    %cst_27 = arith.constant dense<0.000000e+00> : vector<8x512xf32>
    %45 = tpu.matmul %37, %12, %cst_27 {dimension_numbers = #tpu.dot_dimension_numbers<[1], [0], [0], [1], [0, 0, 1, 1], [], []>} : vector<8x128xf32>, vector<128x512xf32>, vector<8x512xf32> -> vector<8x512xf32>
    %46 = arith.addf %44, %45 : vector<8x512xf32>
    %47 = vector.extract_strided_slice %46 {offsets = [0, 0], sizes = [8, 384], strides = [1, 1]} : vector<8x512xf32> to vector<8x384xf32>
    %cst_28 = arith.constant 5.000000e-01 : f32
    %48 = vector.broadcast %cst_28 : f32 to vector<8x384xf32>
    %49 = arith.mulf %48, %47 : vector<8x384xf32>
    %50 = math.tanh %49 : vector<8x384xf32>
    %cst_29 = arith.constant 1.000000e+00 : f32
    %51 = vector.broadcast %cst_29 : f32 to vector<8x384xf32>
    %52 = arith.addf %51, %50 : vector<8x384xf32>
    %cst_30 = arith.constant 5.000000e-01 : f32
    %53 = vector.broadcast %cst_30 : f32 to vector<8x384xf32>
    %54 = arith.mulf %53, %52 : vector<8x384xf32>
    %55 = vector.extract_strided_slice %54 {offsets = [0, 0], sizes = [8, 128], strides = [1, 1]} : vector<8x384xf32> to vector<8x128xf32>
    %56 = vector.extract_strided_slice %54 {offsets = [0, 128], sizes = [8, 128], strides = [1, 1]} : vector<8x384xf32> to vector<8x128xf32>
    %57 = vector.extract_strided_slice %54 {offsets = [0, 256], sizes = [8, 128], strides = [1, 1]} : vector<8x384xf32> to vector<8x128xf32>
    %58 = vector.extract_strided_slice %46 {offsets = [0, 384], sizes = [8, 128], strides = [1, 1]} : vector<8x512xf32> to vector<8x128xf32>
    %59 = math.tanh %58 : vector<8x128xf32>
    %60 = arith.mulf %56, %35 : vector<8x128xf32>
    %61 = arith.mulf %55, %59 : vector<8x128xf32>
    %62 = arith.addf %60, %61 : vector<8x128xf32>
    %63 = math.tanh %62 : vector<8x128xf32>
    %64 = arith.mulf %57, %63 : vector<8x128xf32>
    %65 = arith.index_cast %c1_i32 : i32 to index
    %c0_31 = arith.constant 0 : index
    %c0_32 = arith.constant 0 : index
    %66 = vector.load %arg7[%65, %c0_31, %c0_32] : memref<8x8x128xf32, #tpu.memory_space<vmem>>, vector<1x8x128xf32>
    %67 = vector.shape_cast %66 : vector<1x8x128xf32> to vector<8x128xf32>
    %68 = vector.shape_cast %64 : vector<8x128xf32> to vector<1x8x128xf32>
    tpu.vector_store %arg7[%65, %c0_31, %c0_32], %68 {strides = array<i32>} : memref<8x8x128xf32, #tpu.memory_space<vmem>>, vector<1x8x128xf32>,
    %c2_i32 = arith.constant 2 : i32
    %69 = arith.index_cast %c2_i32 : i32 to index
    %c0_33 = arith.constant 0 : index
    %c0_34 = arith.constant 0 : index
    %70 = vector.load %arg9[%69, %c0_33, %c0_34] : memref<8x8x512xf32, #tpu.memory_space<vmem>>, vector<1x8x512xf32>
    %71 = vector.shape_cast %70 : vector<1x8x512xf32> to vector<8x512xf32>
    %cst_35 = arith.constant dense<0.000000e+00> : vector<8x512xf32>
    %72 = tpu.matmul %64, %12, %cst_35 {dimension_numbers = #tpu.dot_dimension_numbers<[1], [0], [0], [1], [0, 0, 1, 1], [], []>} : vector<8x128xf32>, vector<128x512xf32>, vector<8x512xf32> -> vector<8x512xf32>
    %73 = arith.addf %71, %72 : vector<8x512xf32>
    %74 = vector.extract_strided_slice %73 {offsets = [0, 0], sizes = [8, 384], strides = [1, 1]} : vector<8x512xf32> to vector<8x384xf32>
    %cst_36 = arith.constant 5.000000e-01 : f32
    %75 = vector.broadcast %cst_36 : f32 to vector<8x384xf32>
    %76 = arith.mulf %75, %74 : vector<8x384xf32>
    %77 = math.tanh %76 : vector<8x384xf32>
    %cst_37 = arith.constant 1.000000e+00 : f32
    %78 = vector.broadcast %cst_37 : f32 to vector<8x384xf32>
    %79 = arith.addf %78, %77 : vector<8x384xf32>
    %cst_38 = arith.constant 5.000000e-01 : f32
    %80 = vector.broadcast %cst_38 : f32 to vector<8x384xf32>
    %81 = arith.mulf %80, %79 : vector<8x384xf32>
    %82 = vector.extract_strided_slice %81 {offsets = [0, 0], sizes = [8, 128], strides = [1, 1]} : vector<8x384xf32> to vector<8x128xf32>
    %83 = vector.extract_strided_slice %81 {offsets = [0, 128], sizes = [8, 128], strides = [1, 1]} : vector<8x384xf32> to vector<8x128xf32>
    %84 = vector.extract_strided_slice %81 {offsets = [0, 256], sizes = [8, 128], strides = [1, 1]} : vector<8x384xf32> to vector<8x128xf32>
    %85 = vector.extract_strided_slice %73 {offsets = [0, 384], sizes = [8, 128], strides = [1, 1]} : vector<8x512xf32> to vector<8x128xf32>
    %86 = math.tanh %85 : vector<8x128xf32>
    %87 = arith.mulf %83, %62 : vector<8x128xf32>
    %88 = arith.mulf %82, %86 : vector<8x128xf32>
    %89 = arith.addf %87, %88 : vector<8x128xf32>
    %90 = math.tanh %89 : vector<8x128xf32>
    %91 = arith.mulf %84, %90 : vector<8x128xf32>
    %92 = arith.index_cast %c2_i32 : i32 to index
    %c0_39 = arith.constant 0 : index
    %c0_40 = arith.constant 0 : index
    %93 = vector.load %arg7[%92, %c0_39, %c0_40] : memref<8x8x128xf32, #tpu.memory_space<vmem>>, vector<1x8x128xf32>
    %94 = vector.shape_cast %93 : vector<1x8x128xf32> to vector<8x128xf32>
    %95 = vector.shape_cast %91 : vector<8x128xf32> to vector<1x8x128xf32>
    tpu.vector_store %arg7[%92, %c0_39, %c0_40], %95 {strides = array<i32>} : memref<8x8x128xf32, #tpu.memory_space<vmem>>, vector<1x8x128xf32>,
    %c3_i32 = arith.constant 3 : i32
    %96 = arith.index_cast %c3_i32 : i32 to index
    %c0_41 = arith.constant 0 : index
    %c0_42 = arith.constant 0 : index
    %97 = vector.load %arg9[%96, %c0_41, %c0_42] : memref<8x8x512xf32, #tpu.memory_space<vmem>>, vector<1x8x512xf32>
    %98 = vector.shape_cast %97 : vector<1x8x512xf32> to vector<8x512xf32>
    %cst_43 = arith.constant dense<0.000000e+00> : vector<8x512xf32>
    %99 = tpu.matmul %91, %12, %cst_43 {dimension_numbers = #tpu.dot_dimension_numbers<[1], [0], [0], [1], [0, 0, 1, 1], [], []>} : vector<8x128xf32>, vector<128x512xf32>, vector<8x512xf32> -> vector<8x512xf32>
    %100 = arith.addf %98, %99 : vector<8x512xf32>
    %101 = vector.extract_strided_slice %100 {offsets = [0, 0], sizes = [8, 384], strides = [1, 1]} : vector<8x512xf32> to vector<8x384xf32>
    %cst_44 = arith.constant 5.000000e-01 : f32
    %102 = vector.broadcast %cst_44 : f32 to vector<8x384xf32>
    %103 = arith.mulf %102, %101 : vector<8x384xf32>
    %104 = math.tanh %103 : vector<8x384xf32>
    %cst_45 = arith.constant 1.000000e+00 : f32
    %105 = vector.broadcast %cst_45 : f32 to vector<8x384xf32>
    %106 = arith.addf %105, %104 : vector<8x384xf32>
    %cst_46 = arith.constant 5.000000e-01 : f32
    %107 = vector.broadcast %cst_46 : f32 to vector<8x384xf32>
    %108 = arith.mulf %107, %106 : vector<8x384xf32>
    %109 = vector.extract_strided_slice %108 {offsets = [0, 0], sizes = [8, 128], strides = [1, 1]} : vector<8x384xf32> to vector<8x128xf32>
    %110 = vector.extract_strided_slice %108 {offsets = [0, 128], sizes = [8, 128], strides = [1, 1]} : vector<8x384xf32> to vector<8x128xf32>
    %111 = vector.extract_strided_slice %108 {offsets = [0, 256], sizes = [8, 128], strides = [1, 1]} : vector<8x384xf32> to vector<8x128xf32>
    %112 = vector.extract_strided_slice %100 {offsets = [0, 384], sizes = [8, 128], strides = [1, 1]} : vector<8x512xf32> to vector<8x128xf32>
    %113 = math.tanh %112 : vector<8x128xf32>
    %114 = arith.mulf %110, %89 : vector<8x128xf32>
    %115 = arith.mulf %109, %113 : vector<8x128xf32>
    %116 = arith.addf %114, %115 : vector<8x128xf32>
    %117 = math.tanh %116 : vector<8x128xf32>
    %118 = arith.mulf %111, %117 : vector<8x128xf32>
    %119 = arith.index_cast %c3_i32 : i32 to index
    %c0_47 = arith.constant 0 : index
    %c0_48 = arith.constant 0 : index
    %120 = vector.load %arg7[%119, %c0_47, %c0_48] : memref<8x8x128xf32, #tpu.memory_space<vmem>>, vector<1x8x128xf32>
    %121 = vector.shape_cast %120 : vector<1x8x128xf32> to vector<8x128xf32>
    %122 = vector.shape_cast %118 : vector<8x128xf32> to vector<1x8x128xf32>
    tpu.vector_store %arg7[%119, %c0_47, %c0_48], %122 {strides = array<i32>} : memref<8x8x128xf32, #tpu.memory_space<vmem>>, vector<1x8x128xf32>,
    %c4_i32 = arith.constant 4 : i32
    %123 = arith.index_cast %c4_i32 : i32 to index
    %c0_49 = arith.constant 0 : index
    %c0_50 = arith.constant 0 : index
    %124 = vector.load %arg9[%123, %c0_49, %c0_50] : memref<8x8x512xf32, #tpu.memory_space<vmem>>, vector<1x8x512xf32>
    %125 = vector.shape_cast %124 : vector<1x8x512xf32> to vector<8x512xf32>
    %cst_51 = arith.constant dense<0.000000e+00> : vector<8x512xf32>
    %126 = tpu.matmul %118, %12, %cst_51 {dimension_numbers = #tpu.dot_dimension_numbers<[1], [0], [0], [1], [0, 0, 1, 1], [], []>} : vector<8x128xf32>, vector<128x512xf32>, vector<8x512xf32> -> vector<8x512xf32>
    %127 = arith.addf %125, %126 : vector<8x512xf32>
    %128 = vector.extract_strided_slice %127 {offsets = [0, 0], sizes = [8, 384], strides = [1, 1]} : vector<8x512xf32> to vector<8x384xf32>
    %cst_52 = arith.constant 5.000000e-01 : f32
    %129 = vector.broadcast %cst_52 : f32 to vector<8x384xf32>
    %130 = arith.mulf %129, %128 : vector<8x384xf32>
    %131 = math.tanh %130 : vector<8x384xf32>
    %cst_53 = arith.constant 1.000000e+00 : f32
    %132 = vector.broadcast %cst_53 : f32 to vector<8x384xf32>
    %133 = arith.addf %132, %131 : vector<8x384xf32>
    %cst_54 = arith.constant 5.000000e-01 : f32
    %134 = vector.broadcast %cst_54 : f32 to vector<8x384xf32>
    %135 = arith.mulf %134, %133 : vector<8x384xf32>
    %136 = vector.extract_strided_slice %135 {offsets = [0, 0], sizes = [8, 128], strides = [1, 1]} : vector<8x384xf32> to vector<8x128xf32>
    %137 = vector.extract_strided_slice %135 {offsets = [0, 128], sizes = [8, 128], strides = [1, 1]} : vector<8x384xf32> to vector<8x128xf32>
    %138 = vector.extract_strided_slice %135 {offsets = [0, 256], sizes = [8, 128], strides = [1, 1]} : vector<8x384xf32> to vector<8x128xf32>
    %139 = vector.extract_strided_slice %127 {offsets = [0, 384], sizes = [8, 128], strides = [1, 1]} : vector<8x512xf32> to vector<8x128xf32>
    %140 = math.tanh %139 : vector<8x128xf32>
    %141 = arith.mulf %137, %116 : vector<8x128xf32>
    %142 = arith.mulf %136, %140 : vector<8x128xf32>
    %143 = arith.addf %141, %142 : vector<8x128xf32>
    %144 = math.tanh %143 : vector<8x128xf32>
    %145 = arith.mulf %138, %144 : vector<8x128xf32>
    %146 = arith.index_cast %c4_i32 : i32 to index
    %c0_55 = arith.constant 0 : index
    %c0_56 = arith.constant 0 : index
    %147 = vector.load %arg7[%146, %c0_55, %c0_56] : memref<8x8x128xf32, #tpu.memory_space<vmem>>, vector<1x8x128xf32>
    %148 = vector.shape_cast %147 : vector<1x8x128xf32> to vector<8x128xf32>
    %149 = vector.shape_cast %145 : vector<8x128xf32> to vector<1x8x128xf32>
    tpu.vector_store %arg7[%146, %c0_55, %c0_56], %149 {strides = array<i32>} : memref<8x8x128xf32, #tpu.memory_space<vmem>>, vector<1x8x128xf32>,
    %c5_i32 = arith.constant 5 : i32
    %150 = arith.index_cast %c5_i32 : i32 to index
    %c0_57 = arith.constant 0 : index
    %c0_58 = arith.constant 0 : index
    %151 = vector.load %arg9[%150, %c0_57, %c0_58] : memref<8x8x512xf32, #tpu.memory_space<vmem>>, vector<1x8x512xf32>
    %152 = vector.shape_cast %151 : vector<1x8x512xf32> to vector<8x512xf32>
    %cst_59 = arith.constant dense<0.000000e+00> : vector<8x512xf32>
    %153 = tpu.matmul %145, %12, %cst_59 {dimension_numbers = #tpu.dot_dimension_numbers<[1], [0], [0], [1], [0, 0, 1, 1], [], []>} : vector<8x128xf32>, vector<128x512xf32>, vector<8x512xf32> -> vector<8x512xf32>
    %154 = arith.addf %152, %153 : vector<8x512xf32>
    %155 = vector.extract_strided_slice %154 {offsets = [0, 0], sizes = [8, 384], strides = [1, 1]} : vector<8x512xf32> to vector<8x384xf32>
    %cst_60 = arith.constant 5.000000e-01 : f32
    %156 = vector.broadcast %cst_60 : f32 to vector<8x384xf32>
    %157 = arith.mulf %156, %155 : vector<8x384xf32>
    %158 = math.tanh %157 : vector<8x384xf32>
    %cst_61 = arith.constant 1.000000e+00 : f32
    %159 = vector.broadcast %cst_61 : f32 to vector<8x384xf32>
    %160 = arith.addf %159, %158 : vector<8x384xf32>
    %cst_62 = arith.constant 5.000000e-01 : f32
    %161 = vector.broadcast %cst_62 : f32 to vector<8x384xf32>
    %162 = arith.mulf %161, %160 : vector<8x384xf32>
    %163 = vector.extract_strided_slice %162 {offsets = [0, 0], sizes = [8, 128], strides = [1, 1]} : vector<8x384xf32> to vector<8x128xf32>
    %164 = vector.extract_strided_slice %162 {offsets = [0, 128], sizes = [8, 128], strides = [1, 1]} : vector<8x384xf32> to vector<8x128xf32>
    %165 = vector.extract_strided_slice %162 {offsets = [0, 256], sizes = [8, 128], strides = [1, 1]} : vector<8x384xf32> to vector<8x128xf32>
    %166 = vector.extract_strided_slice %154 {offsets = [0, 384], sizes = [8, 128], strides = [1, 1]} : vector<8x512xf32> to vector<8x128xf32>
    %167 = math.tanh %166 : vector<8x128xf32>
    %168 = arith.mulf %164, %143 : vector<8x128xf32>
    %169 = arith.mulf %163, %167 : vector<8x128xf32>
    %170 = arith.addf %168, %169 : vector<8x128xf32>
    %171 = math.tanh %170 : vector<8x128xf32>
    %172 = arith.mulf %165, %171 : vector<8x128xf32>
    %173 = arith.index_cast %c5_i32 : i32 to index
    %c0_63 = arith.constant 0 : index
    %c0_64 = arith.constant 0 : index
    %174 = vector.load %arg7[%173, %c0_63, %c0_64] : memref<8x8x128xf32, #tpu.memory_space<vmem>>, vector<1x8x128xf32>
    %175 = vector.shape_cast %174 : vector<1x8x128xf32> to vector<8x128xf32>
    %176 = vector.shape_cast %172 : vector<8x128xf32> to vector<1x8x128xf32>
    tpu.vector_store %arg7[%173, %c0_63, %c0_64], %176 {strides = array<i32>} : memref<8x8x128xf32, #tpu.memory_space<vmem>>, vector<1x8x128xf32>,
    %c6_i32 = arith.constant 6 : i32
    %177 = arith.index_cast %c6_i32 : i32 to index
    %c0_65 = arith.constant 0 : index
    %c0_66 = arith.constant 0 : index
    %178 = vector.load %arg9[%177, %c0_65, %c0_66] : memref<8x8x512xf32, #tpu.memory_space<vmem>>, vector<1x8x512xf32>
    %179 = vector.shape_cast %178 : vector<1x8x512xf32> to vector<8x512xf32>
    %cst_67 = arith.constant dense<0.000000e+00> : vector<8x512xf32>
    %180 = tpu.matmul %172, %12, %cst_67 {dimension_numbers = #tpu.dot_dimension_numbers<[1], [0], [0], [1], [0, 0, 1, 1], [], []>} : vector<8x128xf32>, vector<128x512xf32>, vector<8x512xf32> -> vector<8x512xf32>
    %181 = arith.addf %179, %180 : vector<8x512xf32>
    %182 = vector.extract_strided_slice %181 {offsets = [0, 0], sizes = [8, 384], strides = [1, 1]} : vector<8x512xf32> to vector<8x384xf32>
    %cst_68 = arith.constant 5.000000e-01 : f32
    %183 = vector.broadcast %cst_68 : f32 to vector<8x384xf32>
    %184 = arith.mulf %183, %182 : vector<8x384xf32>
    %185 = math.tanh %184 : vector<8x384xf32>
    %cst_69 = arith.constant 1.000000e+00 : f32
    %186 = vector.broadcast %cst_69 : f32 to vector<8x384xf32>
    %187 = arith.addf %186, %185 : vector<8x384xf32>
    %cst_70 = arith.constant 5.000000e-01 : f32
    %188 = vector.broadcast %cst_70 : f32 to vector<8x384xf32>
    %189 = arith.mulf %188, %187 : vector<8x384xf32>
    %190 = vector.extract_strided_slice %189 {offsets = [0, 0], sizes = [8, 128], strides = [1, 1]} : vector<8x384xf32> to vector<8x128xf32>
    %191 = vector.extract_strided_slice %189 {offsets = [0, 128], sizes = [8, 128], strides = [1, 1]} : vector<8x384xf32> to vector<8x128xf32>
    %192 = vector.extract_strided_slice %189 {offsets = [0, 256], sizes = [8, 128], strides = [1, 1]} : vector<8x384xf32> to vector<8x128xf32>
    %193 = vector.extract_strided_slice %181 {offsets = [0, 384], sizes = [8, 128], strides = [1, 1]} : vector<8x512xf32> to vector<8x128xf32>
    %194 = math.tanh %193 : vector<8x128xf32>
    %195 = arith.mulf %191, %170 : vector<8x128xf32>
    %196 = arith.mulf %190, %194 : vector<8x128xf32>
    %197 = arith.addf %195, %196 : vector<8x128xf32>
    %198 = math.tanh %197 : vector<8x128xf32>
    %199 = arith.mulf %192, %198 : vector<8x128xf32>
    %200 = arith.index_cast %c6_i32 : i32 to index
    %c0_71 = arith.constant 0 : index
    %c0_72 = arith.constant 0 : index
    %201 = vector.load %arg7[%200, %c0_71, %c0_72] : memref<8x8x128xf32, #tpu.memory_space<vmem>>, vector<1x8x128xf32>
    %202 = vector.shape_cast %201 : vector<1x8x128xf32> to vector<8x128xf32>
    %203 = vector.shape_cast %199 : vector<8x128xf32> to vector<1x8x128xf32>
    tpu.vector_store %arg7[%200, %c0_71, %c0_72], %203 {strides = array<i32>} : memref<8x8x128xf32, #tpu.memory_space<vmem>>, vector<1x8x128xf32>,
    %c7_i32 = arith.constant 7 : i32
    %204 = arith.index_cast %c7_i32 : i32 to index
    %c0_73 = arith.constant 0 : index
    %c0_74 = arith.constant 0 : index
    %205 = vector.load %arg9[%204, %c0_73, %c0_74] : memref<8x8x512xf32, #tpu.memory_space<vmem>>, vector<1x8x512xf32>
    %206 = vector.shape_cast %205 : vector<1x8x512xf32> to vector<8x512xf32>
    %cst_75 = arith.constant dense<0.000000e+00> : vector<8x512xf32>
    %207 = tpu.matmul %199, %12, %cst_75 {dimension_numbers = #tpu.dot_dimension_numbers<[1], [0], [0], [1], [0, 0, 1, 1], [], []>} : vector<8x128xf32>, vector<128x512xf32>, vector<8x512xf32> -> vector<8x512xf32>
    %208 = arith.addf %206, %207 : vector<8x512xf32>
    %209 = vector.extract_strided_slice %208 {offsets = [0, 0], sizes = [8, 384], strides = [1, 1]} : vector<8x512xf32> to vector<8x384xf32>
    %cst_76 = arith.constant 5.000000e-01 : f32
    %210 = vector.broadcast %cst_76 : f32 to vector<8x384xf32>
    %211 = arith.mulf %210, %209 : vector<8x384xf32>
    %212 = math.tanh %211 : vector<8x384xf32>
    %cst_77 = arith.constant 1.000000e+00 : f32
    %213 = vector.broadcast %cst_77 : f32 to vector<8x384xf32>
    %214 = arith.addf %213, %212 : vector<8x384xf32>
    %cst_78 = arith.constant 5.000000e-01 : f32
    %215 = vector.broadcast %cst_78 : f32 to vector<8x384xf32>
    %216 = arith.mulf %215, %214 : vector<8x384xf32>
    %217 = vector.extract_strided_slice %216 {offsets = [0, 0], sizes = [8, 128], strides = [1, 1]} : vector<8x384xf32> to vector<8x128xf32>
    %218 = vector.extract_strided_slice %216 {offsets = [0, 128], sizes = [8, 128], strides = [1, 1]} : vector<8x384xf32> to vector<8x128xf32>
    %219 = vector.extract_strided_slice %216 {offsets = [0, 256], sizes = [8, 128], strides = [1, 1]} : vector<8x384xf32> to vector<8x128xf32>
    %220 = vector.extract_strided_slice %208 {offsets = [0, 384], sizes = [8, 128], strides = [1, 1]} : vector<8x512xf32> to vector<8x128xf32>
    %221 = math.tanh %220 : vector<8x128xf32>
    %222 = arith.mulf %218, %197 : vector<8x128xf32>
    %223 = arith.mulf %217, %221 : vector<8x128xf32>
    %224 = arith.addf %222, %223 : vector<8x128xf32>
    %225 = math.tanh %224 : vector<8x128xf32>
    %226 = arith.mulf %219, %225 : vector<8x128xf32>
    %227 = arith.index_cast %c7_i32 : i32 to index
    %c0_79 = arith.constant 0 : index
    %c0_80 = arith.constant 0 : index
    %228 = vector.load %arg7[%227, %c0_79, %c0_80] : memref<8x8x128xf32, #tpu.memory_space<vmem>>, vector<1x8x128xf32>
    %229 = vector.shape_cast %228 : vector<1x8x128xf32> to vector<8x128xf32>
    %230 = vector.shape_cast %226 : vector<8x128xf32> to vector<1x8x128xf32>
    tpu.vector_store %arg7[%227, %c0_79, %c0_80], %230 {strides = array<i32>} : memref<8x8x128xf32, #tpu.memory_space<vmem>>, vector<1x8x128xf32>,
    %c8_i32 = arith.constant 8 : i32
    %c0_81 = arith.constant 0 : index
    %c0_82 = arith.constant 0 : index
    %231 = vector.load %arg10[%c0_81, %c0_82] : memref<8x128xf32, #tpu.memory_space<vmem>>, vector<8x128xf32>
    tpu.vector_store %arg10[%c0_81, %c0_82], %226 {strides = array<i32>} : memref<8x128xf32, #tpu.memory_space<vmem>>, vector<8x128xf32>,
    %c0_83 = arith.constant 0 : index
    %c0_84 = arith.constant 0 : index
    %232 = vector.load %arg11[%c0_83, %c0_84] : memref<8x128xf32, #tpu.memory_space<vmem>>, vector<8x128xf32>
    tpu.vector_store %arg11[%c0_83, %c0_84], %224 {strides = array<i32>} : memref<8x128xf32, #tpu.memory_space<vmem>>, vector<8x128xf32>,
    %c0_i32_85 = arith.constant 0 : i32
    %233 = arith.cmpi eq, %arg0, %c0_i32_85 : i32
    %234 = arith.extui %233 : i1 to i32
    %c0_i32_86 = arith.constant 0 : i32
    %235 = arith.cmpi ne, %234, %c0_i32_86 : i32
    scf.if %235 {
      %c0_87 = arith.constant 0 : index
      %c0_88 = arith.constant 0 : index
      %236 = vector.load %arg5[%c0_87, %c0_88] : memref<128x128xf32, #tpu.memory_space<vmem>>, vector<128x128xf32>
      %cst_89 = arith.constant dense<0.000000e+00> : vector<8x128xf32>
      %237 = tpu.matmul %226, %236, %cst_89 {dimension_numbers = #tpu.dot_dimension_numbers<[1], [0], [0], [1], [0, 0, 1, 1], [], []>} : vector<8x128xf32>, vector<128x128xf32>, vector<8x128xf32> -> vector<8x128xf32>
      %c0_90 = arith.constant 0 : index
      %c0_91 = arith.constant 0 : index
      %238 = vector.load %arg6[%c0_90, %c0_91] : memref<1x128xf32, #tpu.memory_space<vmem>>, vector<1x128xf32>
      %239 = vector.broadcast %238 : vector<1x128xf32> to vector<8x128xf32>
      %240 = arith.addf %237, %239 : vector<8x128xf32>
      %c0_92 = arith.constant 0 : index
      %c0_93 = arith.constant 0 : index
      %241 = vector.load %arg8[%c0_92, %c0_93] : memref<8x128xf32, #tpu.memory_space<vmem>>, vector<8x128xf32>
      tpu.vector_store %arg8[%c0_92, %c0_93], %240 {strides = array<i32>} : memref<8x128xf32, #tpu.memory_space<vmem>>, vector<8x128xf32>,
    } else {
    }
    return
  }
  func.func @transform_0(%arg0: i32) -> (i32, i32, i32) {
    %c0_i32 = arith.constant 0 : i32
    %c0_i32_0 = arith.constant 0 : i32
    %c0_i32_1 = arith.constant 0 : i32
    return %arg0, %c0_i32, %c0_i32_0 : i32, i32, i32
  }
  func.func @transform_1(%arg0: i32) -> (i32, i32) {
    %c0_i32 = arith.constant 0 : i32
    %c0_i32_0 = arith.constant 0 : i32
    %c0_i32_1 = arith.constant 0 : i32
    return %c0_i32, %c0_i32_0 : i32, i32
  }
  func.func @transform_2(%arg0: i32) -> (i32, i32) {
    %c0_i32 = arith.constant 0 : i32
    %c0_i32_0 = arith.constant 0 : i32
    %c0_i32_1 = arith.constant 0 : i32
    return %c0_i32, %c0_i32_0 : i32, i32
  }
  func.func @transform_3(%arg0: i32) -> (i32, i32) {
    %c0_i32 = arith.constant 0 : i32
    %c0_i32_0 = arith.constant 0 : i32
    %c0_i32_1 = arith.constant 0 : i32
    return %c0_i32, %c0_i32_0 : i32, i32
  }
  func.func @transform_4(%arg0: i32) -> (i32, i32) {
    %c0_i32 = arith.constant 0 : i32
    %c0_i32_0 = arith.constant 0 : i32
    %c0_i32_1 = arith.constant 0 : i32
    return %c0_i32, %c0_i32_0 : i32, i32
  }
  func.func @transform_5(%arg0: i32) -> (i32, i32) {
    %c0_i32 = arith.constant 0 : i32
    %c0_i32_0 = arith.constant 0 : i32
    %c0_i32_1 = arith.constant 0 : i32
    return %c0_i32, %c0_i32_0 : i32, i32
  }
  func.func @transform_6(%arg0: i32) -> (i32, i32, i32) {
    %c0_i32 = arith.constant 0 : i32
    %c0_i32_0 = arith.constant 0 : i32
    %c0_i32_1 = arith.constant 0 : i32
    return %arg0, %c0_i32, %c0_i32_0 : i32, i32, i32
  }
  func.func @transform_7(%arg0: i32) -> (i32, i32) {
    %c0_i32 = arith.constant 0 : i32
    %c0_i32_0 = arith.constant 0 : i32
    %c0_i32_1 = arith.constant 0 : i32
    return %c0_i32, %c0_i32_0 : i32, i32
  }
}

module attributes {stable_mosaic.version = 11 : i64} {
  func.func @_lstm_layer_kernel(%arg0: i32, %arg1: memref<8x8x128xf32, #tpu.memory_space<vmem>>, %arg2: memref<128x512xf32, #tpu.memory_space<vmem>>, %arg3: memref<128x512xf32, #tpu.memory_space<vmem>>, %arg4: memref<1x512xf32, #tpu.memory_space<vmem>>, %arg5: memref<128x128xf32, #tpu.memory_space<vmem>>, %arg6: memref<1x128xf32, #tpu.memory_space<vmem>>, %arg7: memref<8x8x128xf32, #tpu.memory_space<vmem>>, %arg8: memref<8x128xf32, #tpu.memory_space<vmem>>, %arg9: memref<8x8x512xf32, #tpu.memory_space<vmem>>, %arg10: memref<8x128xf32, #tpu.memory_space<vmem>>, %arg11: memref<8x128xf32, #tpu.memory_space<vmem>>) attributes {dimension_semantics = [#tpu.dimension_semantics<arbitrary>], iteration_bounds = array<i64: 1>, scalar_prefetch = 0 : i64, scratch_operands = 3 : i64, tpu.core_type = #tpu.core_type<tc>, window_params = [{transform_indices = @transform_0, window_bounds = array<i64: 8, 8, 128>}, {pipeline_mode = #tpu.pipeline_mode<synchronous>, transform_indices = @transform_1, window_bounds = array<i64: 128, 512>}, {pipeline_mode = #tpu.pipeline_mode<synchronous>, transform_indices = @transform_2, window_bounds = array<i64: 128, 512>}, {pipeline_mode = #tpu.pipeline_mode<synchronous>, transform_indices = @transform_3, window_bounds = array<i64: 1, 512>}, {pipeline_mode = #tpu.pipeline_mode<synchronous>, transform_indices = @transform_4, window_bounds = array<i64: 128, 128>}, {pipeline_mode = #tpu.pipeline_mode<synchronous>, transform_indices = @transform_5, window_bounds = array<i64: 1, 128>}, {transform_indices = @transform_6, window_bounds = array<i64: 8, 8, 128>}, {pipeline_mode = #tpu.pipeline_mode<synchronous>, transform_indices = @transform_7, window_bounds = array<i64: 8, 128>}]} {
    %c0_i32 = arith.constant 0 : i32
    %0 = arith.cmpi eq, %arg0, %c0_i32 : i32
    %1 = arith.extui %0 : i1 to i32
    %c0_i32_0 = arith.constant 0 : i32
    %2 = arith.cmpi ne, %1, %c0_i32_0 : i32
    scf.if %2 {
      %cst_87 = arith.constant 0.000000e+00 : f32
      %236 = vector.broadcast %cst_87 : f32 to vector<8x128xf32>
      %c0_88 = arith.constant 0 : index
      %c0_89 = arith.constant 0 : index
      %237 = vector.load %arg10[%c0_88, %c0_89] : memref<8x128xf32, #tpu.memory_space<vmem>>, vector<8x128xf32>
      tpu.vector_store %arg10[%c0_88, %c0_89], %236 {strides = array<i32>} : memref<8x128xf32, #tpu.memory_space<vmem>>, vector<8x128xf32>,
      %cst_90 = arith.constant 0.000000e+00 : f32
      %238 = vector.broadcast %cst_90 : f32 to vector<8x128xf32>
      %c0_91 = arith.constant 0 : index
      %c0_92 = arith.constant 0 : index
      %239 = vector.load %arg11[%c0_91, %c0_92] : memref<8x128xf32, #tpu.memory_space<vmem>>, vector<8x128xf32>
      tpu.vector_store %arg11[%c0_91, %c0_92], %238 {strides = array<i32>} : memref<8x128xf32, #tpu.memory_space<vmem>>, vector<8x128xf32>,
    } else {
    }
    %c0 = arith.constant 0 : index
    %c0_1 = arith.constant 0 : index
    %c0_2 = arith.constant 0 : index
    %3 = vector.load %arg1[%c0, %c0_1, %c0_2] : memref<8x8x128xf32, #tpu.memory_space<vmem>>, vector<8x8x128xf32>
    %4 = vector.shape_cast %3 : vector<8x8x128xf32> to vector<64x128xf32>
    %c0_3 = arith.constant 0 : index
    %c0_4 = arith.constant 0 : index
    %5 = vector.load %arg2[%c0_3, %c0_4] : memref<128x512xf32, #tpu.memory_space<vmem>>, vector<128x512xf32>
    %cst = arith.constant dense<0.000000e+00> : vector<64x512xf32>
    %6 = tpu.matmul %4, %5, %cst {dimension_numbers = #tpu.dot_dimension_numbers<[1], [0], [0], [1], [0, 0, 1, 1], [], []>} : vector<64x128xf32>, vector<128x512xf32>, vector<64x512xf32> -> vector<64x512xf32>
    %c0_5 = arith.constant 0 : index
    %c0_6 = arith.constant 0 : index
    %7 = vector.load %arg4[%c0_5, %c0_6] : memref<1x512xf32, #tpu.memory_space<vmem>>, vector<1x512xf32>
    %8 = vector.broadcast %7 : vector<1x512xf32> to vector<64x512xf32>
    %9 = arith.addf %6, %8 : vector<64x512xf32>
    %10 = vector.shape_cast %9 : vector<64x512xf32> to vector<8x8x512xf32>
    %c0_7 = arith.constant 0 : index
    %c0_8 = arith.constant 0 : index
    %c0_9 = arith.constant 0 : index
    %11 = vector.load %arg9[%c0_7, %c0_8, %c0_9] : memref<8x8x512xf32, #tpu.memory_space<vmem>>, vector<8x8x512xf32>
    tpu.vector_store %arg9[%c0_7, %c0_8, %c0_9], %10 {strides = array<i32>} : memref<8x8x512xf32, #tpu.memory_space<vmem>>, vector<8x8x512xf32>,
    %c0_10 = arith.constant 0 : index
    %c0_11 = arith.constant 0 : index
    %12 = vector.load %arg3[%c0_10, %c0_11] : memref<128x512xf32, #tpu.memory_space<vmem>>, vector<128x512xf32>
    %c0_12 = arith.constant 0 : index
    %c0_13 = arith.constant 0 : index
    %13 = vector.load %arg10[%c0_12, %c0_13] : memref<8x128xf32, #tpu.memory_space<vmem>>, vector<8x128xf32>
    %c0_14 = arith.constant 0 : index
    %c0_15 = arith.constant 0 : index
    %14 = vector.load %arg11[%c0_14, %c0_15] : memref<8x128xf32, #tpu.memory_space<vmem>>, vector<8x128xf32>
    %c0_i32_16 = arith.constant 0 : i32
    %15 = arith.index_cast %c0_i32_16 : i32 to index
    %c0_17 = arith.constant 0 : index
    %c0_18 = arith.constant 0 : index
    %16 = vector.load %arg9[%15, %c0_17, %c0_18] : memref<8x8x512xf32, #tpu.memory_space<vmem>>, vector<1x8x512xf32>
    %17 = vector.shape_cast %16 : vector<1x8x512xf32> to vector<8x512xf32>
    %cst_19 = arith.constant dense<0.000000e+00> : vector<8x512xf32>
    %18 = tpu.matmul %13, %12, %cst_19 {dimension_numbers = #tpu.dot_dimension_numbers<[1], [0], [0], [1], [0, 0, 1, 1], [], []>} : vector<8x128xf32>, vector<128x512xf32>, vector<8x512xf32> -> vector<8x512xf32>
    %19 = arith.addf %17, %18 : vector<8x512xf32>
    %20 = vector.extract_strided_slice %19 {offsets = [0, 0], sizes = [8, 384], strides = [1, 1]} : vector<8x512xf32> to vector<8x384xf32>
    %cst_20 = arith.constant 5.000000e-01 : f32
    %21 = vector.broadcast %cst_20 : f32 to vector<8x384xf32>
    %22 = arith.mulf %21, %20 : vector<8x384xf32>
    %23 = math.tanh %22 : vector<8x384xf32>
    %cst_21 = arith.constant 1.000000e+00 : f32
    %24 = vector.broadcast %cst_21 : f32 to vector<8x384xf32>
    %25 = arith.addf %24, %23 : vector<8x384xf32>
    %cst_22 = arith.constant 5.000000e-01 : f32
    %26 = vector.broadcast %cst_22 : f32 to vector<8x384xf32>
    %27 = arith.mulf %26, %25 : vector<8x384xf32>
    %28 = vector.extract_strided_slice %27 {offsets = [0, 0], sizes = [8, 128], strides = [1, 1]} : vector<8x384xf32> to vector<8x128xf32>
    %29 = vector.extract_strided_slice %27 {offsets = [0, 128], sizes = [8, 128], strides = [1, 1]} : vector<8x384xf32> to vector<8x128xf32>
    %30 = vector.extract_strided_slice %27 {offsets = [0, 256], sizes = [8, 128], strides = [1, 1]} : vector<8x384xf32> to vector<8x128xf32>
    %31 = vector.extract_strided_slice %19 {offsets = [0, 384], sizes = [8, 128], strides = [1, 1]} : vector<8x512xf32> to vector<8x128xf32>
    %32 = math.tanh %31 : vector<8x128xf32>
    %33 = arith.mulf %29, %14 : vector<8x128xf32>
    %34 = arith.mulf %28, %32 : vector<8x128xf32>
    %35 = arith.addf %33, %34 : vector<8x128xf32>
    %36 = math.tanh %35 : vector<8x128xf32>
    %37 = arith.mulf %30, %36 : vector<8x128xf32>
    %38 = arith.index_cast %c0_i32_16 : i32 to index
    %c0_23 = arith.constant 0 : index
    %c0_24 = arith.constant 0 : index
    %39 = vector.load %arg7[%38, %c0_23, %c0_24] : memref<8x8x128xf32, #tpu.memory_space<vmem>>, vector<1x8x128xf32>
    %40 = vector.shape_cast %39 : vector<1x8x128xf32> to vector<8x128xf32>
    %41 = vector.shape_cast %37 : vector<8x128xf32> to vector<1x8x128xf32>
    tpu.vector_store %arg7[%38, %c0_23, %c0_24], %41 {strides = array<i32>} : memref<8x8x128xf32, #tpu.memory_space<vmem>>, vector<1x8x128xf32>,
    %c1_i32 = arith.constant 1 : i32
    %42 = arith.index_cast %c1_i32 : i32 to index
    %c0_25 = arith.constant 0 : index
    %c0_26 = arith.constant 0 : index
    %43 = vector.load %arg9[%42, %c0_25, %c0_26] : memref<8x8x512xf32, #tpu.memory_space<vmem>>, vector<1x8x512xf32>
    %44 = vector.shape_cast %43 : vector<1x8x512xf32> to vector<8x512xf32>
    %cst_27 = arith.constant dense<0.000000e+00> : vector<8x512xf32>
    %45 = tpu.matmul %37, %12, %cst_27 {dimension_numbers = #tpu.dot_dimension_numbers<[1], [0], [0], [1], [0, 0, 1, 1], [], []>} : vector<8x128xf32>, vector<128x512xf32>, vector<8x512xf32> -> vector<8x512xf32>
    %46 = arith.addf %44, %45 : vector<8x512xf32>
    %47 = vector.extract_strided_slice %46 {offsets = [0, 0], sizes = [8, 384], strides = [1, 1]} : vector<8x512xf32> to vector<8x384xf32>
    %cst_28 = arith.constant 5.000000e-01 : f32
    %48 = vector.broadcast %cst_28 : f32 to vector<8x384xf32>
    %49 = arith.mulf %48, %47 : vector<8x384xf32>
    %50 = math.tanh %49 : vector<8x384xf32>
    %cst_29 = arith.constant 1.000000e+00 : f32
    %51 = vector.broadcast %cst_29 : f32 to vector<8x384xf32>
    %52 = arith.addf %51, %50 : vector<8x384xf32>
    %cst_30 = arith.constant 5.000000e-01 : f32
    %53 = vector.broadcast %cst_30 : f32 to vector<8x384xf32>
    %54 = arith.mulf %53, %52 : vector<8x384xf32>
    %55 = vector.extract_strided_slice %54 {offsets = [0, 0], sizes = [8, 128], strides = [1, 1]} : vector<8x384xf32> to vector<8x128xf32>
    %56 = vector.extract_strided_slice %54 {offsets = [0, 128], sizes = [8, 128], strides = [1, 1]} : vector<8x384xf32> to vector<8x128xf32>
    %57 = vector.extract_strided_slice %54 {offsets = [0, 256], sizes = [8, 128], strides = [1, 1]} : vector<8x384xf32> to vector<8x128xf32>
    %58 = vector.extract_strided_slice %46 {offsets = [0, 384], sizes = [8, 128], strides = [1, 1]} : vector<8x512xf32> to vector<8x128xf32>
    %59 = math.tanh %58 : vector<8x128xf32>
    %60 = arith.mulf %56, %35 : vector<8x128xf32>
    %61 = arith.mulf %55, %59 : vector<8x128xf32>
    %62 = arith.addf %60, %61 : vector<8x128xf32>
    %63 = math.tanh %62 : vector<8x128xf32>
    %64 = arith.mulf %57, %63 : vector<8x128xf32>
    %65 = arith.index_cast %c1_i32 : i32 to index
    %c0_31 = arith.constant 0 : index
    %c0_32 = arith.constant 0 : index
    %66 = vector.load %arg7[%65, %c0_31, %c0_32] : memref<8x8x128xf32, #tpu.memory_space<vmem>>, vector<1x8x128xf32>
    %67 = vector.shape_cast %66 : vector<1x8x128xf32> to vector<8x128xf32>
    %68 = vector.shape_cast %64 : vector<8x128xf32> to vector<1x8x128xf32>
    tpu.vector_store %arg7[%65, %c0_31, %c0_32], %68 {strides = array<i32>} : memref<8x8x128xf32, #tpu.memory_space<vmem>>, vector<1x8x128xf32>,
    %c2_i32 = arith.constant 2 : i32
    %69 = arith.index_cast %c2_i32 : i32 to index
    %c0_33 = arith.constant 0 : index
    %c0_34 = arith.constant 0 : index
    %70 = vector.load %arg9[%69, %c0_33, %c0_34] : memref<8x8x512xf32, #tpu.memory_space<vmem>>, vector<1x8x512xf32>
    %71 = vector.shape_cast %70 : vector<1x8x512xf32> to vector<8x512xf32>
    %cst_35 = arith.constant dense<0.000000e+00> : vector<8x512xf32>
    %72 = tpu.matmul %64, %12, %cst_35 {dimension_numbers = #tpu.dot_dimension_numbers<[1], [0], [0], [1], [0, 0, 1, 1], [], []>} : vector<8x128xf32>, vector<128x512xf32>, vector<8x512xf32> -> vector<8x512xf32>
    %73 = arith.addf %71, %72 : vector<8x512xf32>
    %74 = vector.extract_strided_slice %73 {offsets = [0, 0], sizes = [8, 384], strides = [1, 1]} : vector<8x512xf32> to vector<8x384xf32>
    %cst_36 = arith.constant 5.000000e-01 : f32
    %75 = vector.broadcast %cst_36 : f32 to vector<8x384xf32>
    %76 = arith.mulf %75, %74 : vector<8x384xf32>
    %77 = math.tanh %76 : vector<8x384xf32>
    %cst_37 = arith.constant 1.000000e+00 : f32
    %78 = vector.broadcast %cst_37 : f32 to vector<8x384xf32>
    %79 = arith.addf %78, %77 : vector<8x384xf32>
    %cst_38 = arith.constant 5.000000e-01 : f32
    %80 = vector.broadcast %cst_38 : f32 to vector<8x384xf32>
    %81 = arith.mulf %80, %79 : vector<8x384xf32>
    %82 = vector.extract_strided_slice %81 {offsets = [0, 0], sizes = [8, 128], strides = [1, 1]} : vector<8x384xf32> to vector<8x128xf32>
    %83 = vector.extract_strided_slice %81 {offsets = [0, 128], sizes = [8, 128], strides = [1, 1]} : vector<8x384xf32> to vector<8x128xf32>
    %84 = vector.extract_strided_slice %81 {offsets = [0, 256], sizes = [8, 128], strides = [1, 1]} : vector<8x384xf32> to vector<8x128xf32>
    %85 = vector.extract_strided_slice %73 {offsets = [0, 384], sizes = [8, 128], strides = [1, 1]} : vector<8x512xf32> to vector<8x128xf32>
    %86 = math.tanh %85 : vector<8x128xf32>
    %87 = arith.mulf %83, %62 : vector<8x128xf32>
    %88 = arith.mulf %82, %86 : vector<8x128xf32>
    %89 = arith.addf %87, %88 : vector<8x128xf32>
    %90 = math.tanh %89 : vector<8x128xf32>
    %91 = arith.mulf %84, %90 : vector<8x128xf32>
    %92 = arith.index_cast %c2_i32 : i32 to index
    %c0_39 = arith.constant 0 : index
    %c0_40 = arith.constant 0 : index
    %93 = vector.load %arg7[%92, %c0_39, %c0_40] : memref<8x8x128xf32, #tpu.memory_space<vmem>>, vector<1x8x128xf32>
    %94 = vector.shape_cast %93 : vector<1x8x128xf32> to vector<8x128xf32>
    %95 = vector.shape_cast %91 : vector<8x128xf32> to vector<1x8x128xf32>
    tpu.vector_store %arg7[%92, %c0_39, %c0_40], %95 {strides = array<i32>} : memref<8x8x128xf32, #tpu.memory_space<vmem>>, vector<1x8x128xf32>,
    %c3_i32 = arith.constant 3 : i32
    %96 = arith.index_cast %c3_i32 : i32 to index
    %c0_41 = arith.constant 0 : index
    %c0_42 = arith.constant 0 : index
    %97 = vector.load %arg9[%96, %c0_41, %c0_42] : memref<8x8x512xf32, #tpu.memory_space<vmem>>, vector<1x8x512xf32>
    %98 = vector.shape_cast %97 : vector<1x8x512xf32> to vector<8x512xf32>
    %cst_43 = arith.constant dense<0.000000e+00> : vector<8x512xf32>
    %99 = tpu.matmul %91, %12, %cst_43 {dimension_numbers = #tpu.dot_dimension_numbers<[1], [0], [0], [1], [0, 0, 1, 1], [], []>} : vector<8x128xf32>, vector<128x512xf32>, vector<8x512xf32> -> vector<8x512xf32>
    %100 = arith.addf %98, %99 : vector<8x512xf32>
    %101 = vector.extract_strided_slice %100 {offsets = [0, 0], sizes = [8, 384], strides = [1, 1]} : vector<8x512xf32> to vector<8x384xf32>
    %cst_44 = arith.constant 5.000000e-01 : f32
    %102 = vector.broadcast %cst_44 : f32 to vector<8x384xf32>
    %103 = arith.mulf %102, %101 : vector<8x384xf32>
    %104 = math.tanh %103 : vector<8x384xf32>
    %cst_45 = arith.constant 1.000000e+00 : f32
    %105 = vector.broadcast %cst_45 : f32 to vector<8x384xf32>
    %106 = arith.addf %105, %104 : vector<8x384xf32>
    %cst_46 = arith.constant 5.000000e-01 : f32
    %107 = vector.broadcast %cst_46 : f32 to vector<8x384xf32>
    %108 = arith.mulf %107, %106 : vector<8x384xf32>
    %109 = vector.extract_strided_slice %108 {offsets = [0, 0], sizes = [8, 128], strides = [1, 1]} : vector<8x384xf32> to vector<8x128xf32>
    %110 = vector.extract_strided_slice %108 {offsets = [0, 128], sizes = [8, 128], strides = [1, 1]} : vector<8x384xf32> to vector<8x128xf32>
    %111 = vector.extract_strided_slice %108 {offsets = [0, 256], sizes = [8, 128], strides = [1, 1]} : vector<8x384xf32> to vector<8x128xf32>
    %112 = vector.extract_strided_slice %100 {offsets = [0, 384], sizes = [8, 128], strides = [1, 1]} : vector<8x512xf32> to vector<8x128xf32>
    %113 = math.tanh %112 : vector<8x128xf32>
    %114 = arith.mulf %110, %89 : vector<8x128xf32>
    %115 = arith.mulf %109, %113 : vector<8x128xf32>
    %116 = arith.addf %114, %115 : vector<8x128xf32>
    %117 = math.tanh %116 : vector<8x128xf32>
    %118 = arith.mulf %111, %117 : vector<8x128xf32>
    %119 = arith.index_cast %c3_i32 : i32 to index
    %c0_47 = arith.constant 0 : index
    %c0_48 = arith.constant 0 : index
    %120 = vector.load %arg7[%119, %c0_47, %c0_48] : memref<8x8x128xf32, #tpu.memory_space<vmem>>, vector<1x8x128xf32>
    %121 = vector.shape_cast %120 : vector<1x8x128xf32> to vector<8x128xf32>
    %122 = vector.shape_cast %118 : vector<8x128xf32> to vector<1x8x128xf32>
    tpu.vector_store %arg7[%119, %c0_47, %c0_48], %122 {strides = array<i32>} : memref<8x8x128xf32, #tpu.memory_space<vmem>>, vector<1x8x128xf32>,
    %c4_i32 = arith.constant 4 : i32
    %123 = arith.index_cast %c4_i32 : i32 to index
    %c0_49 = arith.constant 0 : index
    %c0_50 = arith.constant 0 : index
    %124 = vector.load %arg9[%123, %c0_49, %c0_50] : memref<8x8x512xf32, #tpu.memory_space<vmem>>, vector<1x8x512xf32>
    %125 = vector.shape_cast %124 : vector<1x8x512xf32> to vector<8x512xf32>
    %cst_51 = arith.constant dense<0.000000e+00> : vector<8x512xf32>
    %126 = tpu.matmul %118, %12, %cst_51 {dimension_numbers = #tpu.dot_dimension_numbers<[1], [0], [0], [1], [0, 0, 1, 1], [], []>} : vector<8x128xf32>, vector<128x512xf32>, vector<8x512xf32> -> vector<8x512xf32>
    %127 = arith.addf %125, %126 : vector<8x512xf32>
    %128 = vector.extract_strided_slice %127 {offsets = [0, 0], sizes = [8, 384], strides = [1, 1]} : vector<8x512xf32> to vector<8x384xf32>
    %cst_52 = arith.constant 5.000000e-01 : f32
    %129 = vector.broadcast %cst_52 : f32 to vector<8x384xf32>
    %130 = arith.mulf %129, %128 : vector<8x384xf32>
    %131 = math.tanh %130 : vector<8x384xf32>
    %cst_53 = arith.constant 1.000000e+00 : f32
    %132 = vector.broadcast %cst_53 : f32 to vector<8x384xf32>
    %133 = arith.addf %132, %131 : vector<8x384xf32>
    %cst_54 = arith.constant 5.000000e-01 : f32
    %134 = vector.broadcast %cst_54 : f32 to vector<8x384xf32>
    %135 = arith.mulf %134, %133 : vector<8x384xf32>
    %136 = vector.extract_strided_slice %135 {offsets = [0, 0], sizes = [8, 128], strides = [1, 1]} : vector<8x384xf32> to vector<8x128xf32>
    %137 = vector.extract_strided_slice %135 {offsets = [0, 128], sizes = [8, 128], strides = [1, 1]} : vector<8x384xf32> to vector<8x128xf32>
    %138 = vector.extract_strided_slice %135 {offsets = [0, 256], sizes = [8, 128], strides = [1, 1]} : vector<8x384xf32> to vector<8x128xf32>
    %139 = vector.extract_strided_slice %127 {offsets = [0, 384], sizes = [8, 128], strides = [1, 1]} : vector<8x512xf32> to vector<8x128xf32>
    %140 = math.tanh %139 : vector<8x128xf32>
    %141 = arith.mulf %137, %116 : vector<8x128xf32>
    %142 = arith.mulf %136, %140 : vector<8x128xf32>
    %143 = arith.addf %141, %142 : vector<8x128xf32>
    %144 = math.tanh %143 : vector<8x128xf32>
    %145 = arith.mulf %138, %144 : vector<8x128xf32>
    %146 = arith.index_cast %c4_i32 : i32 to index
    %c0_55 = arith.constant 0 : index
    %c0_56 = arith.constant 0 : index
    %147 = vector.load %arg7[%146, %c0_55, %c0_56] : memref<8x8x128xf32, #tpu.memory_space<vmem>>, vector<1x8x128xf32>
    %148 = vector.shape_cast %147 : vector<1x8x128xf32> to vector<8x128xf32>
    %149 = vector.shape_cast %145 : vector<8x128xf32> to vector<1x8x128xf32>
    tpu.vector_store %arg7[%146, %c0_55, %c0_56], %149 {strides = array<i32>} : memref<8x8x128xf32, #tpu.memory_space<vmem>>, vector<1x8x128xf32>,
    %c5_i32 = arith.constant 5 : i32
    %150 = arith.index_cast %c5_i32 : i32 to index
    %c0_57 = arith.constant 0 : index
    %c0_58 = arith.constant 0 : index
    %151 = vector.load %arg9[%150, %c0_57, %c0_58] : memref<8x8x512xf32, #tpu.memory_space<vmem>>, vector<1x8x512xf32>
    %152 = vector.shape_cast %151 : vector<1x8x512xf32> to vector<8x512xf32>
    %cst_59 = arith.constant dense<0.000000e+00> : vector<8x512xf32>
    %153 = tpu.matmul %145, %12, %cst_59 {dimension_numbers = #tpu.dot_dimension_numbers<[1], [0], [0], [1], [0, 0, 1, 1], [], []>} : vector<8x128xf32>, vector<128x512xf32>, vector<8x512xf32> -> vector<8x512xf32>
    %154 = arith.addf %152, %153 : vector<8x512xf32>
    %155 = vector.extract_strided_slice %154 {offsets = [0, 0], sizes = [8, 384], strides = [1, 1]} : vector<8x512xf32> to vector<8x384xf32>
    %cst_60 = arith.constant 5.000000e-01 : f32
    %156 = vector.broadcast %cst_60 : f32 to vector<8x384xf32>
    %157 = arith.mulf %156, %155 : vector<8x384xf32>
    %158 = math.tanh %157 : vector<8x384xf32>
    %cst_61 = arith.constant 1.000000e+00 : f32
    %159 = vector.broadcast %cst_61 : f32 to vector<8x384xf32>
    %160 = arith.addf %159, %158 : vector<8x384xf32>
    %cst_62 = arith.constant 5.000000e-01 : f32
    %161 = vector.broadcast %cst_62 : f32 to vector<8x384xf32>
    %162 = arith.mulf %161, %160 : vector<8x384xf32>
    %163 = vector.extract_strided_slice %162 {offsets = [0, 0], sizes = [8, 128], strides = [1, 1]} : vector<8x384xf32> to vector<8x128xf32>
    %164 = vector.extract_strided_slice %162 {offsets = [0, 128], sizes = [8, 128], strides = [1, 1]} : vector<8x384xf32> to vector<8x128xf32>
    %165 = vector.extract_strided_slice %162 {offsets = [0, 256], sizes = [8, 128], strides = [1, 1]} : vector<8x384xf32> to vector<8x128xf32>
    %166 = vector.extract_strided_slice %154 {offsets = [0, 384], sizes = [8, 128], strides = [1, 1]} : vector<8x512xf32> to vector<8x128xf32>
    %167 = math.tanh %166 : vector<8x128xf32>
    %168 = arith.mulf %164, %143 : vector<8x128xf32>
    %169 = arith.mulf %163, %167 : vector<8x128xf32>
    %170 = arith.addf %168, %169 : vector<8x128xf32>
    %171 = math.tanh %170 : vector<8x128xf32>
    %172 = arith.mulf %165, %171 : vector<8x128xf32>
    %173 = arith.index_cast %c5_i32 : i32 to index
    %c0_63 = arith.constant 0 : index
    %c0_64 = arith.constant 0 : index
    %174 = vector.load %arg7[%173, %c0_63, %c0_64] : memref<8x8x128xf32, #tpu.memory_space<vmem>>, vector<1x8x128xf32>
    %175 = vector.shape_cast %174 : vector<1x8x128xf32> to vector<8x128xf32>
    %176 = vector.shape_cast %172 : vector<8x128xf32> to vector<1x8x128xf32>
    tpu.vector_store %arg7[%173, %c0_63, %c0_64], %176 {strides = array<i32>} : memref<8x8x128xf32, #tpu.memory_space<vmem>>, vector<1x8x128xf32>,
    %c6_i32 = arith.constant 6 : i32
    %177 = arith.index_cast %c6_i32 : i32 to index
    %c0_65 = arith.constant 0 : index
    %c0_66 = arith.constant 0 : index
    %178 = vector.load %arg9[%177, %c0_65, %c0_66] : memref<8x8x512xf32, #tpu.memory_space<vmem>>, vector<1x8x512xf32>
    %179 = vector.shape_cast %178 : vector<1x8x512xf32> to vector<8x512xf32>
    %cst_67 = arith.constant dense<0.000000e+00> : vector<8x512xf32>
    %180 = tpu.matmul %172, %12, %cst_67 {dimension_numbers = #tpu.dot_dimension_numbers<[1], [0], [0], [1], [0, 0, 1, 1], [], []>} : vector<8x128xf32>, vector<128x512xf32>, vector<8x512xf32> -> vector<8x512xf32>
    %181 = arith.addf %179, %180 : vector<8x512xf32>
    %182 = vector.extract_strided_slice %181 {offsets = [0, 0], sizes = [8, 384], strides = [1, 1]} : vector<8x512xf32> to vector<8x384xf32>
    %cst_68 = arith.constant 5.000000e-01 : f32
    %183 = vector.broadcast %cst_68 : f32 to vector<8x384xf32>
    %184 = arith.mulf %183, %182 : vector<8x384xf32>
    %185 = math.tanh %184 : vector<8x384xf32>
    %cst_69 = arith.constant 1.000000e+00 : f32
    %186 = vector.broadcast %cst_69 : f32 to vector<8x384xf32>
    %187 = arith.addf %186, %185 : vector<8x384xf32>
    %cst_70 = arith.constant 5.000000e-01 : f32
    %188 = vector.broadcast %cst_70 : f32 to vector<8x384xf32>
    %189 = arith.mulf %188, %187 : vector<8x384xf32>
    %190 = vector.extract_strided_slice %189 {offsets = [0, 0], sizes = [8, 128], strides = [1, 1]} : vector<8x384xf32> to vector<8x128xf32>
    %191 = vector.extract_strided_slice %189 {offsets = [0, 128], sizes = [8, 128], strides = [1, 1]} : vector<8x384xf32> to vector<8x128xf32>
    %192 = vector.extract_strided_slice %189 {offsets = [0, 256], sizes = [8, 128], strides = [1, 1]} : vector<8x384xf32> to vector<8x128xf32>
    %193 = vector.extract_strided_slice %181 {offsets = [0, 384], sizes = [8, 128], strides = [1, 1]} : vector<8x512xf32> to vector<8x128xf32>
    %194 = math.tanh %193 : vector<8x128xf32>
    %195 = arith.mulf %191, %170 : vector<8x128xf32>
    %196 = arith.mulf %190, %194 : vector<8x128xf32>
    %197 = arith.addf %195, %196 : vector<8x128xf32>
    %198 = math.tanh %197 : vector<8x128xf32>
    %199 = arith.mulf %192, %198 : vector<8x128xf32>
    %200 = arith.index_cast %c6_i32 : i32 to index
    %c0_71 = arith.constant 0 : index
    %c0_72 = arith.constant 0 : index
    %201 = vector.load %arg7[%200, %c0_71, %c0_72] : memref<8x8x128xf32, #tpu.memory_space<vmem>>, vector<1x8x128xf32>
    %202 = vector.shape_cast %201 : vector<1x8x128xf32> to vector<8x128xf32>
    %203 = vector.shape_cast %199 : vector<8x128xf32> to vector<1x8x128xf32>
    tpu.vector_store %arg7[%200, %c0_71, %c0_72], %203 {strides = array<i32>} : memref<8x8x128xf32, #tpu.memory_space<vmem>>, vector<1x8x128xf32>,
    %c7_i32 = arith.constant 7 : i32
    %204 = arith.index_cast %c7_i32 : i32 to index
    %c0_73 = arith.constant 0 : index
    %c0_74 = arith.constant 0 : index
    %205 = vector.load %arg9[%204, %c0_73, %c0_74] : memref<8x8x512xf32, #tpu.memory_space<vmem>>, vector<1x8x512xf32>
    %206 = vector.shape_cast %205 : vector<1x8x512xf32> to vector<8x512xf32>
    %cst_75 = arith.constant dense<0.000000e+00> : vector<8x512xf32>
    %207 = tpu.matmul %199, %12, %cst_75 {dimension_numbers = #tpu.dot_dimension_numbers<[1], [0], [0], [1], [0, 0, 1, 1], [], []>} : vector<8x128xf32>, vector<128x512xf32>, vector<8x512xf32> -> vector<8x512xf32>
    %208 = arith.addf %206, %207 : vector<8x512xf32>
    %209 = vector.extract_strided_slice %208 {offsets = [0, 0], sizes = [8, 384], strides = [1, 1]} : vector<8x512xf32> to vector<8x384xf32>
    %cst_76 = arith.constant 5.000000e-01 : f32
    %210 = vector.broadcast %cst_76 : f32 to vector<8x384xf32>
    %211 = arith.mulf %210, %209 : vector<8x384xf32>
    %212 = math.tanh %211 : vector<8x384xf32>
    %cst_77 = arith.constant 1.000000e+00 : f32
    %213 = vector.broadcast %cst_77 : f32 to vector<8x384xf32>
    %214 = arith.addf %213, %212 : vector<8x384xf32>
    %cst_78 = arith.constant 5.000000e-01 : f32
    %215 = vector.broadcast %cst_78 : f32 to vector<8x384xf32>
    %216 = arith.mulf %215, %214 : vector<8x384xf32>
    %217 = vector.extract_strided_slice %216 {offsets = [0, 0], sizes = [8, 128], strides = [1, 1]} : vector<8x384xf32> to vector<8x128xf32>
    %218 = vector.extract_strided_slice %216 {offsets = [0, 128], sizes = [8, 128], strides = [1, 1]} : vector<8x384xf32> to vector<8x128xf32>
    %219 = vector.extract_strided_slice %216 {offsets = [0, 256], sizes = [8, 128], strides = [1, 1]} : vector<8x384xf32> to vector<8x128xf32>
    %220 = vector.extract_strided_slice %208 {offsets = [0, 384], sizes = [8, 128], strides = [1, 1]} : vector<8x512xf32> to vector<8x128xf32>
    %221 = math.tanh %220 : vector<8x128xf32>
    %222 = arith.mulf %218, %197 : vector<8x128xf32>
    %223 = arith.mulf %217, %221 : vector<8x128xf32>
    %224 = arith.addf %222, %223 : vector<8x128xf32>
    %225 = math.tanh %224 : vector<8x128xf32>
    %226 = arith.mulf %219, %225 : vector<8x128xf32>
    %227 = arith.index_cast %c7_i32 : i32 to index
    %c0_79 = arith.constant 0 : index
    %c0_80 = arith.constant 0 : index
    %228 = vector.load %arg7[%227, %c0_79, %c0_80] : memref<8x8x128xf32, #tpu.memory_space<vmem>>, vector<1x8x128xf32>
    %229 = vector.shape_cast %228 : vector<1x8x128xf32> to vector<8x128xf32>
    %230 = vector.shape_cast %226 : vector<8x128xf32> to vector<1x8x128xf32>
    tpu.vector_store %arg7[%227, %c0_79, %c0_80], %230 {strides = array<i32>} : memref<8x8x128xf32, #tpu.memory_space<vmem>>, vector<1x8x128xf32>,
    %c8_i32 = arith.constant 8 : i32
    %c0_81 = arith.constant 0 : index
    %c0_82 = arith.constant 0 : index
    %231 = vector.load %arg10[%c0_81, %c0_82] : memref<8x128xf32, #tpu.memory_space<vmem>>, vector<8x128xf32>
    tpu.vector_store %arg10[%c0_81, %c0_82], %226 {strides = array<i32>} : memref<8x128xf32, #tpu.memory_space<vmem>>, vector<8x128xf32>,
    %c0_83 = arith.constant 0 : index
    %c0_84 = arith.constant 0 : index
    %232 = vector.load %arg11[%c0_83, %c0_84] : memref<8x128xf32, #tpu.memory_space<vmem>>, vector<8x128xf32>
    tpu.vector_store %arg11[%c0_83, %c0_84], %224 {strides = array<i32>} : memref<8x128xf32, #tpu.memory_space<vmem>>, vector<8x128xf32>,
    %c0_i32_85 = arith.constant 0 : i32
    %233 = arith.cmpi eq, %arg0, %c0_i32_85 : i32
    %234 = arith.extui %233 : i1 to i32
    %c0_i32_86 = arith.constant 0 : i32
    %235 = arith.cmpi ne, %234, %c0_i32_86 : i32
    scf.if %235 {
      %c0_87 = arith.constant 0 : index
      %c0_88 = arith.constant 0 : index
      %236 = vector.load %arg5[%c0_87, %c0_88] : memref<128x128xf32, #tpu.memory_space<vmem>>, vector<128x128xf32>
      %cst_89 = arith.constant dense<0.000000e+00> : vector<8x128xf32>
      %237 = tpu.matmul %226, %236, %cst_89 {dimension_numbers = #tpu.dot_dimension_numbers<[1], [0], [0], [1], [0, 0, 1, 1], [], []>} : vector<8x128xf32>, vector<128x128xf32>, vector<8x128xf32> -> vector<8x128xf32>
      %c0_90 = arith.constant 0 : index
      %c0_91 = arith.constant 0 : index
      %238 = vector.load %arg6[%c0_90, %c0_91] : memref<1x128xf32, #tpu.memory_space<vmem>>, vector<1x128xf32>
      %239 = vector.broadcast %238 : vector<1x128xf32> to vector<8x128xf32>
      %240 = arith.addf %237, %239 : vector<8x128xf32>
      %c0_92 = arith.constant 0 : index
      %c0_93 = arith.constant 0 : index
      %241 = vector.load %arg8[%c0_92, %c0_93] : memref<8x128xf32, #tpu.memory_space<vmem>>, vector<8x128xf32>
      tpu.vector_store %arg8[%c0_92, %c0_93], %240 {strides = array<i32>} : memref<8x128xf32, #tpu.memory_space<vmem>>, vector<8x128xf32>,
    } else {
    }
    return
  }
  func.func @transform_0(%arg0: i32) -> (i32, i32, i32) {
    %c0_i32 = arith.constant 0 : i32
    %c0_i32_0 = arith.constant 0 : i32
    %c0_i32_1 = arith.constant 0 : i32
    return %arg0, %c0_i32, %c0_i32_0 : i32, i32, i32
  }
  func.func @transform_1(%arg0: i32) -> (i32, i32) {
    %c0_i32 = arith.constant 0 : i32
    %c0_i32_0 = arith.constant 0 : i32
    %c0_i32_1 = arith.constant 0 : i32
    return %c0_i32, %c0_i32_0 : i32, i32
  }
  func.func @transform_2(%arg0: i32) -> (i32, i32) {
    %c0_i32 = arith.constant 0 : i32
    %c0_i32_0 = arith.constant 0 : i32
    %c0_i32_1 = arith.constant 0 : i32
    return %c0_i32, %c0_i32_0 : i32, i32
  }
  func.func @transform_3(%arg0: i32) -> (i32, i32) {
    %c0_i32 = arith.constant 0 : i32
    %c0_i32_0 = arith.constant 0 : i32
    %c0_i32_1 = arith.constant 0 : i32
    return %c0_i32, %c0_i32_0 : i32, i32
  }
  func.func @transform_4(%arg0: i32) -> (i32, i32) {
    %c0_i32 = arith.constant 0 : i32
    %c0_i32_0 = arith.constant 0 : i32
    %c0_i32_1 = arith.constant 0 : i32
    return %c0_i32, %c0_i32_0 : i32, i32
  }
  func.func @transform_5(%arg0: i32) -> (i32, i32) {
    %c0_i32 = arith.constant 0 : i32
    %c0_i32_0 = arith.constant 0 : i32
    %c0_i32_1 = arith.constant 0 : i32
    return %c0_i32, %c0_i32_0 : i32, i32
  }
  func.func @transform_6(%arg0: i32) -> (i32, i32, i32) {
    %c0_i32 = arith.constant 0 : i32
    %c0_i32_0 = arith.constant 0 : i32
    %c0_i32_1 = arith.constant 0 : i32
    return %arg0, %c0_i32, %c0_i32_0 : i32, i32, i32
  }
  func.func @transform_7(%arg0: i32) -> (i32, i32) {
    %c0_i32 = arith.constant 0 : i32
    %c0_i32_0 = arith.constant 0 : i32
    %c0_i32_1 = arith.constant 0 : i32
    return %c0_i32, %c0_i32_0 : i32, i32
  }
}

</mosaic_0001>

<bundles_post_ra>
// kernel: lstm_model_forward.3
= control target key start
LH: loop header
LB: loop body
LE: loop exit
PB: predicated region body
PF: predicated region fallthrough
CT: control target
= control target key end

     0   :  { %13 = vsyncpa [#allocation6], 0  ;;  %s2621_s0 = inlined_call_operand.vmem [shape: f32[8,8,128], index: 0, kind: input, shape index: {}]   ;;  %s2622_s1 = inlined_call_operand.hbm [shape: f32[128,512], index: 1, kind: input, shape index: {}]   ;;  %s2623_s2 = inlined_call_operand.hbm [shape: f32[128,512], index: 2, kind: input, shape index: {}]   ;;  %s2624_s3 = inlined_call_operand.vmem [shape: f32[1,512], index: 3, kind: input, shape index: {}]   ;;  %s2625_s4 = inlined_call_operand.hbm [shape: f32[128,128], index: 4, kind: input, shape index: {}]   ;;  %s2626_s5 = inlined_call_operand.vmem [shape: f32[1,128], index: 5, kind: input, shape index: {}]   ;;  %s2627_s6 = inlined_call_operand.hbm [shape: f32[8,8,128], index: 6, kind: output, shape index: {0}]   ;;  %s2628_s7 = inlined_call_operand.vmem [shape: f32[8,128], index: 7, kind: output, shape index: {1}]  }
   0x1   :  { %14 = vsyncpa [#allocation9], 0 }
   0x2   :  { %15 = vsyncpa [#allocation7], 0  ;;  %s35_s26 = sshll.u32 %s2623_s2, 4  ;;  %s1619_s27 = smov [#allocation8]   ;;  %s36_s26 = int_to_ptr.hbm [resolvable:$true] %s35_s26 }
   0x3   :  { %s37_s28 = sshll.u32 %s1619_s27, 4  ;;  %s22_s8 = sshll.u32 %s2622_s1, 4  ;;  %s38_s28 = int_to_ptr.vmem [resolvable:$true] %s37_s28  ;;  %s23_s8 = int_to_ptr.hbm [resolvable:$true] %s22_s8 }
   0x4   :  { %s1620_s9 = smov 512   ;;  %s1621_s10 = smov 32  }
   0x5   :  { %43 = dma.hbm_to_vmem [thread:$0]  %s36_s26, 8192, %s38_s28, [#allocation9], %s1620_s9, %s1620_s9, %s1621_s10  }
   0x6   :  { %s1622_s11 = smov [#allocation5]   ;;  %s50_s15 = sshll.u32 %s2625_s4, 4  ;;  %s51_s15 = int_to_ptr.hbm [resolvable:$true] %s50_s15 }
   0x7   :  { %s24_s12 = sshll.u32 %s1622_s11, 4  ;;  %s1623_s2 = smov [#allocation10]   ;;  %s25_s12 = int_to_ptr.vmem [resolvable:$true] %s24_s12 }
   0x8   :  { %30 = dma.hbm_to_vmem [thread:$0]  %s23_s8, 8192, %s25_s12, [#allocation6], %s1620_s9, %s1620_s9, %s1621_s10  }
   0x9   :  { %s52_s16 = sshll.u32 %s1623_s2, 4  ;;  %s1624_s17 = smov 128   ;;  %s53_s16 = int_to_ptr.vmem [resolvable:$true] %s52_s16 }
   0xa   :  { %s1625_s18 = smov 8  }
   0xb   :  { %58 = dma.hbm_to_vmem [thread:$0]  %s51_s15, 2048, %s53_s16, [#allocation9], %s1624_s17, %s1624_s17, %s1625_s18  }
   0xc   :  { %1613 = dma.done.wait [#allocation6], 8192  }
   0xd   :  { %1614 = vsyncadd [#allocation6], 4294959104 }
   0xe   :  { %1615 = dma.done.wait [#allocation9], 10240  }
   0xf   :  { %1616 = vsyncadd [#allocation9], 4294957056  ;;  %v147_v0 = vld [vmem:[#allocation5 + $0x1e0] sm:$0xff]  ;;  %v148_v1 = vld [vmem:[#allocation5 + $0x1e8] sm:$0xff]  ;;  %s1345_s14 = sshll.u32 %s2627_s6, 4  ;;  %s1346_s14 = int_to_ptr.hbm [resolvable:$true] %s1345_s14 }
  0x10   :  { %v149_v2 = vld [vmem:[#allocation5 + $0x1f0] sm:$0xff]  ;;  %161 = vmatpush.msra.mxu0 %v147_v0  ;;  %202 = vmatpush.msra.mxu1 %v148_v1  ;;  %v150_v3 = vld [vmem:[#allocation5 + $0x1f8] sm:$0xff]  ;;  %v143_v4 = vld [vmem:[#allocation5 + $0x1c0] sm:$0xff] }
  0x11   :  { %v144_v5 = vld [vmem:[#allocation5 + $0x1c8] sm:$0xff]  ;;  %243 = vmatpush.msra.mxu2 %v149_v2  ;;  %284 = vmatpush.msra.mxu3 %v150_v3  ;;  %v145_v6 = vld [vmem:[#allocation5 + $0x1d0] sm:$0xff]  ;;  %v146_v7 = vld [vmem:[#allocation5 + $0x1d8] sm:$0xff] }
  0x12   :  { %v139_v8 = vld [vmem:[#allocation5 + $0x1a0] sm:$0xff]  ;;  %162 = vmatpush.msra.mxu0 %v143_v4  ;;  %203 = vmatpush.msra.mxu1 %v144_v5  ;;  %v140_v9 = vld [vmem:[#allocation5 + $0x1a8] sm:$0xff]  ;;  %v141_v10 = vld [vmem:[#allocation5 + $0x1b0] sm:$0xff] }
  0x13   :  { %v142_v11 = vld [vmem:[#allocation5 + $0x1b8] sm:$0xff]  ;;  %244 = vmatpush.msra.mxu2 %v145_v6  ;;  %285 = vmatpush.msra.mxu3 %v146_v7  ;;  %v135_v12 = vld [vmem:[#allocation5 + $0x180] sm:$0xff]  ;;  %v136_v13 = vld [vmem:[#allocation5 + $0x188] sm:$0xff] }
  0x14   :  { %163 = vmatpush.msra.mxu0 %v139_v8  ;;  %204 = vmatpush.msra.mxu1 %v140_v9  ;;  %v137_v14 = vld [vmem:[#allocation5 + $0x190] sm:$0xff]  ;;  %v138_v15 = vld [vmem:[#allocation5 + $0x198] sm:$0xff]  ;;  %v131_v16 = vld [vmem:[#allocation5 + $0x160] sm:$0xff] }
  0x15   :  { %245 = vmatpush.msra.mxu2 %v141_v10  ;;  %286 = vmatpush.msra.mxu3 %v142_v11  ;;  %v132_v17 = vld [vmem:[#allocation5 + $0x168] sm:$0xff]  ;;  %v133_v18 = vld [vmem:[#allocation5 + $0x170] sm:$0xff]  ;;  %v134_v19 = vld [vmem:[#allocation5 + $0x178] sm:$0xff] }
  0x16   :  { %164 = vmatpush.msra.mxu0 %v135_v12  ;;  %205 = vmatpush.msra.mxu1 %v136_v13  ;;  %v127_v20 = vld [vmem:[#allocation5 + $0x140] sm:$0xff]  ;;  %v128_v21 = vld [vmem:[#allocation5 + $0x148] sm:$0xff]  ;;  %v129_v22 = vld [vmem:[#allocation5 + $0x150] sm:$0xff] }
  0x17   :  { %246 = vmatpush.msra.mxu2 %v137_v14  ;;  %287 = vmatpush.msra.mxu3 %v138_v15  ;;  %v130_v23 = vld [vmem:[#allocation5 + $0x158] sm:$0xff]  ;;  %v123_v24 = vld [vmem:[#allocation5 + $0x120] sm:$0xff]  ;;  %v124_v25 = vld [vmem:[#allocation5 + $0x128] sm:$0xff] }
  0x18   :  { %165 = vmatpush.msra.mxu0 %v131_v16  ;;  %206 = vmatpush.msra.mxu1 %v132_v17  ;;  %v125_v26 = vld [vmem:[#allocation5 + $0x130] sm:$0xff]  ;;  %v126_v27 = vld [vmem:[#allocation5 + $0x138] sm:$0xff]  ;;  %v119_v28 = vld [vmem:[#allocation5 + $0x100] sm:$0xff] }
  0x19   :  { %247 = vmatpush.msra.mxu2 %v133_v18  ;;  %288 = vmatpush.msra.mxu3 %v134_v19  ;;  %v120_v29 = vld [vmem:[#allocation5 + $0x108] sm:$0xff]  ;;  %v121_v30 = vld [vmem:[#allocation5 + $0x110] sm:$0xff]  ;;  %v122_v31 = vld [vmem:[#allocation5 + $0x118] sm:$0xff] }
  0x1a   :  { %166 = vmatpush.msra.mxu0 %v127_v20  ;;  %207 = vmatpush.msra.mxu1 %v128_v21  ;;  %v115_v32 = vld [vmem:[#allocation5 + $0xe0] sm:$0xff]  ;;  %v116_v33 = vld [vmem:[#allocation5 + $0xe8] sm:$0xff]  ;;  %v117_v34 = vld [vmem:[#allocation5 + $0xf0] sm:$0xff] }
  0x1b   :  { %248 = vmatpush.msra.mxu2 %v129_v22  ;;  %289 = vmatpush.msra.mxu3 %v130_v23  ;;  %v118_v35 = vld [vmem:[#allocation5 + $0xf8] sm:$0xff]  ;;  %v111_v36 = vld [vmem:[#allocation5 + $0xc0] sm:$0xff]  ;;  %v112_v37 = vld [vmem:[#allocation5 + $0xc8] sm:$0xff] }
  0x1c   :  { %167 = vmatpush.msra.mxu0 %v123_v24  ;;  %208 = vmatpush.msra.mxu1 %v124_v25  ;;  %v113_v38 = vld [vmem:[#allocation5 + $0xd0] sm:$0xff]  ;;  %v114_v39 = vld [vmem:[#allocation5 + $0xd8] sm:$0xff]  ;;  %v107_v40 = vld [vmem:[#allocation5 + $0xa0] sm:$0xff] }
  0x1d   :  { %249 = vmatpush.msra.mxu2 %v125_v26  ;;  %290 = vmatpush.msra.mxu3 %v126_v27  ;;  %v108_v41 = vld [vmem:[#allocation5 + $0xa8] sm:$0xff]  ;;  %v109_v42 = vld [vmem:[#allocation5 + $0xb0] sm:$0xff]  ;;  %v110_v43 = vld [vmem:[#allocation5 + $0xb8] sm:$0xff] }
  0x1e   :  { %168 = vmatpush.msra.mxu0 %v119_v28  ;;  %209 = vmatpush.msra.mxu1 %v120_v29  ;;  %v103_v44 = vld [vmem:[#allocation5 + $0x80] sm:$0xff]  ;;  %v104_v45 = vld [vmem:[#allocation5 + $0x88] sm:$0xff]  ;;  %v105_v46 = vld [vmem:[#allocation5 + $0x90] sm:$0xff] }
  0x1f   :  { %250 = vmatpush.msra.mxu2 %v121_v30  ;;  %291 = vmatpush.msra.mxu3 %v122_v31  ;;  %v106_v47 = vld [vmem:[#allocation5 + $0x98] sm:$0xff]  ;;  %v99_v48 = vld [vmem:[#allocation5 + $0x60] sm:$0xff]  ;;  %v100_v49 = vld [vmem:[#allocation5 + $0x68] sm:$0xff] }
  0x20   :  { %169 = vmatpush.msra.mxu0 %v115_v32  ;;  %210 = vmatpush.msra.mxu1 %v116_v33  ;;  %v101_v50 = vld [vmem:[#allocation5 + $0x70] sm:$0xff]  ;;  %v102_v51 = vld [vmem:[#allocation5 + $0x78] sm:$0xff]  ;;  %v95_v52 = vld [vmem:[#allocation5 + $0x40] sm:$0xff] }
  0x21   :  { %251 = vmatpush.msra.mxu2 %v117_v34  ;;  %292 = vmatpush.msra.mxu3 %v118_v35  ;;  %v96_v53 = vld [vmem:[#allocation5 + $0x48] sm:$0xff]  ;;  %v97_v54 = vld [vmem:[#allocation5 + $0x50] sm:$0xff]  ;;  %v98_v55 = vld [vmem:[#allocation5 + $0x58] sm:$0xff] }
  0x22   :  { %170 = vmatpush.msra.mxu0 %v111_v36  ;;  %211 = vmatpush.msra.mxu1 %v112_v37  ;;  %v91_v56 = vld [vmem:[#allocation5 + $0x20] sm:$0xff]  ;;  %v92_v57 = vld [vmem:[#allocation5 + $0x28] sm:$0xff]  ;;  %v93_v58 = vld [vmem:[#allocation5 + $0x30] sm:$0xff] }
  0x23   :  { %252 = vmatpush.msra.mxu2 %v113_v38  ;;  %293 = vmatpush.msra.mxu3 %v114_v39  ;;  %v94_v59 = vld [vmem:[#allocation5 + $0x38] sm:$0xff]  ;;  %v87_v60 = vld [vmem:[#allocation5] sm:$0xff]  ;;  %v88_v61 = vld [vmem:[#allocation5 + $0x8] sm:$0xff] }
  0x24   :  { %171 = vmatpush.msra.mxu0 %v107_v40  ;;  %212 = vmatpush.msra.mxu1 %v108_v41  ;;  %v89_v62 = vld [vmem:[#allocation5 + $0x10] sm:$0xff]  ;;  %v90_v63 = vld [vmem:[#allocation5 + $0x18] sm:$0xff]  ;;  %v79_v0 = vld [vmem:[%s2621_s0] sm:$0xff] }
  0x25   :  { %253 = vmatpush.msra.mxu2 %v109_v42  ;;  %294 = vmatpush.msra.mxu3 %v110_v43  ;;  %v1683_v1 = vld [vmem:[#allocation8 + $0x1e0] sm:$0xff]  ;;  %v1685_v2 = vld [vmem:[#allocation8 + $0x1e8] sm:$0xff]  ;;  %v1687_v3 = vld [vmem:[#allocation8 + $0x1f8] sm:$0xff] }
  0x26   :  { %172 = vmatpush.msra.mxu0 %v103_v44  ;;  %213 = vmatpush.msra.mxu1 %v104_v45  ;;  %v1689_v4 = vld [vmem:[#allocation8 + $0x1f0] sm:$0xff]  ;;  %v1691_v5 = vld [vmem:[#allocation8 + $0x1c0] sm:$0xff]  ;;  %v1693_v6 = vld [vmem:[#allocation8 + $0x1c8] sm:$0xff] }
  0x27   :  { %254 = vmatpush.msra.mxu2 %v105_v46  ;;  %295 = vmatpush.msra.mxu3 %v106_v47  ;;  %v1697_v7 = vld [vmem:[#allocation8 + $0x1d8] sm:$0xff]  ;;  %v1699_v8 = vld [vmem:[#allocation8 + $0x1d0] sm:$0xff]  ;;  %v1703_v9 = vld [vmem:[#allocation8 + $0x1a0] sm:$0xff] }
  0x28   :  { %173 = vmatpush.msra.mxu0 %v99_v48  ;;  %214 = vmatpush.msra.mxu1 %v100_v49  ;;  %v1705_v10 = vld [vmem:[#allocation8 + $0x1a8] sm:$0xff]  ;;  %v1709_v11 = vld [vmem:[#allocation8 + $0x1b8] sm:$0xff]  ;;  %v1711_v12 = vld [vmem:[#allocation8 + $0x1b0] sm:$0xff] }
  0x29   :  { %255 = vmatpush.msra.mxu2 %v101_v50  ;;  %296 = vmatpush.msra.mxu3 %v102_v51  ;;  %v80_v13 = vld [vmem:[%s2621_s0 + $0x8] sm:$0xff]  ;;  %v1721_v14 = vld [vmem:[#allocation8 + $0x180] sm:$0xff]  ;;  %v1726_v16 = vld [vmem:[#allocation8 + $0x198] sm:$0xff] }
  0x2a   :  { %174 = vmatpush.msra.mxu0 %v95_v52  ;;  %215 = vmatpush.msra.mxu1 %v96_v53  ;;  %v1723_v15 = vld [vmem:[#allocation8 + $0x188] sm:$0xff]  ;;  %v1728_v17 = vld [vmem:[#allocation8 + $0x190] sm:$0xff]  ;;  %v1730_v18 = vld [vmem:[#allocation8 + $0x160] sm:$0xff] }
  0x2b   :  { %256 = vmatpush.msra.mxu2 %v97_v54  ;;  %297 = vmatpush.msra.mxu3 %v98_v55  ;;  %v1732_v19 = vld [vmem:[#allocation8 + $0x168] sm:$0xff]  ;;  %v1736_v20 = vld [vmem:[#allocation8 + $0x178] sm:$0xff]  ;;  %v1738_v21 = vld [vmem:[#allocation8 + $0x170] sm:$0xff] }
  0x2c   :  { %175 = vmatpush.msra.mxu0 %v91_v56  ;;  %216 = vmatpush.msra.mxu1 %v92_v57  ;;  %v1742_v22 = vld [vmem:[#allocation8 + $0x140] sm:$0xff]  ;;  %v1744_v23 = vld [vmem:[#allocation8 + $0x148] sm:$0xff]  ;;  %v1748_v24 = vld [vmem:[#allocation8 + $0x158] sm:$0xff] }
  0x2d   :  { %257 = vmatpush.msra.mxu2 %v93_v58  ;;  %298 = vmatpush.msra.mxu3 %v94_v59  ;;  %v1750_v25 = vld [vmem:[#allocation8 + $0x150] sm:$0xff]  ;;  %v1760_v27 = vld [vmem:[#allocation8 + $0x120] sm:$0xff]  ;;  %v1762_v28 = vld [vmem:[#allocation8 + $0x128] sm:$0xff] }
  0x2e   :  { %176 = vmatpush.msra.mxu0 %v87_v60  ;;  %217 = vmatpush.msra.mxu1 %v88_v61  ;;  %v81_v26 = vld [vmem:[%s2621_s0 + $0x10] sm:$0xff]  ;;  %v1765_v29 = vld [vmem:[#allocation8 + $0x138] sm:$0xff]  ;;  %v1769_v31 = vld [vmem:[#allocation8 + $0x100] sm:$0xff] }
  0x2f   :  { %258 = vmatpush.msra.mxu2 %v89_v62  ;;  %299 = vmatpush.msra.mxu3 %v90_v63  ;;  %v1767_v30 = vld [vmem:[#allocation8 + $0x130] sm:$0xff]  ;;  %v1771_v32 = vld [vmem:[#allocation8 + $0x108] sm:$0xff]  ;;  %v1775_v33 = vld [vmem:[#allocation8 + $0x118] sm:$0xff] }
  0x30   :  { %177 = vmatmul.f32.vlgmr.msra.gmra.mxu0 %v79_v0  ;;  %218 = vmatmul.f32.vlgmr.msra.gmra.mxu1 %v79_v0  ;;  %v1777_v34 = vld [vmem:[#allocation8 + $0x110] sm:$0xff]  ;;  %v1781_v35 = vld [vmem:[#allocation8 + $0xe0] sm:$0xff]  ;;  %v1783_v36 = vld [vmem:[#allocation8 + $0xe8] sm:$0xff] }
  0x31   :  { %259 = vmatmul.f32.vlgmr.msra.gmra.mxu2 %v79_v0  ;;  %300 = vmatmul.f32.vlgmr.msra.gmra.mxu3 %v79_v0  ;;  %v1787_v37 = vld [vmem:[#allocation8 + $0xf8] sm:$0xff]  ;;  %v1789_v38 = vld [vmem:[#allocation8 + $0xf0] sm:$0xff]  ;;  %v1799_v40 = vld [vmem:[#allocation8 + $0xc0] sm:$0xff] }
  0x32   :  { %427 = vmatpush.msrb.mxu0 %v1683_v1  ;;  %447 = vmatpush.msrb.mxu1 %v1685_v2  ;;  %v82_v39 = vld [vmem:[%s2621_s0 + $0x18] sm:$0xff]  ;;  %v1801_v41 = vld [vmem:[#allocation8 + $0xc8] sm:$0xff]  ;;  %v1806_v43 = vld [vmem:[#allocation8 + $0xd0] sm:$0xff] }
  0x33   :  { %487 = vmatpush.msrb.mxu3 %v1687_v3  ;;  %467 = vmatpush.msrb.mxu2 %v1689_v4  ;;  %v1804_v42 = vld [vmem:[#allocation8 + $0xd8] sm:$0xff]  ;;  %v1808_v44 = vld [vmem:[#allocation8 + $0xa0] sm:$0xff]  ;;  %v1810_v45 = vld [vmem:[#allocation8 + $0xa8] sm:$0xff] }
  0x34   :  { %428 = vmatpush.msrb.mxu0 %v1691_v5  ;;  %448 = vmatpush.msrb.mxu1 %v1693_v6  ;;  %2719 = vst [vmem:[#allocation15_spill] sm:$0xff] %v1808_v44  ;;  %v1814_v46 = vld [vmem:[#allocation8 + $0xb8] sm:$0xff]  ;;  %v1816_v47 = vld [vmem:[#allocation8 + $0xb0] sm:$0xff]  ;;  %v1820_v48 = vld [vmem:[#allocation8 + $0x80] sm:$0xff] }
  0x35   :  { %488 = vmatpush.msrb.mxu3 %v1697_v7  ;;  %468 = vmatpush.msrb.mxu2 %v1699_v8  ;;  %2720 = vst [vmem:[#allocation16_spill] sm:$0xff] %v1810_v45  ;;  %v1822_v49 = vld [vmem:[#allocation8 + $0x88] sm:$0xff]  ;;  %v1826_v50 = vld [vmem:[#allocation8 + $0x98] sm:$0xff]  ;;  %v1828_v51 = vld [vmem:[#allocation8 + $0x90] sm:$0xff] }
  0x36   :  { %429 = vmatpush.msrb.mxu0 %v1703_v9  ;;  %449 = vmatpush.msrb.mxu1 %v1705_v10  ;;  %2721 = vst [vmem:[#allocation17_spill] sm:$0xff] %v1814_v46  ;;  %v83_v52 = vld [vmem:[%s2621_s0 + $0x20] sm:$0xff]  ;;  %v1840_v54 = vld [vmem:[#allocation8 + $0x68] sm:$0xff]  ;;  %v1843_v55 = vld [vmem:[#allocation8 + $0x78] sm:$0xff] }
  0x37   :  { %489 = vmatpush.msrb.mxu3 %v1709_v11  ;;  %469 = vmatpush.msrb.mxu2 %v1711_v12  ;;  %2722 = vst [vmem:[#allocation18_spill] sm:$0xff] %v1816_v47  ;;  %v1838_v53 = vld [vmem:[#allocation8 + $0x60] sm:$0xff]  ;;  %v1845_v56 = vld [vmem:[#allocation8 + $0x70] sm:$0xff]  ;;  %v1849_v58 = vld [vmem:[#allocation8 + $0x48] sm:$0xff] }
  0x38   :  { %180 = vmatmul.f32.gmra.mxu0 %v80_v13  ;;  %221 = vmatmul.f32.gmra.mxu1 %v80_v13  ;;  %2723 = vst [vmem:[#allocation19_spill] sm:$0xff] %v1820_v48  ;;  %v1847_v57 = vld [vmem:[#allocation8 + $0x40] sm:$0xff]  ;;  %v1853_v59 = vld [vmem:[#allocation8 + $0x58] sm:$0xff]  ;;  %v1855_v60 = vld [vmem:[#allocation8 + $0x50] sm:$0xff] }
  0x39   :  { %262 = vmatmul.f32.gmra.mxu2 %v80_v13  ;;  %303 = vmatmul.f32.gmra.mxu3 %v80_v13  ;;  %2724 = vst [vmem:[#allocation20_spill] sm:$0xff] %v1822_v49  ;;  %v1859_v61 = vld [vmem:[#allocation8 + $0x20] sm:$0xff]  ;;  %v1861_v62 = vld [vmem:[#allocation8 + $0x28] sm:$0xff]  ;;  %v1865_v63 = vld [vmem:[#allocation8 + $0x38] sm:$0xff] }
  0x3a   :  { %430 = vmatpush.msrb.mxu0 %v1721_v14  ;;  %450 = vmatpush.msrb.mxu1 %v1723_v15  ;;  %2725 = vst [vmem:[#allocation21_spill] sm:$0xff] %v1826_v50  ;;  %v1867_v0 = vld [vmem:[#allocation8 + $0x30] sm:$0xff]  ;;  %v84_v13 = vld [vmem:[%s2621_s0 + $0x28] sm:$0xff] }
  0x3b   :  { %490 = vmatpush.msrb.mxu3 %v1726_v16  ;;  %470 = vmatpush.msrb.mxu2 %v1728_v17  ;;  %2726 = vst [vmem:[#allocation22_spill] sm:$0xff] %v1828_v51 }
  0x3c   :  { %431 = vmatpush.msrb.mxu0 %v1730_v18  ;;  %451 = vmatpush.msrb.mxu1 %v1732_v19  ;;  %2727 = vst [vmem:[#allocation23_spill] sm:$0xff] %v1838_v53 }
  0x3d   :  { %491 = vmatpush.msrb.mxu3 %v1736_v20  ;;  %471 = vmatpush.msrb.mxu2 %v1738_v21  ;;  %2728 = vst [vmem:[#allocation24_spill] sm:$0xff] %v1840_v54 }
  0x3e   :  { %432 = vmatpush.msrb.mxu0 %v1742_v22  ;;  %452 = vmatpush.msrb.mxu1 %v1744_v23  ;;  %2729 = vst [vmem:[#allocation25_spill] sm:$0xff] %v1843_v55 }
  0x3f   :  { %492 = vmatpush.msrb.mxu3 %v1748_v24  ;;  %472 = vmatpush.msrb.mxu2 %v1750_v25  ;;  %2730 = vst [vmem:[#allocation26_spill] sm:$0xff] %v1845_v56 }
  0x40   :  { %183 = vmatmul.f32.gmra.mxu0 %v81_v26  ;;  %224 = vmatmul.f32.gmra.mxu1 %v81_v26  ;;  %2731 = vst [vmem:[#allocation27_spill] sm:$0xff] %v1847_v57 }
  0x41   :  { %265 = vmatmul.f32.gmra.mxu2 %v81_v26  ;;  %306 = vmatmul.f32.gmra.mxu3 %v81_v26  ;;  %2732 = vst [vmem:[#allocation28_spill] sm:$0xff] %v1849_v58  ;;  %v1877_v26 = vld [vmem:[#allocation8] sm:$0xff] }
  0x42   :  { %433 = vmatpush.msrb.mxu0 %v1760_v27  ;;  %453 = vmatpush.msrb.mxu1 %v1762_v28  ;;  %2733 = vst [vmem:[#allocation29_spill] sm:$0xff] %v1853_v59 }
  0x43   :  { %493 = vmatpush.msrb.mxu3 %v1765_v29  ;;  %473 = vmatpush.msrb.mxu2 %v1767_v30  ;;  %2734 = vst [vmem:[#allocation30_spill] sm:$0xff] %v1855_v60 }
  0x44   :  { %434 = vmatpush.msrb.mxu0 %v1769_v31  ;;  %454 = vmatpush.msrb.mxu1 %v1771_v32  ;;  %2735 = vst [vmem:[#allocation31_spill] sm:$0xff] %v1859_v61 }
  0x45   :  { %494 = vmatpush.msrb.mxu3 %v1775_v33  ;;  %474 = vmatpush.msrb.mxu2 %v1777_v34  ;;  %2736 = vst [vmem:[#allocation32_spill] sm:$0xff] %v1861_v62 }
  0x46   :  { %435 = vmatpush.msrb.mxu0 %v1781_v35  ;;  %455 = vmatpush.msrb.mxu1 %v1783_v36  ;;  %2737 = vst [vmem:[#allocation33_spill] sm:$0xff] %v1865_v63 }
  0x47   :  { %495 = vmatpush.msrb.mxu3 %v1787_v37  ;;  %475 = vmatpush.msrb.mxu2 %v1789_v38  ;;  %2738 = vst [vmem:[#allocation34_spill] sm:$0xff] %v1867_v0 }
  0x48   :  { %186 = vmatmul.f32.gmra.mxu0 %v82_v39  ;;  %227 = vmatmul.f32.gmra.mxu1 %v82_v39  ;;  %2739 = vst [vmem:[#allocation35_spill] sm:$0xff] %v1877_v26 }
  0x49   :  { %268 = vmatmul.f32.gmra.mxu2 %v82_v39  ;;  %309 = vmatmul.f32.gmra.mxu3 %v82_v39  ;;  %v1879_v39 = vld [vmem:[#allocation8 + $0x8] sm:$0xff] }
  0x4a   :  { %436 = vmatpush.msrb.mxu0 %v1799_v40  ;;  %456 = vmatpush.msrb.mxu1 %v1801_v41  ;;  %2740 = vst [vmem:[#allocation36_spill] sm:$0xff] %v1879_v39 }
  0x4b   :  { %496 = vmatpush.msrb.mxu3 %v1804_v42  ;;  %476 = vmatpush.msrb.mxu2 %v1806_v43 }
  0x4c   :  { %437 = vmatpush.msrb.mxu0 %v1808_v44  ;;  %457 = vmatpush.msrb.mxu1 %v1810_v45 }
  0x4d   :  { %497 = vmatpush.msrb.mxu3 %v1814_v46  ;;  %477 = vmatpush.msrb.mxu2 %v1816_v47 }
  0x4e   :  { %438 = vmatpush.msrb.mxu0 %v1820_v48  ;;  %458 = vmatpush.msrb.mxu1 %v1822_v49 }
  0x4f   :  { %498 = vmatpush.msrb.mxu3 %v1826_v50  ;;  %478 = vmatpush.msrb.mxu2 %v1828_v51 }
  0x50   :  { %189 = vmatmul.f32.gmra.mxu0 %v83_v52  ;;  %230 = vmatmul.f32.gmra.mxu1 %v83_v52 }
  0x51   :  { %271 = vmatmul.f32.gmra.mxu2 %v83_v52  ;;  %312 = vmatmul.f32.gmra.mxu3 %v83_v52  ;;  %v1882_v52 = vld [vmem:[#allocation8 + $0x18] sm:$0xff] }
  0x52   :  { %439 = vmatpush.msrb.mxu0 %v1838_v53  ;;  %459 = vmatpush.msrb.mxu1 %v1840_v54  ;;  %2741 = vst [vmem:[#allocation37_spill] sm:$0xff] %v1882_v52 }
  0x53   :  { %499 = vmatpush.msrb.mxu3 %v1843_v55  ;;  %479 = vmatpush.msrb.mxu2 %v1845_v56 }
  0x54   :  { %440 = vmatpush.msrb.mxu0 %v1847_v57  ;;  %460 = vmatpush.msrb.mxu1 %v1849_v58  ;;  %v1884_v58 = vld [vmem:[#allocation8 + $0x10] sm:$0xff] }
  0x55   :  { %500 = vmatpush.msrb.mxu3 %v1853_v59  ;;  %480 = vmatpush.msrb.mxu2 %v1855_v60  ;;  %2742 = vst [vmem:[#allocation38_spill] sm:$0xff] %v1884_v58 }
  0x56   :  { %441 = vmatpush.msrb.mxu0 %v1859_v61  ;;  %461 = vmatpush.msrb.mxu1 %v1861_v62 }
  0x57   :  { %501 = vmatpush.msrb.mxu3 %v1865_v63  ;;  %481 = vmatpush.msrb.mxu2 %v1867_v0  ;;  %v85_v63 = vld [vmem:[%s2621_s0 + $0x30] sm:$0xff] }
  0x58   :  { %192 = vmatmul.f32.gmra.mxu0 %v84_v13  ;;  %233 = vmatmul.f32.gmra.mxu1 %v84_v13 }
  0x59   :  { %274 = vmatmul.f32.gmra.mxu2 %v84_v13  ;;  %315 = vmatmul.f32.gmra.mxu3 %v84_v13  ;;  %v86_v13 = vld [vmem:[%s2621_s0 + $0x38] sm:$0xff] }
  0x5a   :  { %442 = vmatpush.msrb.mxu0 %v1877_v26  ;;  %462 = vmatpush.msrb.mxu1 %v1879_v39 }
  0x5b   :  { %502 = vmatpush.msrb.mxu3 %v1882_v52  ;;  %482 = vmatpush.msrb.mxu2 %v1884_v58 }
  0x5c   :  { %535 = vmatpush.msra.mxu0 %v1683_v1  ;;  %555 = vmatpush.msra.mxu1 %v1685_v2 }
  0x5d   :  { %575 = vmatpush.msra.mxu2 %v1689_v4  ;;  %595 = vmatpush.msra.mxu3 %v1687_v3 }
  0x5e   :  { %536 = vmatpush.msra.mxu0 %v1691_v5  ;;  %556 = vmatpush.msra.mxu1 %v1693_v6 }
  0x5f   :  { %576 = vmatpush.msra.mxu2 %v1699_v8  ;;  %596 = vmatpush.msra.mxu3 %v1697_v7 }
  0x60   :  { %195 = vmatmul.f32.gmra.mxu0 %v85_v63  ;;  %236 = vmatmul.f32.gmra.mxu1 %v85_v63 }
  0x61   :  { %277 = vmatmul.f32.gmra.mxu2 %v85_v63  ;;  %318 = vmatmul.f32.gmra.mxu3 %v85_v63  ;;  %v1626_v63 = vmov 0.0  }
  0x62   :  { %537 = vmatpush.msra.mxu0 %v1703_v9  ;;  %557 = vmatpush.msra.mxu1 %v1705_v10 }
  0x63   :  { %577 = vmatpush.msra.mxu2 %v1711_v12  ;;  %597 = vmatpush.msra.mxu3 %v1709_v11 }
  0x64   :  { %538 = vmatpush.msra.mxu0 %v1721_v14  ;;  %558 = vmatpush.msra.mxu1 %v1723_v15 }
  0x65   :  { %578 = vmatpush.msra.mxu2 %v1728_v17  ;;  %598 = vmatpush.msra.mxu3 %v1726_v16 }
  0x66   :  { %539 = vmatpush.msra.mxu0 %v1730_v18  ;;  %559 = vmatpush.msra.mxu1 %v1732_v19 }
  0x67   :  { %579 = vmatpush.msra.mxu2 %v1738_v21  ;;  %599 = vmatpush.msra.mxu3 %v1736_v20 }
  0x68   :  { %198 = vmatmul.f32.gmra.mxu0 %v86_v13  ;;  %239 = vmatmul.f32.gmra.mxu1 %v86_v13 }
  0x69   :  { %280 = vmatmul.f32.gmra.mxu2 %v86_v13  ;;  %321 = vmatmul.f32.gmra.mxu3 %v86_v13  ;;  %v2743_v13 = vld [vmem:[#allocation28_spill] sm:$0xff] }
  0x6a   :  { %540 = vmatpush.msra.mxu0 %v1742_v22  ;;  %560 = vmatpush.msra.mxu1 %v1744_v23 }
  0x6b   :  { %580 = vmatpush.msra.mxu2 %v1750_v25  ;;  %600 = vmatpush.msra.mxu3 %v1748_v24 }
  0x6c   :  { %541 = vmatpush.msra.mxu0 %v1760_v27  ;;  %561 = vmatpush.msra.mxu1 %v1762_v28 }
  0x6d   :  { %581 = vmatpush.msra.mxu2 %v1767_v30  ;;  %601 = vmatpush.msra.mxu3 %v1765_v29 }
  0x6e   :  { %542 = vmatpush.msra.mxu0 %v1769_v31  ;;  %562 = vmatpush.msra.mxu1 %v1771_v32 }
  0x6f   :  { %582 = vmatpush.msra.mxu2 %v1777_v34  ;;  %602 = vmatpush.msra.mxu3 %v1775_v33 }
  0x70   :  { %443 = vmatmul.f32.vlgmr.msrb.gmra.mxu0 %v1626_v63  ;;  %463 = vmatmul.f32.vlgmr.msrb.gmra.mxu1 %v1626_v63 }
  0x71   :  { %483 = vmatmul.f32.vlgmr.msrb.gmra.mxu2 %v1626_v63  ;;  %503 = vmatmul.f32.vlgmr.msrb.gmra.mxu3 %v1626_v63  ;;  %v2744_v63 = vld [vmem:[#allocation33_spill] sm:$0xff] }
  0x72   :  { %543 = vmatpush.msra.mxu0 %v1781_v35  ;;  %563 = vmatpush.msra.mxu1 %v1783_v36 }
  0x73   :  { %583 = vmatpush.msra.mxu2 %v1789_v38  ;;  %603 = vmatpush.msra.mxu3 %v1787_v37 }
  0x74   :  { %544 = vmatpush.msra.mxu0 %v1799_v40  ;;  %564 = vmatpush.msra.mxu1 %v1801_v41 }
  0x75   :  { %584 = vmatpush.msra.mxu2 %v1806_v43  ;;  %604 = vmatpush.msra.mxu3 %v1804_v42 }
  0x76   :  { %545 = vmatpush.msra.mxu0 %v1808_v44  ;;  %565 = vmatpush.msra.mxu1 %v1810_v45 }
  0x77   :  { %585 = vmatpush.msra.mxu2 %v1816_v47  ;;  %605 = vmatpush.msra.mxu3 %v1814_v46 }
  0x78   :  { %546 = vmatpush.msra.mxu0 %v1820_v48  ;;  %566 = vmatpush.msra.mxu1 %v1822_v49 }
  0x79   :  { %586 = vmatpush.msra.mxu2 %v1828_v51  ;;  %606 = vmatpush.msra.mxu3 %v1826_v50 }
  0x7a   :  { %547 = vmatpush.msra.mxu0 %v1838_v53  ;;  %567 = vmatpush.msra.mxu1 %v1840_v54 }
  0x7b   :  { %587 = vmatpush.msra.mxu2 %v1845_v56  ;;  %607 = vmatpush.msra.mxu3 %v1843_v55 }
  0x7c   :  { %548 = vmatpush.msra.mxu0 %v1847_v57  ;;  %568 = vmatpush.msra.mxu1 %v2743_v13 }
  0x7d   :  { %588 = vmatpush.msra.mxu2 %v1855_v60  ;;  %608 = vmatpush.msra.mxu3 %v1853_v59 }
  0x7e   :  { %549 = vmatpush.msra.mxu0 %v1859_v61  ;;  %569 = vmatpush.msra.mxu1 %v1861_v62 }
  0x7f   :  { %589 = vmatpush.msra.mxu2 %v1867_v0  ;;  %609 = vmatpush.msra.mxu3 %v2744_v63 }
  0x80   :  { %550 = vmatpush.msra.mxu0 %v1877_v26  ;;  %570 = vmatpush.msra.mxu1 %v1879_v39 }
  0x81   :  { %590 = vmatpush.msra.mxu2 %v1884_v58  ;;  %610 = vmatpush.msra.mxu3 %v1882_v52 }
  0x82   :  { %644 = vmatpush.msrb.mxu0 %v1683_v1  ;;  %664 = vmatpush.msrb.mxu1 %v1685_v2 }
  0x83   :  { %684 = vmatpush.msrb.mxu2 %v1689_v4  ;;  %704 = vmatpush.msrb.mxu3 %v1687_v3 }
  0x84   :  { %645 = vmatpush.msrb.mxu0 %v1691_v5  ;;  %665 = vmatpush.msrb.mxu1 %v1693_v6 }
  0x85   :  { %685 = vmatpush.msrb.mxu2 %v1699_v8  ;;  %705 = vmatpush.msrb.mxu3 %v1697_v7 }
  0x86   :  { %646 = vmatpush.msrb.mxu0 %v1703_v9  ;;  %666 = vmatpush.msrb.mxu1 %v1705_v10 }
  0x87   :  { %686 = vmatpush.msrb.mxu2 %v1711_v12  ;;  %706 = vmatpush.msrb.mxu3 %v1709_v11 }
  0x88   :  { %647 = vmatpush.msrb.mxu0 %v1721_v14  ;;  %667 = vmatpush.msrb.mxu1 %v1723_v15 }
  0x89   :  { %687 = vmatpush.msrb.mxu2 %v1728_v17  ;;  %707 = vmatpush.msrb.mxu3 %v1726_v16 }
  0x8a   :  { %648 = vmatpush.msrb.mxu0 %v1730_v18  ;;  %668 = vmatpush.msrb.mxu1 %v1732_v19 }
  0x8b   :  { %688 = vmatpush.msrb.mxu2 %v1738_v21  ;;  %708 = vmatpush.msrb.mxu3 %v1736_v20 }
  0x8c   :  { %649 = vmatpush.msrb.mxu0 %v1742_v22  ;;  %669 = vmatpush.msrb.mxu1 %v1744_v23 }
  0x8d   :  { %689 = vmatpush.msrb.mxu2 %v1750_v25  ;;  %709 = vmatpush.msrb.mxu3 %v1748_v24 }
  0x8e   :  { %650 = vmatpush.msrb.mxu0 %v1760_v27  ;;  %670 = vmatpush.msrb.mxu1 %v1762_v28 }
  0x8f   :  { %690 = vmatpush.msrb.mxu2 %v1767_v30  ;;  %710 = vmatpush.msrb.mxu3 %v1765_v29 }
  0x90   :  { %651 = vmatpush.msrb.mxu0 %v1769_v31  ;;  %671 = vmatpush.msrb.mxu1 %v1771_v32 }
  0x91   :  { %691 = vmatpush.msrb.mxu2 %v1777_v34  ;;  %711 = vmatpush.msrb.mxu3 %v1775_v33 }
  0x92   :  { %652 = vmatpush.msrb.mxu0 %v1781_v35  ;;  %672 = vmatpush.msrb.mxu1 %v1783_v36 }
  0x93   :  { %692 = vmatpush.msrb.mxu2 %v1789_v38  ;;  %712 = vmatpush.msrb.mxu3 %v1787_v37 }
  0x94   :  { %653 = vmatpush.msrb.mxu0 %v1799_v40  ;;  %673 = vmatpush.msrb.mxu1 %v1801_v41 }
  0x95   :  { %693 = vmatpush.msrb.mxu2 %v1806_v43  ;;  %713 = vmatpush.msrb.mxu3 %v1804_v42 }
  0x96   :  { %654 = vmatpush.msrb.mxu0 %v1808_v44  ;;  %674 = vmatpush.msrb.mxu1 %v1810_v45 }
  0x97   :  { %694 = vmatpush.msrb.mxu2 %v1816_v47  ;;  %714 = vmatpush.msrb.mxu3 %v1814_v46 }
  0x98   :  { %655 = vmatpush.msrb.mxu0 %v1820_v48  ;;  %675 = vmatpush.msrb.mxu1 %v1822_v49 }
  0x99   :  { %695 = vmatpush.msrb.mxu2 %v1828_v51  ;;  %715 = vmatpush.msrb.mxu3 %v1826_v50 }
  0x9a   :  { %656 = vmatpush.msrb.mxu0 %v1838_v53  ;;  %676 = vmatpush.msrb.mxu1 %v1840_v54 }
  0x9b   :  { %696 = vmatpush.msrb.mxu2 %v1845_v56  ;;  %716 = vmatpush.msrb.mxu3 %v1843_v55 }
  0x9c   :  { %657 = vmatpush.msrb.mxu0 %v1847_v57  ;;  %677 = vmatpush.msrb.mxu1 %v2743_v13 }
  0x9d   :  { %697 = vmatpush.msrb.mxu2 %v1855_v60  ;;  %717 = vmatpush.msrb.mxu3 %v1853_v59 }
  0x9e   :  { %658 = vmatpush.msrb.mxu0 %v1859_v61  ;;  %678 = vmatpush.msrb.mxu1 %v1861_v62  ;;  %v151_v61 = vld [vmem:[%s2624_s3] sm:$0xf]  ;;  %s1627_s3 = smov [#allocation11]  }
  0x9f   :  { %698 = vmatpush.msrb.mxu2 %v1867_v0  ;;  %718 = vmatpush.msrb.mxu3 %v2744_v63  ;;  %v153_v59 = vperm.slane %v151_v61, 0  ;;  %v154_v62 = vperm.slane %v151_v61, 1  ;;  %s1343_s11 = sshll.u32 %s1627_s3, 4  ;;  %s1344_s11 = int_to_ptr.vmem [resolvable:$true] %s1343_s11 }
  0xa0   :  { %659 = vmatpush.msrb.mxu0 %v1877_v26  ;;  %679 = vmatpush.msrb.mxu1 %v1879_v39 }
  0xa1   :  { %699 = vmatpush.msrb.mxu2 %v1884_v58  ;;  %719 = vmatpush.msrb.mxu3 %v1882_v52  ;;  %v2035_v58 = vperm.slane %v151_v61, 2  ;;  %v2037_v52 = vperm.slane %v151_v61, 3 }
  0xad   :  { %v178_v13 = vpop.f32.mrf.mxu0  ;;  %v219_v60 = vpop.f32.mrf.mxu1 }
  0xb4   :  { %v2027_v57 = vpop.f32.mrf.mxu2  ;;  %v2029_v0 = vpop.f32.mrf.mxu3 }
  0xb5   :  { %v181_v63 = vpop.f32.mrf.mxu0  ;;  %v222_v26 = vpop.f32.mrf.mxu1 }
  0xb6   :  { %v2031_v55 = vadd.f32 %v181_v63, %v153_v59  ;;  %v2033_v39 = vadd.f32 %v222_v26, %v154_v62 }
  0xb8   :  { %2745 = vst [vmem:[#allocation39_spill] sm:$0xff] %v2031_v55 }
  0xb9   :  { %2746 = vst [vmem:[#allocation40_spill] sm:$0xff] %v2033_v39 }
  0xbc   :  { %v263_v56 = vpop.f32.mrf.mxu2  ;;  %v304_v54 = vpop.f32.mrf.mxu3 }
  0xbd   :  { %v2040_v53 = vadd.f32 %v263_v56, %v2035_v58  ;;  %v2043_v50 = vadd.f32 %v304_v54, %v2037_v52  ;;  %v184_v51 = vpop.f32.mrf.mxu0  ;;  %v225_v49 = vpop.f32.mrf.mxu1 }
  0xbe   :  { %v2045_v48 = vadd.f32 %v184_v51, %v153_v59  ;;  %v2047_v63 = vadd.f32 %v225_v49, %v154_v62 }
  0xbf   :  { %2747 = vst [vmem:[#allocation41_spill] sm:$0xff] %v2040_v53 }
  0xc0   :  { %2748 = vst [vmem:[#allocation42_spill] sm:$0xff] %v2043_v50 }
  0xc1   :  { %2749 = vst [vmem:[#allocation43_spill] sm:$0xff] %v2045_v48 }
  0xc2   :  { %2750 = vst [vmem:[#allocation44_spill] sm:$0xff] %v2047_v63 }
  0xc4   :  { %v266_v26 = vpop.f32.mrf.mxu2  ;;  %v307_v39 = vpop.f32.mrf.mxu3 }
  0xc5   :  { %v2050_v55 = vadd.f32 %v266_v26, %v2035_v58  ;;  %v2053_v61 = vadd.f32 %v307_v39, %v2037_v52  ;;  %v187_v46 = vpop.f32.mrf.mxu0  ;;  %v228_v56 = vpop.f32.mrf.mxu1 }
  0xc6   :  { %v2055_v53 = vadd.f32 %v187_v46, %v153_v59  ;;  %v2057_v54 = vadd.f32 %v228_v56, %v154_v62 }
  0xc7   :  { %2751 = vst [vmem:[#allocation45_spill] sm:$0xff] %v2050_v55 }
  0xc8   :  { %2752 = vst [vmem:[#allocation46_spill] sm:$0xff] %v2053_v61 }
  0xc9   :  { %2753 = vst [vmem:[#allocation47_spill] sm:$0xff] %v2055_v53 }
  0xca   :  { %2754 = vst [vmem:[#allocation48_spill] sm:$0xff] %v2057_v54 }
  0xcc   :  { %v269_v50 = vpop.f32.mrf.mxu2  ;;  %v310_v47 = vpop.f32.mrf.mxu3 }
  0xcd   :  { %v2060_v51 = vadd.f32 %v269_v50, %v2035_v58  ;;  %v2063_v49 = vadd.f32 %v310_v47, %v2037_v52  ;;  %v190_v63 = vpop.f32.mrf.mxu0  ;;  %v231_v26 = vpop.f32.mrf.mxu1 }
  0xce   :  { %v2065_v55 = vadd.f32 %v190_v63, %v153_v59  ;;  %v2067_v39 = vadd.f32 %v231_v26, %v154_v62 }
  0xcf   :  { %2755 = vst [vmem:[#allocation49_spill] sm:$0xff] %v2060_v51 }
  0xd0   :  { %2756 = vst [vmem:[#allocation50_spill] sm:$0xff] %v2063_v49 }
  0xd1   :  { %2757 = vst [vmem:[#allocation51_spill] sm:$0xff] %v2065_v55 }
  0xd2   :  { %2758 = vst [vmem:[#allocation52_spill] sm:$0xff] %v2067_v39 }
  0xd4   :  { %v272_v61 = vpop.f32.mrf.mxu2  ;;  %v313_v48 = vpop.f32.mrf.mxu3 }
  0xd5   :  { %v2070_v46 = vadd.f32 %v272_v61, %v2035_v58  ;;  %v2073_v56 = vadd.f32 %v313_v48, %v2037_v52  ;;  %v193_v54 = vpop.f32.mrf.mxu0  ;;  %v234_v50 = vpop.f32.mrf.mxu1 }
  0xd6   :  { %v2075_v51 = vadd.f32 %v193_v54, %v153_v59  ;;  %v2077_v47 = vadd.f32 %v234_v50, %v154_v62 }
  0xd7   :  { %2759 = vst [vmem:[#allocation53_spill] sm:$0xff] %v2070_v46 }
  0xd8   :  { %2760 = vst [vmem:[#allocation54_spill] sm:$0xff] %v2073_v56 }
  0xd9   :  { %2761 = vst [vmem:[#allocation55_spill] sm:$0xff] %v2075_v51  ;;  %v220_v51 = vadd.f32 %v219_v60, %v154_v62 }
  0xda   :  { %2762 = vst [vmem:[#allocation56_spill] sm:$0xff] %v2077_v47 }
  0xdc   :  { %v275_v49 = vpop.f32.mrf.mxu2  ;;  %v316_v53 = vpop.f32.mrf.mxu3 }
  0xdd   :  { %v2080_v63 = vadd.f32 %v275_v49, %v2035_v58  ;;  %v2083_v26 = vadd.f32 %v316_v53, %v2037_v52  ;;  %v196_v39 = vpop.f32.mrf.mxu0  ;;  %v237_v61 = vpop.f32.mrf.mxu1 }
  0xde   :  { %v2085_v46 = vadd.f32 %v196_v39, %v153_v59  ;;  %v2087_v48 = vadd.f32 %v237_v61, %v154_v62 }
  0xdf   :  { %2763 = vst [vmem:[#allocation57_spill] sm:$0xff] %v2080_v63 }
  0xe0   :  { %2764 = vst [vmem:[#allocation58_spill] sm:$0xff] %v2083_v26  ;;  %v179_v26 = vadd.f32 %v178_v13, %v153_v59 }
  0xe1   :  { %2765 = vst [vmem:[#allocation59_spill] sm:$0xff] %v2085_v46 }
  0xe2   :  { %2766 = vst [vmem:[#allocation60_spill] sm:$0xff] %v2087_v48 }
  0xe4   :  { %v278_v56 = vpop.f32.mrf.mxu2  ;;  %v319_v55 = vpop.f32.mrf.mxu3 }
  0xe5   :  { %v2090_v54 = vadd.f32 %v278_v56, %v2035_v58  ;;  %v2093_v50 = vadd.f32 %v319_v55, %v2037_v52  ;;  %v199_v47 = vpop.f32.mrf.mxu0  ;;  %v240_v49 = vpop.f32.mrf.mxu1 }
  0xe6   :  { %v2095_v63 = vadd.f32 %v199_v47, %v153_v59  ;;  %v2097_v53 = vadd.f32 %v240_v49, %v154_v62  ;;  %v261_v47 = vadd.f32 %v2027_v57, %v2035_v58  ;;  %v302_v59 = vadd.f32 %v2029_v0, %v2037_v52 }
  0xe7   :  { %2767 = vst [vmem:[#allocation61_spill] sm:$0xff] %v2090_v54 }
  0xe8   :  { %2768 = vst [vmem:[#allocation62_spill] sm:$0xff] %v2093_v50 }
  0xe9   :  { %2769 = vst [vmem:[#allocation63_spill] sm:$0xff] %v2095_v63  ;;  %v2795_v63 = vld [vmem:[#allocation38_spill] sm:$0xff] }
  0xea   :  { %2770 = vst [vmem:[#allocation64_spill] sm:$0xff] %v2097_v53  ;;  %v2794_v53 = vld [vmem:[#allocation36_spill] sm:$0xff] }
  0xec   :  { %v281_v39 = vpop.f32.mrf.mxu2  ;;  %v322_v46 = vpop.f32.mrf.mxu3 }
  0xed   :  { %v2100_v61 = vadd.f32 %v281_v39, %v2035_v58  ;;  %v2103_v48 = vadd.f32 %v322_v46, %v2037_v52  ;;  %v444_v56 = vpop.f32.mrf.mxu0  ;;  %v464_v54 = vpop.f32.mrf.mxu1 }
  0xee   :  { %v507_v55 = vadd.f32 %v444_v56, %v179_v26  ;;  %v508_v50 = vadd.f32 %v464_v54, %v220_v51 }
  0xef   :  { %2771 = vst [vmem:[#allocation65_spill] sm:$0xff] %v2100_v61  ;;  %v2793_v61 = vld [vmem:[#allocation35_spill] sm:$0xff] }
  0xf0   :  { %2772 = vst [vmem:[#allocation66_spill] sm:$0xff] %v2103_v48  ;;  %v511_v45 = vmul.f32 0.5, %v507_v55  ;;  %v512_v44 = vmul.f32 0.5, %v508_v50 }
  0xf2   :  { %1373 = vtanh.f32 %v511_v45 }
  0xf3   :  { %1375 = vtanh.f32 %v512_v44 }
  0xf4   :  { %v484_v60 = vpop.f32.mrf.mxu2  ;;  %v504_v62 = vpop.f32.mrf.mxu3 }
  0xf5   :  { %v509_v13 = vadd.f32 %v484_v60, %v261_v47  ;;  %v510_v49 = vadd.f32 %v504_v62, %v302_v59  ;;  %v2774_v59 = vld [vmem:[#allocation16_spill] sm:$0xff]  ;;  %v2775_v60 = vld [vmem:[#allocation18_spill] sm:$0xff]  ;;  %v2776_v62 = vld [vmem:[#allocation17_spill] sm:$0xff] }
  0xf7   :  { %v513_v46 = vmul.f32 0.5, %v509_v13  ;;  %1377 = vtanh.f32 %v510_v49  ;;  %v2777_v13 = vld [vmem:[#allocation19_spill] sm:$0xff]  ;;  %v2778_v49 = vld [vmem:[#allocation20_spill] sm:$0xff] }
  0xf8   :  { %v1374_v39 = vpop.eup %1373 }
  0xf9   :  { %v1376_v48 = vpop.eup %1375  ;;  %v517_v26 = vadd.f32 1.0, %v1374_v39  ;;  %1379 = vtanh.f32 %v513_v46  ;;  %v2779_v46 = vld [vmem:[#allocation22_spill] sm:$0xff]  ;;  %v2780_v39 = vld [vmem:[#allocation21_spill] sm:$0xff] }
  0xfa   :  { %v518_v51 = vadd.f32 1.0, %v1376_v48  ;;  %v2773_v48 = vld [vmem:[#allocation15_spill] sm:$0xff] }
  0xfb   :  { %v520_v54 = vmul.f32 0.5, %v517_v26  ;;  %v2781_v26 = vld [vmem:[#allocation23_spill] sm:$0xff] }
  0xfc   :  { %v521_v45 = vmul.f32 0.5, %v518_v51  ;;  %v2782_v51 = vld [vmem:[#allocation24_spill] sm:$0xff] }
  0xfd   :  { %v1378_v50 = vpop.eup %1377 }
  0xfe   :  { %v524_v56 = vmul.f32 0.0, %v521_v45  ;;  %v525_v57 = vmul.f32 %v1378_v50, %v520_v54  ;;  %v2783_v54 = vld [vmem:[#allocation26_spill] sm:$0xff]  ;;  %v2784_v45 = vld [vmem:[#allocation25_spill] sm:$0xff]  ;;  %v2785_v50 = vld [vmem:[#allocation27_spill] sm:$0xff] }
  0xff   :  { %v1380_v58 = vpop.eup %1379 }
 0x100   :  { %v2109_v55 = vadd.f32 %v525_v57, %v524_v56  ;;  %v519_v44 = vadd.f32 1.0, %v1380_v58  ;;  %v2786_v56 = vld [vmem:[#allocation28_spill] sm:$0xff]  ;;  %v2787_v57 = vld [vmem:[#allocation30_spill] sm:$0xff]  ;;  %v2788_v58 = vld [vmem:[#allocation29_spill] sm:$0xff] }
 0x102   :  { %1381 = vtanh.f32 %v2109_v55  ;;  %v522_v0 = vmul.f32 0.5, %v519_v44  ;;  %v2789_v44 = vld [vmem:[#allocation31_spill] sm:$0xff] }
 0x108   :  { %v1382_v52 = vpop.eup %1381 }
 0x109   :  { %v528_v47 = vmul.f32 %v1382_v52, %v522_v0  ;;  %v2790_v0 = vld [vmem:[#allocation32_spill] sm:$0xff]  ;;  %v2791_v52 = vld [vmem:[#allocation34_spill] sm:$0xff] }
 0x10b   :  { %529 = vst [vmem:[#allocation11] sm:$0xff] %v528_v47  ;;  %551 = vmatmul.f32.vlgmr.msra.gmra.mxu0 %v528_v47  ;;  %571 = vmatmul.f32.vlgmr.msra.gmra.mxu1 %v528_v47 }
 0x10c   :  { %591 = vmatmul.f32.vlgmr.msra.gmra.mxu2 %v528_v47  ;;  %611 = vmatmul.f32.vlgmr.msra.gmra.mxu3 %v528_v47  ;;  %v2792_v47 = vld [vmem:[#allocation33_spill] sm:$0xff] }
 0x10d   :  { %753 = vmatpush.msra.mxu0 %v1683_v1  ;;  %773 = vmatpush.msra.mxu1 %v1685_v2 }
 0x10e   :  { %793 = vmatpush.msra.mxu2 %v1689_v4  ;;  %813 = vmatpush.msra.mxu3 %v1687_v3 }
 0x10f   :  { %754 = vmatpush.msra.mxu0 %v1691_v5  ;;  %774 = vmatpush.msra.mxu1 %v1693_v6 }
 0x110   :  { %794 = vmatpush.msra.mxu2 %v1699_v8  ;;  %814 = vmatpush.msra.mxu3 %v1697_v7 }
 0x111   :  { %755 = vmatpush.msra.mxu0 %v1703_v9  ;;  %775 = vmatpush.msra.mxu1 %v1705_v10 }
 0x112   :  { %795 = vmatpush.msra.mxu2 %v1711_v12  ;;  %815 = vmatpush.msra.mxu3 %v1709_v11 }
 0x113   :  { %756 = vmatpush.msra.mxu0 %v1721_v14  ;;  %776 = vmatpush.msra.mxu1 %v1723_v15 }
 0x114   :  { %796 = vmatpush.msra.mxu2 %v1728_v17  ;;  %816 = vmatpush.msra.mxu3 %v1726_v16 }
 0x115   :  { %757 = vmatpush.msra.mxu0 %v1730_v18  ;;  %777 = vmatpush.msra.mxu1 %v1732_v19 }
 0x116   :  { %797 = vmatpush.msra.mxu2 %v1738_v21  ;;  %817 = vmatpush.msra.mxu3 %v1736_v20 }
 0x117   :  { %758 = vmatpush.msra.mxu0 %v1742_v22  ;;  %778 = vmatpush.msra.mxu1 %v1744_v23 }
 0x118   :  { %798 = vmatpush.msra.mxu2 %v1750_v25  ;;  %818 = vmatpush.msra.mxu3 %v1748_v24 }
 0x119   :  { %759 = vmatpush.msra.mxu0 %v1760_v27  ;;  %779 = vmatpush.msra.mxu1 %v1762_v28 }
 0x11a   :  { %799 = vmatpush.msra.mxu2 %v1767_v30  ;;  %819 = vmatpush.msra.mxu3 %v1765_v29 }
 0x11b   :  { %760 = vmatpush.msra.mxu0 %v1769_v31  ;;  %780 = vmatpush.msra.mxu1 %v1771_v32 }
 0x11c   :  { %800 = vmatpush.msra.mxu2 %v1777_v34  ;;  %820 = vmatpush.msra.mxu3 %v1775_v33 }
 0x11d   :  { %761 = vmatpush.msra.mxu0 %v1781_v35  ;;  %781 = vmatpush.msra.mxu1 %v1783_v36 }
 0x11e   :  { %801 = vmatpush.msra.mxu2 %v1789_v38  ;;  %821 = vmatpush.msra.mxu3 %v1787_v37 }
 0x11f   :  { %762 = vmatpush.msra.mxu0 %v1799_v40  ;;  %782 = vmatpush.msra.mxu1 %v1801_v41 }
 0x120   :  { %802 = vmatpush.msra.mxu2 %v1806_v43  ;;  %822 = vmatpush.msra.mxu3 %v1804_v42 }
 0x121   :  { %763 = vmatpush.msra.mxu0 %v2773_v48  ;;  %783 = vmatpush.msra.mxu1 %v2774_v59 }
 0x122   :  { %803 = vmatpush.msra.mxu2 %v2775_v60  ;;  %823 = vmatpush.msra.mxu3 %v2776_v62 }
 0x123   :  { %764 = vmatpush.msra.mxu0 %v2777_v13  ;;  %784 = vmatpush.msra.mxu1 %v2778_v49 }
 0x124   :  { %804 = vmatpush.msra.mxu2 %v2779_v46  ;;  %824 = vmatpush.msra.mxu3 %v2780_v39  ;;  %v2800_v39 = vld [vmem:[#allocation42_spill] sm:$0xff] }
 0x125   :  { %765 = vmatpush.msra.mxu0 %v2781_v26  ;;  %785 = vmatpush.msra.mxu1 %v2782_v51  ;;  %v2799_v26 = vld [vmem:[#allocation41_spill] sm:$0xff] }
 0x126   :  { %805 = vmatpush.msra.mxu2 %v2783_v54  ;;  %825 = vmatpush.msra.mxu3 %v2784_v45  ;;  %v2797_v45 = vld [vmem:[#allocation39_spill] sm:$0xff]  ;;  %v2798_v54 = vld [vmem:[#allocation40_spill] sm:$0xff] }
 0x127   :  { %766 = vmatpush.msra.mxu0 %v2785_v50  ;;  %786 = vmatpush.msra.mxu1 %v2786_v56  ;;  %v2796_v50 = vld [vmem:[#allocation37_spill] sm:$0xff] }
 0x128   :  { %806 = vmatpush.msra.mxu2 %v2787_v57  ;;  %826 = vmatpush.msra.mxu3 %v2788_v58 }
 0x129   :  { %767 = vmatpush.msra.mxu0 %v2789_v44  ;;  %787 = vmatpush.msra.mxu1 %v2790_v0 }
 0x12a   :  { %807 = vmatpush.msra.mxu2 %v2791_v52  ;;  %827 = vmatpush.msra.mxu3 %v2792_v47 }
 0x12b   :  { %768 = vmatpush.msra.mxu0 %v2793_v61  ;;  %788 = vmatpush.msra.mxu1 %v2794_v53 }
 0x12c   :  { %808 = vmatpush.msra.mxu2 %v2795_v63  ;;  %828 = vmatpush.msra.mxu3 %v2796_v50 }
 0x188   :  { %v552_v56 = vpop.f32.mrf.mxu0  ;;  %v572_v57 = vpop.f32.mrf.mxu1 }
 0x189   :  { %v615_v58 = vadd.f32 %v552_v56, %v2797_v45  ;;  %v616_v44 = vadd.f32 %v572_v57, %v2798_v54 }
 0x18b   :  { %v619_v51 = vmul.f32 0.5, %v615_v58  ;;  %v620_v0 = vmul.f32 0.5, %v616_v44 }
 0x18d   :  { %1383 = vtanh.f32 %v619_v51 }
 0x18e   :  { %1385 = vtanh.f32 %v620_v0  ;;  %v2256_v0 = vld [vmem:[#allocation8 + $0x1e0] sm:$0xff] }
 0x18f   :  { %v592_v52 = vpop.f32.mrf.mxu2  ;;  %v612_v47 = vpop.f32.mrf.mxu3 }
 0x190   :  { %v617_v61 = vadd.f32 %v592_v52, %v2799_v26  ;;  %v618_v53 = vadd.f32 %v612_v47, %v2800_v39  ;;  %v2259_v52 = vld [vmem:[#allocation8 + $0x1e8] sm:$0xff]  ;;  %v2262_v47 = vld [vmem:[#allocation8 + $0x1f0] sm:$0xff] }
 0x192   :  { %v621_v46 = vmul.f32 0.5, %v617_v61  ;;  %1387 = vtanh.f32 %v618_v53 }
 0x193   :  { %v1384_v63 = vpop.eup %1383 }
 0x194   :  { %v1386_v50 = vpop.eup %1385  ;;  %v625_v49 = vadd.f32 1.0, %v1384_v63  ;;  %1389 = vtanh.f32 %v621_v46 }
 0x195   :  { %v626_v13 = vadd.f32 1.0, %v1386_v50 }
 0x196   :  { %v628_v45 = vmul.f32 0.5, %v625_v49 }
 0x197   :  { %v629_v56 = vmul.f32 0.5, %v626_v13 }
 0x198   :  { %v1388_v54 = vpop.eup %1387 }
 0x199   :  { %v632_v57 = vmul.f32 %v629_v56, %v2109_v55  ;;  %v633_v51 = vmul.f32 %v1388_v54, %v628_v45  ;;  %v2265_v45 = vld [vmem:[#allocation8 + $0x1f8] sm:$0xff]  ;;  %v2268_v56 = vld [vmem:[#allocation8 + $0x1c0] sm:$0xff]  ;;  %v2271_v54 = vld [vmem:[#allocation8 + $0x1c8] sm:$0xff] }
 0x19a   :  { %v1390_v58 = vpop.eup %1389 }
 0x19b   :  { %v2181_v44 = vadd.f32 %v633_v51, %v632_v57  ;;  %v627_v26 = vadd.f32 1.0, %v1390_v58  ;;  %v2274_v57 = vld [vmem:[#allocation8 + $0x1d0] sm:$0xff]  ;;  %v2277_v51 = vld [vmem:[#allocation8 + $0x1d8] sm:$0xff]  ;;  %v2280_v58 = vld [vmem:[#allocation8 + $0x1a0] sm:$0xff] }
 0x19d   :  { %1391 = vtanh.f32 %v2181_v44  ;;  %v630_v39 = vmul.f32 0.5, %v627_v26  ;;  %v2286_v26 = vld [vmem:[#allocation8 + $0x1b0] sm:$0xff] }
 0x1a3   :  { %v1392_v61 = vpop.eup %1391 }
 0x1a4   :  { %v636_v53 = vmul.f32 %v1392_v61, %v630_v39  ;;  %v2289_v39 = vld [vmem:[#allocation8 + $0x1b8] sm:$0xff]  ;;  %v2292_v61 = vld [vmem:[#allocation8 + $0x180] sm:$0xff] }
 0x1a6   :  { %638 = vst [vmem:[#allocation11 + $0x8] sm:$0xff] %v636_v53  ;;  %660 = vmatmul.f32.vlgmr.msrb.gmra.mxu0 %v636_v53  ;;  %680 = vmatmul.f32.vlgmr.msrb.gmra.mxu1 %v636_v53 }
 0x1a7   :  { %700 = vmatmul.f32.vlgmr.msrb.gmra.mxu2 %v636_v53  ;;  %720 = vmatmul.f32.vlgmr.msrb.gmra.mxu3 %v636_v53  ;;  %v2295_v53 = vld [vmem:[#allocation8 + $0x188] sm:$0xff] }
 0x1a8   :  { %862 = vmatpush.msrb.mxu0 %v1683_v1  ;;  %882 = vmatpush.msrb.mxu1 %v1685_v2  ;;  %v2801_v1 = vld [vmem:[#allocation19_spill] sm:$0xff]  ;;  %v2802_v2 = vld [vmem:[#allocation20_spill] sm:$0xff] }
 0x1a9   :  { %902 = vmatpush.msrb.mxu2 %v1689_v4  ;;  %922 = vmatpush.msrb.mxu3 %v1687_v3  ;;  %v2803_v3 = vld [vmem:[#allocation22_spill] sm:$0xff]  ;;  %v2804_v4 = vld [vmem:[#allocation21_spill] sm:$0xff] }
 0x1aa   :  { %863 = vmatpush.msrb.mxu0 %v1691_v5  ;;  %883 = vmatpush.msrb.mxu1 %v1693_v6  ;;  %v2805_v5 = vld [vmem:[#allocation23_spill] sm:$0xff]  ;;  %v2806_v6 = vld [vmem:[#allocation24_spill] sm:$0xff] }
 0x1ab   :  { %903 = vmatpush.msrb.mxu2 %v1699_v8  ;;  %923 = vmatpush.msrb.mxu3 %v1697_v7  ;;  %v2807_v7 = vld [vmem:[#allocation26_spill] sm:$0xff]  ;;  %v2808_v8 = vld [vmem:[#allocation25_spill] sm:$0xff] }
 0x1ac   :  { %864 = vmatpush.msrb.mxu0 %v1703_v9  ;;  %884 = vmatpush.msrb.mxu1 %v1705_v10  ;;  %v2809_v9 = vld [vmem:[#allocation27_spill] sm:$0xff]  ;;  %v2810_v10 = vld [vmem:[#allocation28_spill] sm:$0xff] }
 0x1ad   :  { %904 = vmatpush.msrb.mxu2 %v1711_v12  ;;  %924 = vmatpush.msrb.mxu3 %v1709_v11  ;;  %v2811_v11 = vld [vmem:[#allocation30_spill] sm:$0xff]  ;;  %v2812_v12 = vld [vmem:[#allocation29_spill] sm:$0xff] }
 0x1ae   :  { %865 = vmatpush.msrb.mxu0 %v1721_v14  ;;  %885 = vmatpush.msrb.mxu1 %v1723_v15  ;;  %v2813_v14 = vld [vmem:[#allocation31_spill] sm:$0xff]  ;;  %v2814_v15 = vld [vmem:[#allocation32_spill] sm:$0xff] }
 0x1af   :  { %905 = vmatpush.msrb.mxu2 %v1728_v17  ;;  %925 = vmatpush.msrb.mxu3 %v1726_v16  ;;  %v2815_v16 = vld [vmem:[#allocation34_spill] sm:$0xff]  ;;  %v2816_v17 = vld [vmem:[#allocation33_spill] sm:$0xff] }
 0x1b0   :  { %866 = vmatpush.msrb.mxu0 %v1730_v18  ;;  %886 = vmatpush.msrb.mxu1 %v1732_v19  ;;  %v2817_v18 = vld [vmem:[#allocation35_spill] sm:$0xff]  ;;  %v2818_v19 = vld [vmem:[#allocation36_spill] sm:$0xff] }
 0x1b1   :  { %906 = vmatpush.msrb.mxu2 %v1738_v21  ;;  %926 = vmatpush.msrb.mxu3 %v1736_v20  ;;  %v2819_v20 = vld [vmem:[#allocation38_spill] sm:$0xff]  ;;  %v2820_v21 = vld [vmem:[#allocation37_spill] sm:$0xff] }
 0x1b2   :  { %867 = vmatpush.msrb.mxu0 %v1742_v22  ;;  %887 = vmatpush.msrb.mxu1 %v1744_v23 }
 0x1b3   :  { %907 = vmatpush.msrb.mxu2 %v1750_v25  ;;  %927 = vmatpush.msrb.mxu3 %v1748_v24  ;;  %v2821_v24 = vld [vmem:[#allocation43_spill] sm:$0xff] }
 0x1b4   :  { %868 = vmatpush.msrb.mxu0 %v1760_v27  ;;  %888 = vmatpush.msrb.mxu1 %v1762_v28  ;;  %v2822_v27 = vld [vmem:[#allocation44_spill] sm:$0xff] }
 0x1b5   :  { %908 = vmatpush.msrb.mxu2 %v1767_v30  ;;  %928 = vmatpush.msrb.mxu3 %v1765_v29 }
 0x1b6   :  { %869 = vmatpush.msrb.mxu0 %v1769_v31  ;;  %889 = vmatpush.msrb.mxu1 %v1771_v32 }
 0x1b7   :  { %909 = vmatpush.msrb.mxu2 %v1777_v34  ;;  %929 = vmatpush.msrb.mxu3 %v1775_v33  ;;  %v2823_v33 = vld [vmem:[#allocation45_spill] sm:$0xff] }
 0x1b8   :  { %870 = vmatpush.msrb.mxu0 %v1781_v35  ;;  %890 = vmatpush.msrb.mxu1 %v1783_v36  ;;  %v2824_v35 = vld [vmem:[#allocation46_spill] sm:$0xff] }
 0x1b9   :  { %910 = vmatpush.msrb.mxu2 %v1789_v38  ;;  %930 = vmatpush.msrb.mxu3 %v1787_v37 }
 0x1ba   :  { %871 = vmatpush.msrb.mxu0 %v1799_v40  ;;  %891 = vmatpush.msrb.mxu1 %v1801_v41 }
 0x1bb   :  { %911 = vmatpush.msrb.mxu2 %v1806_v43  ;;  %931 = vmatpush.msrb.mxu3 %v1804_v42 }
 0x1bc   :  { %872 = vmatpush.msrb.mxu0 %v2773_v48  ;;  %892 = vmatpush.msrb.mxu1 %v2774_v59 }
 0x1bd   :  { %912 = vmatpush.msrb.mxu2 %v2775_v60  ;;  %932 = vmatpush.msrb.mxu3 %v2776_v62 }
 0x1be   :  { %873 = vmatpush.msrb.mxu0 %v2801_v1  ;;  %893 = vmatpush.msrb.mxu1 %v2802_v2  ;;  %v2298_v1 = vld [vmem:[#allocation8 + $0x190] sm:$0xff]  ;;  %v2301_v2 = vld [vmem:[#allocation8 + $0x198] sm:$0xff] }
 0x1bf   :  { %913 = vmatpush.msrb.mxu2 %v2803_v3  ;;  %933 = vmatpush.msrb.mxu3 %v2804_v4  ;;  %v2304_v3 = vld [vmem:[#allocation8 + $0x160] sm:$0xff]  ;;  %v2307_v4 = vld [vmem:[#allocation8 + $0x168] sm:$0xff] }
 0x1c0   :  { %874 = vmatpush.msrb.mxu0 %v2805_v5  ;;  %894 = vmatpush.msrb.mxu1 %v2806_v6  ;;  %v2310_v5 = vld [vmem:[#allocation8 + $0x170] sm:$0xff]  ;;  %v2313_v6 = vld [vmem:[#allocation8 + $0x178] sm:$0xff] }
 0x1c1   :  { %914 = vmatpush.msrb.mxu2 %v2807_v7  ;;  %934 = vmatpush.msrb.mxu3 %v2808_v8  ;;  %v2316_v7 = vld [vmem:[#allocation8 + $0x140] sm:$0xff]  ;;  %v2319_v8 = vld [vmem:[#allocation8 + $0x148] sm:$0xff] }
 0x1c2   :  { %875 = vmatpush.msrb.mxu0 %v2809_v9  ;;  %895 = vmatpush.msrb.mxu1 %v2810_v10  ;;  %v2322_v9 = vld [vmem:[#allocation8 + $0x150] sm:$0xff]  ;;  %v2325_v10 = vld [vmem:[#allocation8 + $0x158] sm:$0xff] }
 0x1c3   :  { %915 = vmatpush.msrb.mxu2 %v2811_v11  ;;  %935 = vmatpush.msrb.mxu3 %v2812_v12  ;;  %v2328_v11 = vld [vmem:[#allocation8 + $0x120] sm:$0xff]  ;;  %v2331_v12 = vld [vmem:[#allocation8 + $0x128] sm:$0xff] }
 0x1c4   :  { %876 = vmatpush.msrb.mxu0 %v2813_v14  ;;  %896 = vmatpush.msrb.mxu1 %v2814_v15  ;;  %v2334_v14 = vld [vmem:[#allocation8 + $0x130] sm:$0xff]  ;;  %v2337_v15 = vld [vmem:[#allocation8 + $0x138] sm:$0xff] }
 0x1c5   :  { %916 = vmatpush.msrb.mxu2 %v2815_v16  ;;  %936 = vmatpush.msrb.mxu3 %v2816_v17  ;;  %v2340_v16 = vld [vmem:[#allocation8 + $0x100] sm:$0xff]  ;;  %v2343_v17 = vld [vmem:[#allocation8 + $0x108] sm:$0xff] }
 0x1c6   :  { %877 = vmatpush.msrb.mxu0 %v2817_v18  ;;  %897 = vmatpush.msrb.mxu1 %v2818_v19  ;;  %v2346_v18 = vld [vmem:[#allocation8 + $0x110] sm:$0xff]  ;;  %v2349_v19 = vld [vmem:[#allocation8 + $0x118] sm:$0xff] }
 0x1c7   :  { %917 = vmatpush.msrb.mxu2 %v2819_v20  ;;  %937 = vmatpush.msrb.mxu3 %v2820_v21  ;;  %v2352_v20 = vld [vmem:[#allocation8 + $0xe0] sm:$0xff]  ;;  %v2355_v21 = vld [vmem:[#allocation8 + $0xe8] sm:$0xff] }
 0x223   :  { %v661_v22 = vpop.f32.mrf.mxu0  ;;  %v681_v23 = vpop.f32.mrf.mxu1 }
 0x224   :  { %v724_v25 = vadd.f32 %v661_v22, %v2821_v24  ;;  %v725_v28 = vadd.f32 %v681_v23, %v2822_v27  ;;  %v2358_v22 = vld [vmem:[#allocation8 + $0xf0] sm:$0xff]  ;;  %v2361_v23 = vld [vmem:[#allocation8 + $0xf8] sm:$0xff]  ;;  %v2364_v24 = vld [vmem:[#allocation8 + $0xc0] sm:$0xff] }
 0x225   :  { %v2370_v27 = vld [vmem:[#allocation8 + $0xd0] sm:$0xff] }
 0x226   :  { %v728_v29 = vmul.f32 0.5, %v724_v25  ;;  %v729_v30 = vmul.f32 0.5, %v725_v28  ;;  %v2367_v25 = vld [vmem:[#allocation8 + $0xc8] sm:$0xff]  ;;  %v2373_v28 = vld [vmem:[#allocation8 + $0xd8] sm:$0xff] }
 0x228   :  { %1393 = vtanh.f32 %v728_v29  ;;  %v2376_v29 = vld [vmem:[#allocation8 + $0xa0] sm:$0xff] }
 0x229   :  { %1395 = vtanh.f32 %v729_v30  ;;  %v2379_v30 = vld [vmem:[#allocation8 + $0xa8] sm:$0xff] }
 0x22a   :  { %v701_v31 = vpop.f32.mrf.mxu2  ;;  %v721_v32 = vpop.f32.mrf.mxu3 }
 0x22b   :  { %v726_v34 = vadd.f32 %v701_v31, %v2823_v33  ;;  %v727_v36 = vadd.f32 %v721_v32, %v2824_v35  ;;  %v2382_v31 = vld [vmem:[#allocation8 + $0xb0] sm:$0xff]  ;;  %v2385_v32 = vld [vmem:[#allocation8 + $0xb8] sm:$0xff]  ;;  %v2388_v33 = vld [vmem:[#allocation8 + $0x80] sm:$0xff] }
 0x22c   :  { %2825 = vst [vmem:[#allocation15_spill] sm:$0xff] %v2388_v33  ;;  %v2394_v35 = vld [vmem:[#allocation8 + $0x90] sm:$0xff] }
 0x22d   :  { %v730_v37 = vmul.f32 0.5, %v726_v34  ;;  %1397 = vtanh.f32 %v727_v36  ;;  %v2391_v34 = vld [vmem:[#allocation8 + $0x88] sm:$0xff]  ;;  %2827 = vst [vmem:[#allocation18_spill] sm:$0xff] %v2394_v35  ;;  %v2397_v36 = vld [vmem:[#allocation8 + $0x98] sm:$0xff] }
 0x22e   :  { %v1394_v38 = vpop.eup %1393  ;;  %2826 = vst [vmem:[#allocation16_spill] sm:$0xff] %v2391_v34 }
 0x22f   :  { %v1396_v40 = vpop.eup %1395  ;;  %v734_v41 = vadd.f32 1.0, %v1394_v38  ;;  %1399 = vtanh.f32 %v730_v37  ;;  %2828 = vst [vmem:[#allocation17_spill] sm:$0xff] %v2397_v36  ;;  %v2400_v37 = vld [vmem:[#allocation8 + $0x60] sm:$0xff]  ;;  %v2403_v38 = vld [vmem:[#allocation8 + $0x68] sm:$0xff] }
 0x230   :  { %v735_v42 = vadd.f32 1.0, %v1396_v40  ;;  %2829 = vst [vmem:[#allocation39_spill] sm:$0xff] %v2400_v37  ;;  %v2406_v40 = vld [vmem:[#allocation8 + $0x70] sm:$0xff] }
 0x231   :  { %v737_v43 = vmul.f32 0.5, %v734_v41  ;;  %2830 = vst [vmem:[#allocation40_spill] sm:$0xff] %v2403_v38  ;;  %v2409_v41 = vld [vmem:[#allocation8 + $0x78] sm:$0xff] }
 0x232   :  { %v738_v63 = vmul.f32 0.5, %v735_v42  ;;  %2831 = vst [vmem:[#allocation41_spill] sm:$0xff] %v2406_v40  ;;  %v2412_v42 = vld [vmem:[#allocation8 + $0x40] sm:$0xff] }
 0x233   :  { %v1398_v55 = vpop.eup %1397  ;;  %2832 = vst [vmem:[#allocation42_spill] sm:$0xff] %v2409_v41 }
 0x234   :  { %v741_v48 = vmul.f32 %v738_v63, %v2181_v44  ;;  %v742_v59 = vmul.f32 %v1398_v55, %v737_v43  ;;  %v2283_v44 = vld [vmem:[#allocation8 + $0x1a8] sm:$0xff]  ;;  %2833 = vst [vmem:[#allocation19_spill] sm:$0xff] %v2412_v42  ;;  %v2418_v63 = vld [vmem:[#allocation8 + $0x50] sm:$0xff]  ;;  %v2421_v55 = vld [vmem:[#allocation8 + $0x58] sm:$0xff] }
 0x235   :  { %v1400_v60 = vpop.eup %1399  ;;  %v2415_v43 = vld [vmem:[#allocation8 + $0x48] sm:$0xff]  ;;  %2835 = vst [vmem:[#allocation22_spill] sm:$0xff] %v2418_v63 }
 0x236   :  { %v2253_v62 = vadd.f32 %v742_v59, %v741_v48  ;;  %v736_v13 = vadd.f32 1.0, %v1400_v60  ;;  %2834 = vst [vmem:[#allocation20_spill] sm:$0xff] %v2415_v43  ;;  %v2424_v48 = vld [vmem:[#allocation8 + $0x20] sm:$0xff]  ;;  %v2427_v59 = vld [vmem:[#allocation8 + $0x28] sm:$0xff]  ;;  %v2430_v60 = vld [vmem:[#allocation8 + $0x30] sm:$0xff] }
 0x237   :  { %2836 = vst [vmem:[#allocation21_spill] sm:$0xff] %v2421_v55 }
 0x238   :  { %1401 = vtanh.f32 %v2253_v62  ;;  %v739_v49 = vmul.f32 0.5, %v736_v13  ;;  %2837 = vst [vmem:[#allocation23_spill] sm:$0xff] %v2424_v48  ;;  %v2433_v13 = vld [vmem:[#allocation8 + $0x38] sm:$0xff] }
 0x239   :  { %2838 = vst [vmem:[#allocation24_spill] sm:$0xff] %v2427_v59 }
 0x23a   :  { %2839 = vst [vmem:[#allocation26_spill] sm:$0xff] %v2430_v60 }
 0x23b   :  { %2840 = vst [vmem:[#allocation25_spill] sm:$0xff] %v2433_v13 }
 0x23e   :  { %v1402_v46 = vpop.eup %1401 }
 0x23f   :  { %v745_v50 = vmul.f32 %v1402_v46, %v739_v49  ;;  %v2436_v49 = vld [vmem:[#allocation8] sm:$0xff]  ;;  %v2439_v46 = vld [vmem:[#allocation8 + $0x8] sm:$0xff] }
 0x240   :  { %2841 = vst [vmem:[#allocation27_spill] sm:$0xff] %v2436_v49 }
 0x241   :  { %747 = vst [vmem:[#allocation11 + $0x10] sm:$0xff] %v745_v50  ;;  %769 = vmatmul.f32.vlgmr.msra.gmra.mxu0 %v745_v50  ;;  %789 = vmatmul.f32.vlgmr.msra.gmra.mxu1 %v745_v50 }
 0x242   :  { %809 = vmatmul.f32.vlgmr.msra.gmra.mxu2 %v745_v50  ;;  %829 = vmatmul.f32.vlgmr.msra.gmra.mxu3 %v745_v50  ;;  %2842 = vst [vmem:[#allocation28_spill] sm:$0xff] %v2439_v46  ;;  %v2442_v50 = vld [vmem:[#allocation8 + $0x10] sm:$0xff] }
 0x243   :  { %971 = vmatpush.msra.mxu0 %v2256_v0  ;;  %991 = vmatpush.msra.mxu1 %v2259_v52  ;;  %2843 = vst [vmem:[#allocation30_spill] sm:$0xff] %v2442_v50 }
 0x244   :  { %1011 = vmatpush.msra.mxu2 %v2262_v47  ;;  %1031 = vmatpush.msra.mxu3 %v2265_v45 }
 0x245   :  { %972 = vmatpush.msra.mxu0 %v2268_v56  ;;  %992 = vmatpush.msra.mxu1 %v2271_v54 }
 0x246   :  { %1012 = vmatpush.msra.mxu2 %v2274_v57  ;;  %1032 = vmatpush.msra.mxu3 %v2277_v51 }
 0x247   :  { %973 = vmatpush.msra.mxu0 %v2280_v58  ;;  %993 = vmatpush.msra.mxu1 %v2283_v44 }
 0x248   :  { %1013 = vmatpush.msra.mxu2 %v2286_v26  ;;  %1033 = vmatpush.msra.mxu3 %v2289_v39 }
 0x249   :  { %974 = vmatpush.msra.mxu0 %v2292_v61  ;;  %994 = vmatpush.msra.mxu1 %v2295_v53 }
 0x24a   :  { %1014 = vmatpush.msra.mxu2 %v2298_v1  ;;  %1034 = vmatpush.msra.mxu3 %v2301_v2 }
 0x24b   :  { %975 = vmatpush.msra.mxu0 %v2304_v3  ;;  %995 = vmatpush.msra.mxu1 %v2307_v4 }
 0x24c   :  { %1015 = vmatpush.msra.mxu2 %v2310_v5  ;;  %1035 = vmatpush.msra.mxu3 %v2313_v6 }
 0x24d   :  { %976 = vmatpush.msra.mxu0 %v2316_v7  ;;  %996 = vmatpush.msra.mxu1 %v2319_v8 }
 0x24e   :  { %1016 = vmatpush.msra.mxu2 %v2322_v9  ;;  %1036 = vmatpush.msra.mxu3 %v2325_v10 }
 0x24f   :  { %977 = vmatpush.msra.mxu0 %v2328_v11  ;;  %997 = vmatpush.msra.mxu1 %v2331_v12 }
 0x250   :  { %1017 = vmatpush.msra.mxu2 %v2334_v14  ;;  %1037 = vmatpush.msra.mxu3 %v2337_v15 }
 0x251   :  { %978 = vmatpush.msra.mxu0 %v2340_v16  ;;  %998 = vmatpush.msra.mxu1 %v2343_v17 }
 0x252   :  { %1018 = vmatpush.msra.mxu2 %v2346_v18  ;;  %1038 = vmatpush.msra.mxu3 %v2349_v19 }
 0x253   :  { %979 = vmatpush.msra.mxu0 %v2352_v20  ;;  %999 = vmatpush.msra.mxu1 %v2355_v21 }
 0x254   :  { %1019 = vmatpush.msra.mxu2 %v2358_v22  ;;  %1039 = vmatpush.msra.mxu3 %v2361_v23 }
 0x255   :  { %980 = vmatpush.msra.mxu0 %v2364_v24  ;;  %1000 = vmatpush.msra.mxu1 %v2367_v25 }
 0x256   :  { %1020 = vmatpush.msra.mxu2 %v2370_v27  ;;  %1040 = vmatpush.msra.mxu3 %v2373_v28 }
 0x257   :  { %981 = vmatpush.msra.mxu0 %v2376_v29  ;;  %1001 = vmatpush.msra.mxu1 %v2379_v30 }
 0x258   :  { %1021 = vmatpush.msra.mxu2 %v2382_v31  ;;  %1041 = vmatpush.msra.mxu3 %v2385_v32 }
 0x259   :  { %982 = vmatpush.msra.mxu0 %v2388_v33  ;;  %1002 = vmatpush.msra.mxu1 %v2391_v34 }
 0x25a   :  { %1022 = vmatpush.msra.mxu2 %v2394_v35  ;;  %1042 = vmatpush.msra.mxu3 %v2397_v36 }
 0x25b   :  { %983 = vmatpush.msra.mxu0 %v2400_v37  ;;  %1003 = vmatpush.msra.mxu1 %v2403_v38  ;;  %v2848_v37 = vld [vmem:[#allocation50_spill] sm:$0xff] }
 0x25c   :  { %1023 = vmatpush.msra.mxu2 %v2406_v40  ;;  %1043 = vmatpush.msra.mxu3 %v2409_v41  ;;  %v2847_v40 = vld [vmem:[#allocation49_spill] sm:$0xff] }
 0x25d   :  { %984 = vmatpush.msra.mxu0 %v2412_v42  ;;  %1004 = vmatpush.msra.mxu1 %v2415_v43 }
 0x25e   :  { %1024 = vmatpush.msra.mxu2 %v2418_v63  ;;  %1044 = vmatpush.msra.mxu3 %v2421_v55  ;;  %v2845_v55 = vld [vmem:[#allocation47_spill] sm:$0xff]  ;;  %v2846_v63 = vld [vmem:[#allocation48_spill] sm:$0xff] }
 0x25f   :  { %985 = vmatpush.msra.mxu0 %v2424_v48  ;;  %1005 = vmatpush.msra.mxu1 %v2427_v59  ;;  %v2445_v59 = vld [vmem:[#allocation8 + $0x18] sm:$0xff] }
 0x260   :  { %1025 = vmatpush.msra.mxu2 %v2430_v60  ;;  %1045 = vmatpush.msra.mxu3 %v2433_v13  ;;  %2844 = vst [vmem:[#allocation29_spill] sm:$0xff] %v2445_v59 }
 0x261   :  { %986 = vmatpush.msra.mxu0 %v2436_v49  ;;  %1006 = vmatpush.msra.mxu1 %v2439_v46 }
 0x262   :  { %1026 = vmatpush.msra.mxu2 %v2442_v50  ;;  %1046 = vmatpush.msra.mxu3 %v2445_v59 }
 0x2be   :  { %v770_v60 = vpop.f32.mrf.mxu0  ;;  %v790_v48 = vpop.f32.mrf.mxu1 }
 0x2bf   :  { %v833_v13 = vadd.f32 %v770_v60, %v2845_v55  ;;  %v834_v43 = vadd.f32 %v790_v48, %v2846_v63 }
 0x2c1   :  { %v837_v42 = vmul.f32 0.5, %v833_v13  ;;  %v838_v49 = vmul.f32 0.5, %v834_v43 }
 0x2c3   :  { %1403 = vtanh.f32 %v837_v42 }
 0x2c4   :  { %1405 = vtanh.f32 %v838_v49  ;;  %v2855_v49 = vld [vmem:[#allocation41_spill] sm:$0xff] }
 0x2c5   :  { %v810_v41 = vpop.f32.mrf.mxu2  ;;  %v830_v46 = vpop.f32.mrf.mxu3 }
 0x2c6   :  { %v835_v38 = vadd.f32 %v810_v41, %v2847_v40  ;;  %v836_v50 = vadd.f32 %v830_v46, %v2848_v37  ;;  %v2856_v46 = vld [vmem:[#allocation42_spill] sm:$0xff] }
 0x2c8   :  { %v839_v36 = vmul.f32 0.5, %v835_v38  ;;  %1407 = vtanh.f32 %v836_v50  ;;  %v2857_v50 = vld [vmem:[#allocation19_spill] sm:$0xff] }
 0x2c9   :  { %v1404_v35 = vpop.eup %1403 }
 0x2ca   :  { %v1406_v59 = vpop.eup %1405  ;;  %v843_v34 = vadd.f32 1.0, %v1404_v35  ;;  %1409 = vtanh.f32 %v839_v36  ;;  %v2852_v35 = vld [vmem:[#allocation17_spill] sm:$0xff]  ;;  %v2853_v36 = vld [vmem:[#allocation39_spill] sm:$0xff] }
 0x2cb   :  { %v844_v33 = vadd.f32 1.0, %v1406_v59  ;;  %v2854_v59 = vld [vmem:[#allocation40_spill] sm:$0xff] }
 0x2cc   :  { %v846_v55 = vmul.f32 0.5, %v843_v34  ;;  %v2851_v34 = vld [vmem:[#allocation18_spill] sm:$0xff] }
 0x2cd   :  { %v847_v60 = vmul.f32 0.5, %v844_v33  ;;  %v2850_v33 = vld [vmem:[#allocation16_spill] sm:$0xff] }
 0x2ce   :  { %v1408_v63 = vpop.eup %1407 }
 0x2cf   :  { %v850_v43 = vmul.f32 %v847_v60, %v2253_v62  ;;  %v851_v42 = vmul.f32 %v1408_v63, %v846_v55  ;;  %v2849_v62 = vld [vmem:[#allocation15_spill] sm:$0xff]  ;;  %v2858_v55 = vld [vmem:[#allocation20_spill] sm:$0xff]  ;;  %v2859_v60 = vld [vmem:[#allocation22_spill] sm:$0xff] }
 0x2d0   :  { %v1410_v48 = vpop.eup %1409  ;;  %v2860_v63 = vld [vmem:[#allocation21_spill] sm:$0xff] }
 0x2d1   :  { %v2453_v13 = vadd.f32 %v851_v42, %v850_v43  ;;  %v845_v40 = vadd.f32 1.0, %v1410_v48  ;;  %v2861_v43 = vld [vmem:[#allocation23_spill] sm:$0xff]  ;;  %v2862_v42 = vld [vmem:[#allocation24_spill] sm:$0xff]  ;;  %v2863_v48 = vld [vmem:[#allocation26_spill] sm:$0xff] }
 0x2d3   :  { %1411 = vtanh.f32 %v2453_v13  ;;  %v848_v37 = vmul.f32 0.5, %v845_v40  ;;  %v2864_v40 = vld [vmem:[#allocation25_spill] sm:$0xff] }
 0x2d9   :  { %v1412_v38 = vpop.eup %1411 }
 0x2da   :  { %v854_v41 = vmul.f32 %v1412_v38, %v848_v37  ;;  %v2865_v37 = vld [vmem:[#allocation27_spill] sm:$0xff]  ;;  %v2866_v38 = vld [vmem:[#allocation28_spill] sm:$0xff] }
 0x2dc   :  { %856 = vst [vmem:[#allocation11 + $0x18] sm:$0xff] %v854_v41  ;;  %878 = vmatmul.f32.vlgmr.msrb.gmra.mxu0 %v854_v41  ;;  %898 = vmatmul.f32.vlgmr.msrb.gmra.mxu1 %v854_v41 }
 0x2dd   :  { %918 = vmatmul.f32.vlgmr.msrb.gmra.mxu2 %v854_v41  ;;  %938 = vmatmul.f32.vlgmr.msrb.gmra.mxu3 %v854_v41  ;;  %v2867_v41 = vld [vmem:[#allocation30_spill] sm:$0xff] }
 0x2de   :  { %1080 = vmatpush.msrb.mxu0 %v2256_v0  ;;  %1100 = vmatpush.msrb.mxu1 %v2259_v52 }
 0x2df   :  { %1120 = vmatpush.msrb.mxu2 %v2262_v47  ;;  %1140 = vmatpush.msrb.mxu3 %v2265_v45 }
 0x2e0   :  { %1081 = vmatpush.msrb.mxu0 %v2268_v56  ;;  %1101 = vmatpush.msrb.mxu1 %v2271_v54 }
 0x2e1   :  { %1121 = vmatpush.msrb.mxu2 %v2274_v57  ;;  %1141 = vmatpush.msrb.mxu3 %v2277_v51 }
 0x2e2   :  { %1082 = vmatpush.msrb.mxu0 %v2280_v58  ;;  %1102 = vmatpush.msrb.mxu1 %v2283_v44 }
 0x2e3   :  { %1122 = vmatpush.msrb.mxu2 %v2286_v26  ;;  %1142 = vmatpush.msrb.mxu3 %v2289_v39 }
 0x2e4   :  { %1083 = vmatpush.msrb.mxu0 %v2292_v61  ;;  %1103 = vmatpush.msrb.mxu1 %v2295_v53 }
 0x2e5   :  { %1123 = vmatpush.msrb.mxu2 %v2298_v1  ;;  %1143 = vmatpush.msrb.mxu3 %v2301_v2 }
 0x2e6   :  { %1084 = vmatpush.msrb.mxu0 %v2304_v3  ;;  %1104 = vmatpush.msrb.mxu1 %v2307_v4 }
 0x2e7   :  { %1124 = vmatpush.msrb.mxu2 %v2310_v5  ;;  %1144 = vmatpush.msrb.mxu3 %v2313_v6 }
 0x2e8   :  { %1085 = vmatpush.msrb.mxu0 %v2316_v7  ;;  %1105 = vmatpush.msrb.mxu1 %v2319_v8 }
 0x2e9   :  { %1125 = vmatpush.msrb.mxu2 %v2322_v9  ;;  %1145 = vmatpush.msrb.mxu3 %v2325_v10 }
 0x2ea   :  { %1086 = vmatpush.msrb.mxu0 %v2328_v11  ;;  %1106 = vmatpush.msrb.mxu1 %v2331_v12 }
 0x2eb   :  { %1126 = vmatpush.msrb.mxu2 %v2334_v14  ;;  %1146 = vmatpush.msrb.mxu3 %v2337_v15 }
 0x2ec   :  { %1087 = vmatpush.msrb.mxu0 %v2340_v16  ;;  %1107 = vmatpush.msrb.mxu1 %v2343_v17 }
 0x2ed   :  { %1127 = vmatpush.msrb.mxu2 %v2346_v18  ;;  %1147 = vmatpush.msrb.mxu3 %v2349_v19 }
 0x2ee   :  { %1088 = vmatpush.msrb.mxu0 %v2352_v20  ;;  %1108 = vmatpush.msrb.mxu1 %v2355_v21 }
 0x2ef   :  { %1128 = vmatpush.msrb.mxu2 %v2358_v22  ;;  %1148 = vmatpush.msrb.mxu3 %v2361_v23 }
 0x2f0   :  { %1089 = vmatpush.msrb.mxu0 %v2364_v24  ;;  %1109 = vmatpush.msrb.mxu1 %v2367_v25 }
 0x2f1   :  { %1129 = vmatpush.msrb.mxu2 %v2370_v27  ;;  %1149 = vmatpush.msrb.mxu3 %v2373_v28 }
 0x2f2   :  { %1090 = vmatpush.msrb.mxu0 %v2376_v29  ;;  %1110 = vmatpush.msrb.mxu1 %v2379_v30 }
 0x2f3   :  { %1130 = vmatpush.msrb.mxu2 %v2382_v31  ;;  %1150 = vmatpush.msrb.mxu3 %v2385_v32 }
 0x2f4   :  { %1091 = vmatpush.msrb.mxu0 %v2849_v62  ;;  %1111 = vmatpush.msrb.mxu1 %v2850_v33 }
 0x2f5   :  { %1131 = vmatpush.msrb.mxu2 %v2851_v34  ;;  %1151 = vmatpush.msrb.mxu3 %v2852_v35  ;;  %v2872_v35 = vld [vmem:[#allocation54_spill] sm:$0xff] }
 0x2f6   :  { %1092 = vmatpush.msrb.mxu0 %v2853_v36  ;;  %1112 = vmatpush.msrb.mxu1 %v2854_v59  ;;  %v2871_v36 = vld [vmem:[#allocation53_spill] sm:$0xff] }
 0x2f7   :  { %1132 = vmatpush.msrb.mxu2 %v2855_v49  ;;  %1152 = vmatpush.msrb.mxu3 %v2856_v46  ;;  %v2869_v46 = vld [vmem:[#allocation51_spill] sm:$0xff]  ;;  %v2870_v49 = vld [vmem:[#allocation52_spill] sm:$0xff] }
 0x2f8   :  { %1093 = vmatpush.msrb.mxu0 %v2857_v50  ;;  %1113 = vmatpush.msrb.mxu1 %v2858_v55  ;;  %v2868_v50 = vld [vmem:[#allocation29_spill] sm:$0xff] }
 0x2f9   :  { %1133 = vmatpush.msrb.mxu2 %v2859_v60  ;;  %1153 = vmatpush.msrb.mxu3 %v2860_v63 }
 0x2fa   :  { %1094 = vmatpush.msrb.mxu0 %v2861_v43  ;;  %1114 = vmatpush.msrb.mxu1 %v2862_v42 }
 0x2fb   :  { %1134 = vmatpush.msrb.mxu2 %v2863_v48  ;;  %1154 = vmatpush.msrb.mxu3 %v2864_v40 }
 0x2fc   :  { %1095 = vmatpush.msrb.mxu0 %v2865_v37  ;;  %1115 = vmatpush.msrb.mxu1 %v2866_v38 }
 0x2fd   :  { %1135 = vmatpush.msrb.mxu2 %v2867_v41  ;;  %1155 = vmatpush.msrb.mxu3 %v2868_v50 }
 0x359   :  { %v879_v55 = vpop.f32.mrf.mxu0  ;;  %v899_v60 = vpop.f32.mrf.mxu1 }
 0x35a   :  { %v942_v63 = vadd.f32 %v879_v55, %v2869_v46  ;;  %v943_v43 = vadd.f32 %v899_v60, %v2870_v49 }
 0x35c   :  { %v946_v59 = vmul.f32 0.5, %v942_v63  ;;  %v947_v42 = vmul.f32 0.5, %v943_v43 }
 0x35e   :  { %1413 = vtanh.f32 %v946_v59 }
 0x35f   :  { %1415 = vtanh.f32 %v947_v42 }
 0x360   :  { %v919_v48 = vpop.f32.mrf.mxu2  ;;  %v939_v40 = vpop.f32.mrf.mxu3 }
 0x361   :  { %v944_v37 = vadd.f32 %v919_v48, %v2871_v36  ;;  %v945_v38 = vadd.f32 %v939_v40, %v2872_v35 }
 0x363   :  { %v948_v34 = vmul.f32 0.5, %v944_v37  ;;  %1417 = vtanh.f32 %v945_v38  ;;  %v1313_v37 = vld [vmem:[#allocation10 + $0x78] sm:$0xff] }
 0x364   :  { %v1414_v41 = vpop.eup %1413 }
 0x365   :  { %v1416_v50 = vpop.eup %1415  ;;  %v952_v33 = vadd.f32 1.0, %v1414_v41  ;;  %1419 = vtanh.f32 %v948_v34 }
 0x366   :  { %v953_v62 = vadd.f32 1.0, %v1416_v50 }
 0x367   :  { %v955_v46 = vmul.f32 0.5, %v952_v33 }
 0x368   :  { %v956_v55 = vmul.f32 0.5, %v953_v62 }
 0x369   :  { %v1418_v49 = vpop.eup %1417 }
 0x36a   :  { %v959_v60 = vmul.f32 %v956_v55, %v2453_v13  ;;  %v960_v59 = vmul.f32 %v1418_v49, %v955_v46  ;;  %v2897_v46 = vld [vmem:[#allocation59_spill] sm:$0xff]  ;;  %v2898_v49 = vld [vmem:[#allocation60_spill] sm:$0xff] }
 0x36b   :  { %v1420_v63 = vpop.eup %1419 }
 0x36c   :  { %v2525_v43 = vadd.f32 %v960_v59, %v959_v60  ;;  %v954_v36 = vadd.f32 1.0, %v1420_v63 }
 0x36e   :  { %1421 = vtanh.f32 %v2525_v43  ;;  %v957_v35 = vmul.f32 0.5, %v954_v36 }
 0x374   :  { %v1422_v42 = vpop.eup %1421 }
 0x375   :  { %v963_v48 = vmul.f32 %v1422_v42, %v957_v35  ;;  %v2899_v35 = vld [vmem:[#allocation61_spill] sm:$0xff] }
 0x377   :  { %965 = vst [vmem:[#allocation11 + $0x20] sm:$0xff] %v963_v48  ;;  %987 = vmatmul.f32.vlgmr.msra.gmra.mxu0 %v963_v48  ;;  %1007 = vmatmul.f32.vlgmr.msra.gmra.mxu1 %v963_v48 }
 0x378   :  { %1027 = vmatmul.f32.vlgmr.msra.gmra.mxu2 %v963_v48  ;;  %1047 = vmatmul.f32.vlgmr.msra.gmra.mxu3 %v963_v48  ;;  %v2900_v48 = vld [vmem:[#allocation62_spill] sm:$0xff] }
 0x379   :  { %1189 = vmatpush.msra.mxu0 %v2256_v0  ;;  %1209 = vmatpush.msra.mxu1 %v2259_v52  ;;  %v2873_v0 = vld [vmem:[#allocation15_spill] sm:$0xff]  ;;  %v2874_v52 = vld [vmem:[#allocation16_spill] sm:$0xff] }
 0x37a   :  { %1229 = vmatpush.msra.mxu2 %v2262_v47  ;;  %1249 = vmatpush.msra.mxu3 %v2265_v45  ;;  %v2875_v47 = vld [vmem:[#allocation18_spill] sm:$0xff]  ;;  %v2876_v45 = vld [vmem:[#allocation17_spill] sm:$0xff] }
 0x37b   :  { %1190 = vmatpush.msra.mxu0 %v2268_v56  ;;  %1210 = vmatpush.msra.mxu1 %v2271_v54  ;;  %v2877_v56 = vld [vmem:[#allocation39_spill] sm:$0xff]  ;;  %v2878_v54 = vld [vmem:[#allocation40_spill] sm:$0xff] }
 0x37c   :  { %1230 = vmatpush.msra.mxu2 %v2274_v57  ;;  %1250 = vmatpush.msra.mxu3 %v2277_v51  ;;  %v2879_v57 = vld [vmem:[#allocation41_spill] sm:$0xff]  ;;  %v2880_v51 = vld [vmem:[#allocation42_spill] sm:$0xff] }
 0x37d   :  { %1191 = vmatpush.msra.mxu0 %v2280_v58  ;;  %1211 = vmatpush.msra.mxu1 %v2283_v44  ;;  %v2881_v58 = vld [vmem:[#allocation19_spill] sm:$0xff]  ;;  %v2882_v44 = vld [vmem:[#allocation20_spill] sm:$0xff] }
 0x37e   :  { %1231 = vmatpush.msra.mxu2 %v2286_v26  ;;  %1251 = vmatpush.msra.mxu3 %v2289_v39  ;;  %v2883_v26 = vld [vmem:[#allocation22_spill] sm:$0xff]  ;;  %v2884_v39 = vld [vmem:[#allocation21_spill] sm:$0xff] }
 0x37f   :  { %1192 = vmatpush.msra.mxu0 %v2292_v61  ;;  %1212 = vmatpush.msra.mxu1 %v2295_v53  ;;  %v2885_v61 = vld [vmem:[#allocation23_spill] sm:$0xff]  ;;  %v2886_v53 = vld [vmem:[#allocation24_spill] sm:$0xff] }
 0x380   :  { %1232 = vmatpush.msra.mxu2 %v2298_v1  ;;  %1252 = vmatpush.msra.mxu3 %v2301_v2  ;;  %v2887_v1 = vld [vmem:[#allocation26_spill] sm:$0xff]  ;;  %v2888_v2 = vld [vmem:[#allocation25_spill] sm:$0xff] }
 0x381   :  { %1193 = vmatpush.msra.mxu0 %v2304_v3  ;;  %1213 = vmatpush.msra.mxu1 %v2307_v4  ;;  %v2889_v3 = vld [vmem:[#allocation27_spill] sm:$0xff]  ;;  %v2890_v4 = vld [vmem:[#allocation28_spill] sm:$0xff] }
 0x382   :  { %1233 = vmatpush.msra.mxu2 %v2310_v5  ;;  %1253 = vmatpush.msra.mxu3 %v2313_v6  ;;  %v2891_v5 = vld [vmem:[#allocation30_spill] sm:$0xff]  ;;  %v2892_v6 = vld [vmem:[#allocation29_spill] sm:$0xff] }
 0x383   :  { %1194 = vmatpush.msra.mxu0 %v2316_v7  ;;  %1214 = vmatpush.msra.mxu1 %v2319_v8 }
 0x384   :  { %1234 = vmatpush.msra.mxu2 %v2322_v9  ;;  %1254 = vmatpush.msra.mxu3 %v2325_v10  ;;  %v2893_v9 = vld [vmem:[#allocation55_spill] sm:$0xff] }
 0x385   :  { %1195 = vmatpush.msra.mxu0 %v2328_v11  ;;  %1215 = vmatpush.msra.mxu1 %v2331_v12  ;;  %v2894_v11 = vld [vmem:[#allocation56_spill] sm:$0xff] }
 0x386   :  { %1235 = vmatpush.msra.mxu2 %v2334_v14  ;;  %1255 = vmatpush.msra.mxu3 %v2337_v15 }
 0x387   :  { %1196 = vmatpush.msra.mxu0 %v2340_v16  ;;  %1216 = vmatpush.msra.mxu1 %v2343_v17 }
 0x388   :  { %1236 = vmatpush.msra.mxu2 %v2346_v18  ;;  %1256 = vmatpush.msra.mxu3 %v2349_v19  ;;  %v2895_v18 = vld [vmem:[#allocation57_spill] sm:$0xff] }
 0x389   :  { %1197 = vmatpush.msra.mxu0 %v2352_v20  ;;  %1217 = vmatpush.msra.mxu1 %v2355_v21  ;;  %v2896_v20 = vld [vmem:[#allocation58_spill] sm:$0xff] }
 0x38a   :  { %1237 = vmatpush.msra.mxu2 %v2358_v22  ;;  %1257 = vmatpush.msra.mxu3 %v2361_v23 }
 0x38b   :  { %1198 = vmatpush.msra.mxu0 %v2364_v24  ;;  %1218 = vmatpush.msra.mxu1 %v2367_v25 }
 0x38c   :  { %1238 = vmatpush.msra.mxu2 %v2370_v27  ;;  %1258 = vmatpush.msra.mxu3 %v2373_v28 }
 0x38d   :  { %1199 = vmatpush.msra.mxu0 %v2376_v29  ;;  %1219 = vmatpush.msra.mxu1 %v2379_v30 }
 0x38e   :  { %1239 = vmatpush.msra.mxu2 %v2382_v31  ;;  %1259 = vmatpush.msra.mxu3 %v2385_v32 }
 0x38f   :  { %1200 = vmatpush.msra.mxu0 %v2873_v0  ;;  %1220 = vmatpush.msra.mxu1 %v2874_v52 }
 0x390   :  { %1240 = vmatpush.msra.mxu2 %v2875_v47  ;;  %1260 = vmatpush.msra.mxu3 %v2876_v45 }
 0x391   :  { %1201 = vmatpush.msra.mxu0 %v2877_v56  ;;  %1221 = vmatpush.msra.mxu1 %v2878_v54 }
 0x392   :  { %1241 = vmatpush.msra.mxu2 %v2879_v57  ;;  %1261 = vmatpush.msra.mxu3 %v2880_v51 }
 0x393   :  { %1202 = vmatpush.msra.mxu0 %v2881_v58  ;;  %1222 = vmatpush.msra.mxu1 %v2882_v44 }
 0x394   :  { %1242 = vmatpush.msra.mxu2 %v2883_v26  ;;  %1262 = vmatpush.msra.mxu3 %v2884_v39 }
 0x395   :  { %1203 = vmatpush.msra.mxu0 %v2885_v61  ;;  %1223 = vmatpush.msra.mxu1 %v2886_v53 }
 0x396   :  { %1243 = vmatpush.msra.mxu2 %v2887_v1  ;;  %1263 = vmatpush.msra.mxu3 %v2888_v2 }
 0x397   :  { %1204 = vmatpush.msra.mxu0 %v2889_v3  ;;  %1224 = vmatpush.msra.mxu1 %v2890_v4  ;;  %v1312_v4 = vld [vmem:[#allocation10 + $0x70] sm:$0xff] }
 0x398   :  { %1244 = vmatpush.msra.mxu2 %v2891_v5  ;;  %1264 = vmatpush.msra.mxu3 %v2892_v6  ;;  %v1311_v5 = vld [vmem:[#allocation10 + $0x68] sm:$0xff]  ;;  %v1310_v6 = vld [vmem:[#allocation10 + $0x60] sm:$0xff] }
 0x3f4   :  { %v988_v7 = vpop.f32.mrf.mxu0  ;;  %v1008_v8 = vpop.f32.mrf.mxu1 }
 0x3f5   :  { %v1051_v10 = vadd.f32 %v988_v7, %v2893_v9  ;;  %v1052_v12 = vadd.f32 %v1008_v8, %v2894_v11  ;;  %v1309_v7 = vld [vmem:[#allocation10 + $0x58] sm:$0xff]  ;;  %v1308_v8 = vld [vmem:[#allocation10 + $0x50] sm:$0xff]  ;;  %v1307_v9 = vld [vmem:[#allocation10 + $0x48] sm:$0xff] }
 0x3f6   :  { %v1305_v11 = vld [vmem:[#allocation10 + $0x38] sm:$0xff] }
 0x3f7   :  { %v1055_v14 = vmul.f32 0.5, %v1051_v10  ;;  %v1056_v15 = vmul.f32 0.5, %v1052_v12  ;;  %v1306_v10 = vld [vmem:[#allocation10 + $0x40] sm:$0xff]  ;;  %v1304_v12 = vld [vmem:[#allocation10 + $0x30] sm:$0xff] }
 0x3f9   :  { %1423 = vtanh.f32 %v1055_v14  ;;  %v1303_v14 = vld [vmem:[#allocation10 + $0x28] sm:$0xff] }
 0x3fa   :  { %1425 = vtanh.f32 %v1056_v15  ;;  %v1302_v15 = vld [vmem:[#allocation10 + $0x20] sm:$0xff] }
 0x3fb   :  { %v1028_v16 = vpop.f32.mrf.mxu2  ;;  %v1048_v17 = vpop.f32.mrf.mxu3 }
 0x3fc   :  { %v1053_v19 = vadd.f32 %v1028_v16, %v2895_v18  ;;  %v1054_v21 = vadd.f32 %v1048_v17, %v2896_v20  ;;  %v1301_v16 = vld [vmem:[#allocation10 + $0x18] sm:$0xff]  ;;  %v1300_v17 = vld [vmem:[#allocation10 + $0x10] sm:$0xff]  ;;  %v1299_v18 = vld [vmem:[#allocation10 + $0x8] sm:$0xff] }
 0x3fe   :  { %v1057_v22 = vmul.f32 0.5, %v1053_v19  ;;  %1427 = vtanh.f32 %v1054_v21  ;;  %v1298_v19 = vld [vmem:[#allocation10] sm:$0xff] }
 0x3ff   :  { %v1424_v23 = vpop.eup %1423 }
 0x400   :  { %v1426_v24 = vpop.eup %1425  ;;  %v1061_v25 = vadd.f32 1.0, %v1424_v23  ;;  %1429 = vtanh.f32 %v1057_v22  ;;  %v2901_v22 = vld [vmem:[#allocation63_spill] sm:$0xff] }
 0x401   :  { %v1062_v27 = vadd.f32 1.0, %v1426_v24  ;;  %v2902_v24 = vld [vmem:[#allocation64_spill] sm:$0xff] }
 0x402   :  { %v1064_v28 = vmul.f32 0.5, %v1061_v25 }
 0x403   :  { %v1065_v29 = vmul.f32 0.5, %v1062_v27 }
 0x404   :  { %v1428_v30 = vpop.eup %1427 }
 0x405   :  { %v1068_v31 = vmul.f32 %v1065_v29, %v2525_v43  ;;  %v1069_v32 = vmul.f32 %v1428_v30, %v1064_v28 }
 0x406   :  { %v1430_v13 = vpop.eup %1429 }
 0x407   :  { %v1070_v62 = vadd.f32 %v1069_v32, %v1068_v31  ;;  %v1063_v33 = vadd.f32 1.0, %v1430_v13  ;;  %v2903_v31 = vld [vmem:[#allocation65_spill] sm:$0xff]  ;;  %v2904_v13 = vld [vmem:[#allocation66_spill] sm:$0xff] }
 0x409   :  { %1431 = vtanh.f32 %v1070_v62  ;;  %v1066_v34 = vmul.f32 0.5, %v1063_v33 }
 0x40f   :  { %v1432_v50 = vpop.eup %1431 }
 0x410   :  { %v1072_v40 = vmul.f32 %v1432_v50, %v1066_v34 }
 0x412   :  { %1074 = vst [vmem:[#allocation11 + $0x28] sm:$0xff] %v1072_v40  ;;  %1096 = vmatmul.f32.vlgmr.msrb.gmra.mxu0 %v1072_v40  ;;  %1116 = vmatmul.f32.vlgmr.msrb.gmra.mxu1 %v1072_v40 }
 0x413   :  { %1136 = vmatmul.f32.vlgmr.msrb.gmra.mxu2 %v1072_v40  ;;  %1156 = vmatmul.f32.vlgmr.msrb.gmra.mxu3 %v1072_v40 }
 0x414   :  { %1318 = vmatpush.msrb.mxu0 %v1313_v37 }
 0x416   :  { %1319 = vmatpush.msrb.mxu0 %v1312_v4 }
 0x418   :  { %1320 = vmatpush.msrb.mxu0 %v1311_v5 }
 0x41a   :  { %1321 = vmatpush.msrb.mxu0 %v1310_v6 }
 0x41c   :  { %1322 = vmatpush.msrb.mxu0 %v1309_v7 }
 0x41e   :  { %1323 = vmatpush.msrb.mxu0 %v1308_v8 }
 0x420   :  { %1324 = vmatpush.msrb.mxu0 %v1307_v9 }
 0x422   :  { %1325 = vmatpush.msrb.mxu0 %v1306_v10 }
 0x424   :  { %1326 = vmatpush.msrb.mxu0 %v1305_v11 }
 0x426   :  { %1327 = vmatpush.msrb.mxu0 %v1304_v12 }
 0x428   :  { %1328 = vmatpush.msrb.mxu0 %v1303_v14 }
 0x42a   :  { %1329 = vmatpush.msrb.mxu0 %v1302_v15 }
 0x42c   :  { %1330 = vmatpush.msrb.mxu0 %v1301_v16 }
 0x42e   :  { %1331 = vmatpush.msrb.mxu0 %v1300_v17 }
 0x430   :  { %1332 = vmatpush.msrb.mxu0 %v1299_v18 }
 0x432   :  { %1333 = vmatpush.msrb.mxu0 %v1298_v19 }
 0x48f   :  { %v1097_v38 = vpop.f32.mrf.mxu0  ;;  %v1117_v41 = vpop.f32.mrf.mxu1 }
 0x490   :  { %v1160_v55 = vadd.f32 %v1097_v38, %v2897_v46  ;;  %v1161_v60 = vadd.f32 %v1117_v41, %v2898_v49 }
 0x492   :  { %v1164_v59 = vmul.f32 0.5, %v1160_v55  ;;  %v1165_v63 = vmul.f32 0.5, %v1161_v60 }
 0x494   :  { %1433 = vtanh.f32 %v1164_v59 }
 0x495   :  { %1435 = vtanh.f32 %v1165_v63 }
 0x496   :  { %v1137_v43 = vpop.f32.mrf.mxu2  ;;  %v1157_v36 = vpop.f32.mrf.mxu3 }
 0x497   :  { %v1162_v42 = vadd.f32 %v1137_v43, %v2899_v35  ;;  %v1163_v0 = vadd.f32 %v1157_v36, %v2900_v48 }
 0x499   :  { %v1166_v52 = vmul.f32 0.5, %v1162_v42  ;;  %1437 = vtanh.f32 %v1163_v0  ;;  %v1372_v42 = vld [vmem:[%s2626_s5] ss:$0 sm:$0xff] }
 0x49a   :  { %v1434_v47 = vpop.eup %1433 }
 0x49b   :  { %v1436_v45 = vpop.eup %1435  ;;  %v1170_v56 = vadd.f32 1.0, %v1434_v47  ;;  %1439 = vtanh.f32 %v1166_v52 }
 0x49c   :  { %v1171_v54 = vadd.f32 1.0, %v1436_v45 }
 0x49d   :  { %v1173_v57 = vmul.f32 0.5, %v1170_v56 }
 0x49e   :  { %v1174_v51 = vmul.f32 0.5, %v1171_v54 }
 0x49f   :  { %v1438_v58 = vpop.eup %1437 }
 0x4a0   :  { %v1177_v44 = vmul.f32 %v1174_v51, %v1070_v62  ;;  %v1178_v26 = vmul.f32 %v1438_v58, %v1173_v57 }
 0x4a1   :  { %v1440_v39 = vpop.eup %1439 }
 0x4a2   :  { %v2601_v61 = vadd.f32 %v1178_v26, %v1177_v44  ;;  %v1172_v53 = vadd.f32 1.0, %v1440_v39 }
 0x4a4   :  { %1441 = vtanh.f32 %v2601_v61  ;;  %v1175_v1 = vmul.f32 0.5, %v1172_v53 }
 0x4aa   :  { %v1442_v2 = vpop.eup %1441 }
 0x4ab   :  { %v1181_v3 = vmul.f32 %v1442_v2, %v1175_v1 }
 0x4ad   :  { %1183 = vst [vmem:[#allocation11 + $0x30] sm:$0xff] %v1181_v3  ;;  %1205 = vmatmul.f32.vlgmr.msra.gmra.mxu0 %v1181_v3  ;;  %1225 = vmatmul.f32.vlgmr.msra.gmra.mxu1 %v1181_v3 }
 0x4ae   :  { %1245 = vmatmul.f32.vlgmr.msra.gmra.mxu2 %v1181_v3  ;;  %1265 = vmatmul.f32.vlgmr.msra.gmra.mxu3 %v1181_v3 }
 0x52a   :  { %v1206_v20 = vpop.f32.mrf.mxu0  ;;  %v1226_v21 = vpop.f32.mrf.mxu1 }
 0x52b   :  { %v1269_v23 = vadd.f32 %v1206_v20, %v2901_v22  ;;  %v1270_v25 = vadd.f32 %v1226_v21, %v2902_v24 }
 0x52d   :  { %v1273_v27 = vmul.f32 0.5, %v1269_v23  ;;  %v1274_v28 = vmul.f32 0.5, %v1270_v25 }
 0x52f   :  { %1443 = vtanh.f32 %v1273_v27 }
 0x530   :  { %1445 = vtanh.f32 %v1274_v28 }
 0x531   :  { %v1246_v29 = vpop.f32.mrf.mxu2  ;;  %v1266_v30 = vpop.f32.mrf.mxu3 }
 0x532   :  { %v1271_v32 = vadd.f32 %v1246_v29, %v2903_v31  ;;  %v1272_v62 = vadd.f32 %v1266_v30, %v2904_v13 }
 0x534   :  { %v1275_v33 = vmul.f32 0.5, %v1271_v32  ;;  %1447 = vtanh.f32 %v1272_v62 }
 0x535   :  { %v1444_v34 = vpop.eup %1443 }
 0x536   :  { %v1446_v50 = vpop.eup %1445  ;;  %v1279_v40 = vadd.f32 1.0, %v1444_v34  ;;  %1449 = vtanh.f32 %v1275_v33 }
 0x537   :  { %v1280_v37 = vadd.f32 1.0, %v1446_v50 }
 0x538   :  { %v1282_v38 = vmul.f32 0.5, %v1279_v40 }
 0x539   :  { %v1283_v41 = vmul.f32 0.5, %v1280_v37 }
 0x53a   :  { %v1448_v46 = vpop.eup %1447 }
 0x53b   :  { %v1286_v55 = vmul.f32 %v1283_v41, %v2601_v61  ;;  %v1287_v49 = vmul.f32 %v1448_v46, %v1282_v38 }
 0x53c   :  { %v1450_v60 = vpop.eup %1449 }
 0x53d   :  { %v1288_v59 = vadd.f32 %v1287_v49, %v1286_v55  ;;  %v1281_v63 = vadd.f32 1.0, %v1450_v60 }
 0x53f   :  { %1451 = vtanh.f32 %v1288_v59  ;;  %v1284_v43 = vmul.f32 0.5, %v1281_v63 }
 0x545   :  { %v1452_v36 = vpop.eup %1451 }
 0x546   :  { %v1290_v35 = vmul.f32 %v1452_v36, %v1284_v43 }
 0x548   :  { %1292 = vst [vmem:[#allocation11 + $0x38] sm:$0xff] %v1290_v35  ;;  %1334 = vmatmul.f32.vlgmr.msrb.gmra.mxu0 %v1290_v35 }
 0x549   :  { %1351 = dma.vmem_to_hbm [thread:$0]  %s1344_s11, 1024, %s1346_s14, [#allocation7], %s1624_s17, %s1624_s17, %s1625_s18  }
 0x5c5   :  { %v1335_v48 = vpop.f32.mrf.mxu0 }
 0x5c6   :  { %v1336_v0 = vadd.f32 %v1372_v42, %v1335_v48 }
 0x5c8   :  { %1338 = vst [vmem:[%s2628_s7] sm:$0xff] %v1336_v0 }
 0x5c9   :  { %1617 = dma.done.wait [#allocation7], 1024  }
 0x5ca   :  { %1618 = vsyncadd [#allocation7], 4294966272 }
 0x5cb   :  { %1360 = vsyncpa [#allocation6], 1 }
 0x5cc   :  { %1361 = vsyncpa [#allocation9], 1 }
 0x5cd   :  { %1362 = vsyncpa [#allocation7], 1 }

// kernel: lstm_model_forward.2
= control target key start
LH: loop header
LB: loop body
LE: loop exit
PB: predicated region body
PF: predicated region fallthrough
CT: control target
= control target key end

     0   :  { %13 = vsyncpa [#allocation6], 0  ;;  %s2615_s0 = inlined_call_operand.vmem [shape: f32[8,8,16], index: 0, kind: input, shape index: {}]   ;;  %s2616_s1 = inlined_call_operand.vmem [shape: f32[16,512], index: 1, kind: input, shape index: {}]   ;;  %s2617_s2 = inlined_call_operand.hbm [shape: f32[128,512], index: 2, kind: input, shape index: {}]   ;;  %s2618_s3 = inlined_call_operand.vmem [shape: f32[1,512], index: 3, kind: input, shape index: {}]   ;;  %s2619_s4 = inlined_call_operand.hbm [shape: f32[128,128], index: 4, kind: input, shape index: {}]   ;;  %s2620_s5 = inlined_call_operand.vmem [shape: f32[1,128], index: 5, kind: input, shape index: {}]   ;;  %s2621_s6 = inlined_call_operand.vmem [shape: f32[8,8,128], index: 6, kind: output, shape index: {0}]   ;;  %s2622_s7 = inlined_call_operand.vmem [shape: f32[8,128], index: 7, kind: output, shape index: {1}]  }
   0x1   :  { %s23_s26 = sshll.u32 %s2617_s2, 4  ;;  %s24_s26 = int_to_ptr.hbm [resolvable:$true] %s23_s26 }
   0x2   :  { %14 = vsyncpa [#allocation8], 0  ;;  %s1551_s27 = smov [#allocation5]   ;;  %s38_s8 = sshll.u32 %s2619_s4, 4  ;;  %s39_s8 = int_to_ptr.hbm [resolvable:$true] %s38_s8 }
   0x3   :  { %s25_s28 = sshll.u32 %s1551_s27, 4  ;;  %s1552_s9 = smov 512   ;;  %s26_s28 = int_to_ptr.vmem [resolvable:$true] %s25_s28 }
   0x4   :  { %s1553_s10 = smov 32   ;;  %s1554_s11 = smov [#allocation7]  }
   0x5   :  { %31 = dma.hbm_to_vmem [thread:$0]  %s24_s26, 8192, %s26_s28, [#allocation6], %s1552_s9, %s1552_s9, %s1553_s10  }
   0x6   :  { %s40_s12 = sshll.u32 %s1554_s11, 4  ;;  %s1555_s13 = smov 128   ;;  %s41_s12 = int_to_ptr.vmem [resolvable:$true] %s40_s12 }
   0x7   :  { %s1556_s14 = smov 8  }
   0x8   :  { %46 = dma.hbm_to_vmem [thread:$0]  %s39_s8, 2048, %s41_s12, [#allocation8], %s1555_s13, %s1555_s13, %s1556_s14  }
   0x9   :  { %1547 = dma.done.wait [#allocation6], 8192  }
   0xa   :  { %1548 = vsyncadd [#allocation6], 4294959104 }
   0xb   :  { %1549 = dma.done.wait [#allocation8], 2048  }
   0xc   :  { %1550 = vsyncadd [#allocation8], 4294965248  ;;  %v75_v0 = vld [vmem:[%s2616_s1 + $0x20] sm:$0xff]  ;;  %vm89_vm0 = vcmask 130048   ;;  %v1616_v3 = vld [vmem:[%s2615_s0 + $0x28] sm:$0xff] }
   0xd   :  { %v71_v1 = vld [vmem:[%s2616_s1] sm:$0xff]  ;;  %128 = vmatpush.msra.mxu0 %v75_v0  ;;  %1341 = vmatpush.msra.mxu1 %v75_v0  ;;  %v1621_v4 = vld [vmem:[%s2615_s0 + $0x30] sm:$0xff]  ;;  %v1626_v5 = vld [vmem:[%s2615_s0 + $0x38] sm:$0xff] }
   0xe   :  { %1342 = vmatpush.msra.mxu2 %v75_v0  ;;  %1343 = vmatpush.msra.mxu3 %v75_v0  ;;  %v63_v2 = vld [vmem:[%s2615_s0] sm:$0xff]  ;;  %v76_v6 = vld [vmem:[%s2616_s1 + $0x28] sm:$0xff]  ;;  %v78_v7 = vld [vmem:[%s2616_s1 + $0x38] sm:$0xff] }
   0xf   :  { %129 = vmatpush.msra.mxu0 %v71_v1  ;;  %1344 = vmatpush.msra.mxu1 %v71_v1  ;;  %v77_v8 = vld [vmem:[%s2616_s1 + $0x30] sm:$0xff]  ;;  %v1640_v9 = vld [vmem:[#allocation5 + $0x1e0] sm:$0xff]  ;;  %v72_v10 = vld [vmem:[%s2616_s1 + $0x8] sm:$0xff] }
  0x10   :  { %1345 = vmatpush.msra.mxu2 %v71_v1  ;;  %1346 = vmatpush.msra.mxu3 %v71_v1  ;;  %v74_v11 = vld [vmem:[%s2616_s1 + $0x18] sm:$0xff]  ;;  %v73_v12 = vld [vmem:[%s2616_s1 + $0x10] sm:$0xff]  ;;  %v1655_v13 = vld [vmem:[#allocation5 + $0x1e8] sm:$0xff] }
  0x11   :  { %1302 = vmatmul.msk.f32.vlgmr.msra.gmra.mxu0 %vm89_vm0, %v63_v2  ;;  %1307 = vmatmul.msk.f32.vlgmr.msra.gmra.mxu1 %vm89_vm0, %v1616_v3  ;;  %v1657_v14 = vld [vmem:[#allocation5 + $0x1f8] sm:$0xff]  ;;  %v1660_v15 = vld [vmem:[#allocation5 + $0x1c0] sm:$0xff]  ;;  %v1662_v16 = vld [vmem:[#allocation5 + $0x1c8] sm:$0xff] }
  0x12   :  { %1308 = vmatmul.msk.f32.vlgmr.msra.gmra.mxu2 %vm89_vm0, %v1621_v4  ;;  %1309 = vmatmul.msk.f32.vlgmr.msra.gmra.mxu3 %vm89_vm0, %v1626_v5  ;;  %v1664_v17 = vld [vmem:[#allocation5 + $0x1f0] sm:$0xff]  ;;  %v64_v18 = vld [vmem:[%s2615_s0 + $0x8] sm:$0xff]  ;;  %v1673_v19 = vld [vmem:[#allocation5 + $0x1d8] sm:$0xff] }
  0x13   :  { %169 = vmatpush.msrb.mxu1 %v76_v6  ;;  %251 = vmatpush.msrb.mxu3 %v78_v7  ;;  %v1675_v20 = vld [vmem:[#allocation5 + $0x1a0] sm:$0xff]  ;;  %v1680_v21 = vld [vmem:[#allocation5 + $0x1a8] sm:$0xff]  ;;  %v1682_v22 = vld [vmem:[#allocation5 + $0x1d0] sm:$0xff] }
  0x14   :  { %210 = vmatpush.msrb.mxu2 %v77_v8  ;;  %380 = vmatpush.msrb.mxu0 %v1640_v9  ;;  %v1686_v23 = vld [vmem:[#allocation5 + $0x180] sm:$0xff]  ;;  %v1688_v24 = vld [vmem:[#allocation5 + $0x1b8] sm:$0xff]  ;;  %v1692_v25 = vld [vmem:[#allocation5 + $0x188] sm:$0xff] }
  0x15   :  { %170 = vmatpush.msrb.mxu1 %v72_v10  ;;  %252 = vmatpush.msrb.mxu3 %v74_v11  ;;  %v1694_v26 = vld [vmem:[#allocation5 + $0x1b0] sm:$0xff]  ;;  %v1697_v27 = vld [vmem:[#allocation5 + $0x160] sm:$0xff]  ;;  %v1700_v28 = vld [vmem:[#allocation5 + $0x198] sm:$0xff] }
  0x16   :  { %211 = vmatpush.msrb.mxu2 %v73_v12  ;;  %381 = vmatpush.msrb.mxu0 %v1660_v15  ;;  %v1704_v29 = vld [vmem:[#allocation5 + $0x168] sm:$0xff]  ;;  %v1706_v30 = vld [vmem:[#allocation5 + $0x190] sm:$0xff]  ;;  %v1715_v32 = vld [vmem:[#allocation5 + $0x140] sm:$0xff] }
  0x17   :  { %400 = vmatpush.msra.mxu1 %v1655_v13  ;;  %440 = vmatpush.msra.mxu3 %v1657_v14  ;;  %v65_v31 = vld [vmem:[%s2615_s0 + $0x10] sm:$0xff]  ;;  %v1718_v33 = vld [vmem:[#allocation5 + $0x178] sm:$0xff]  ;;  %v1723_v34 = vld [vmem:[#allocation5 + $0x148] sm:$0xff] }
  0x18   :  { %420 = vmatpush.msra.mxu2 %v1664_v17  ;;  %382 = vmatpush.msrb.mxu0 %v1675_v20  ;;  %v1725_v35 = vld [vmem:[#allocation5 + $0x170] sm:$0xff]  ;;  %v1729_v36 = vld [vmem:[#allocation5 + $0x120] sm:$0xff]  ;;  %v1731_v37 = vld [vmem:[#allocation5 + $0x158] sm:$0xff] }
  0x19   :  { %401 = vmatpush.msra.mxu1 %v1662_v16  ;;  %1303 = vmatmul.msk.f32.gmra.mxu0 %vm89_vm0, %v64_v18  ;;  %v1735_v38 = vld [vmem:[#allocation5 + $0x128] sm:$0xff]  ;;  %v1737_v39 = vld [vmem:[#allocation5 + $0x150] sm:$0xff]  ;;  %v1739_v40 = vld [vmem:[#allocation5 + $0x100] sm:$0xff] }
  0x1a   :  { %1310 = vmatmul.msk.f32.vlgmr.msrb.gmra.mxu1 %vm89_vm0, %v63_v2  ;;  %1318 = vmatmul.msk.f32.vlgmr.msrb.gmra.mxu2 %vm89_vm0, %v63_v2  ;;  %v1743_v41 = vld [vmem:[#allocation5 + $0x138] sm:$0xff]  ;;  %v1747_v42 = vld [vmem:[#allocation5 + $0x108] sm:$0xff]  ;;  %v1749_v43 = vld [vmem:[#allocation5 + $0x130] sm:$0xff] }
  0x1b   :  { %1326 = vmatmul.msk.f32.vlgmr.msrb.gmra.mxu3 %vm89_vm0, %v63_v2  ;;  %402 = vmatpush.msra.mxu1 %v1680_v21  ;;  %v66_v44 = vld [vmem:[%s2615_s0 + $0x18] sm:$0xff]  ;;  %v1758_v45 = vld [vmem:[#allocation5 + $0xe0] sm:$0xff]  ;;  %v1766_v47 = vld [vmem:[#allocation5 + $0xe8] sm:$0xff] }
  0x1c   :  { %441 = vmatpush.msra.mxu3 %v1673_v19  ;;  %421 = vmatpush.msra.mxu2 %v1682_v22  ;;  %v1761_v46 = vld [vmem:[#allocation5 + $0x118] sm:$0xff]  ;;  %v1768_v48 = vld [vmem:[#allocation5 + $0x110] sm:$0xff]  ;;  %v1772_v49 = vld [vmem:[#allocation5 + $0xc0] sm:$0xff] }
  0x1d   :  { %383 = vmatpush.msrb.mxu0 %v1686_v23  ;;  %403 = vmatpush.msra.mxu1 %v1692_v25  ;;  %v1774_v50 = vld [vmem:[#allocation5 + $0xf8] sm:$0xff]  ;;  %v1778_v51 = vld [vmem:[#allocation5 + $0xc8] sm:$0xff]  ;;  %v1780_v52 = vld [vmem:[#allocation5 + $0xf0] sm:$0xff] }
  0x1e   :  { %442 = vmatpush.msra.mxu3 %v1688_v24  ;;  %422 = vmatpush.msra.mxu2 %v1694_v26  ;;  %v1782_v53 = vld [vmem:[#allocation5 + $0xa0] sm:$0xff]  ;;  %v1786_v54 = vld [vmem:[#allocation5 + $0xd8] sm:$0xff]  ;;  %v1790_v55 = vld [vmem:[#allocation5 + $0xa8] sm:$0xff] }
  0x1f   :  { %384 = vmatpush.msrb.mxu0 %v1697_v27  ;;  %404 = vmatpush.msra.mxu1 %v1704_v29  ;;  %2716 = vst [vmem:[#allocation11_spill] sm:$0xff] %v1782_v53  ;;  %v1792_v56 = vld [vmem:[#allocation5 + $0xd0] sm:$0xff]  ;;  %v1794_v57 = vld [vmem:[#allocation5 + $0x80] sm:$0xff]  ;;  %v1809_v60 = vld [vmem:[#allocation5 + $0xb8] sm:$0xff] }
  0x20   :  { %443 = vmatpush.msra.mxu3 %v1700_v28  ;;  %423 = vmatpush.msra.mxu2 %v1706_v30  ;;  %2717 = vst [vmem:[#allocation12_spill] sm:$0xff] %v1786_v54  ;;  %v67_v58 = vld [vmem:[%s2615_s0 + $0x20] sm:$0xff]  ;;  %v1811_v61 = vld [vmem:[#allocation5 + $0x88] sm:$0xff]  ;;  %v1817_v63 = vld [vmem:[#allocation5 + $0xb0] sm:$0xff] }
  0x21   :  { %1304 = vmatmul.msk.f32.gmra.mxu0 %vm89_vm0, %v65_v31  ;;  %405 = vmatpush.msra.mxu1 %v1723_v34  ;;  %2718 = vst [vmem:[#allocation13_spill] sm:$0xff] %v1790_v55  ;;  %v1803_v59 = vld [vmem:[#allocation5 + $0x60] sm:$0xff]  ;;  %v1821_v0 = vld [vmem:[#allocation5 + $0x98] sm:$0xff]  ;;  %v1823_v1 = vld [vmem:[#allocation5 + $0x68] sm:$0xff] }
  0x22   :  { %1311 = vmatmul.msk.f32.gmra.mxu1 %vm89_vm0, %v64_v18  ;;  %1319 = vmatmul.msk.f32.gmra.mxu2 %vm89_vm0, %v64_v18  ;;  %2719 = vst [vmem:[#allocation14_spill] sm:$0xff] %v1794_v57  ;;  %v1815_v62 = vld [vmem:[#allocation5 + $0x40] sm:$0xff]  ;;  %v1829_v6 = vld [vmem:[#allocation5 + $0x90] sm:$0xff]  ;;  %v1833_v7 = vld [vmem:[#allocation5 + $0x78] sm:$0xff] }
  0x23   :  { %1327 = vmatmul.msk.f32.gmra.mxu3 %vm89_vm0, %v64_v18  ;;  %385 = vmatpush.msrb.mxu0 %v1715_v32  ;;  %2720 = vst [vmem:[#allocation15_spill] sm:$0xff] %v1803_v59  ;;  %v1825_v2 = vld [vmem:[#allocation5 + $0x20] sm:$0xff]  ;;  %v1835_v8 = vld [vmem:[#allocation5 + $0x48] sm:$0xff]  ;;  %v1845_v11 = vld [vmem:[#allocation5 + $0x70] sm:$0xff] }
  0x24   :  { %444 = vmatpush.msra.mxu3 %v1718_v33  ;;  %424 = vmatpush.msra.mxu2 %v1725_v35  ;;  %2721 = vst [vmem:[#allocation16_spill] sm:$0xff] %v1809_v60  ;;  %v1837_v10 = vld [vmem:[#allocation5] sm:$0xff]  ;;  %v1849_v12 = vld [vmem:[#allocation5 + $0x58] sm:$0xff]  ;;  %v1851_v18 = vld [vmem:[#allocation5 + $0x28] sm:$0xff] }
  0x25   :  { %386 = vmatpush.msrb.mxu0 %v1729_v36  ;;  %406 = vmatpush.msra.mxu1 %v1735_v38  ;;  %2722 = vst [vmem:[#allocation17_spill] sm:$0xff] %v1811_v61 }
  0x26   :  { %445 = vmatpush.msra.mxu3 %v1731_v37  ;;  %425 = vmatpush.msra.mxu2 %v1737_v39  ;;  %2723 = vst [vmem:[#allocation18_spill] sm:$0xff] %v1815_v62 }
  0x27   :  { %387 = vmatpush.msrb.mxu0 %v1739_v40  ;;  %407 = vmatpush.msra.mxu1 %v1747_v42  ;;  %2724 = vst [vmem:[#allocation19_spill] sm:$0xff] %v1817_v63 }
  0x28   :  { %446 = vmatpush.msra.mxu3 %v1743_v41  ;;  %426 = vmatpush.msra.mxu2 %v1749_v43  ;;  %2725 = vst [vmem:[#allocation20_spill] sm:$0xff] %v1821_v0 }
  0x29   :  { %1305 = vmatmul.msk.f32.gmra.mxu0 %vm89_vm0, %v66_v44  ;;  %408 = vmatpush.msra.mxu1 %v1766_v47  ;;  %2726 = vst [vmem:[#allocation21_spill] sm:$0xff] %v1823_v1 }
  0x2a   :  { %1312 = vmatmul.msk.f32.gmra.mxu1 %vm89_vm0, %v65_v31  ;;  %1320 = vmatmul.msk.f32.gmra.mxu2 %vm89_vm0, %v65_v31  ;;  %2727 = vst [vmem:[#allocation22_spill] sm:$0xff] %v1825_v2 }
  0x2b   :  { %1328 = vmatmul.msk.f32.gmra.mxu3 %vm89_vm0, %v65_v31  ;;  %388 = vmatpush.msrb.mxu0 %v1758_v45  ;;  %2728 = vst [vmem:[#allocation23_spill] sm:$0xff] %v1829_v6  ;;  %v1557_v31 = vmov 0.0  }
  0x2c   :  { %447 = vmatpush.msra.mxu3 %v1761_v46  ;;  %427 = vmatpush.msra.mxu2 %v1768_v48  ;;  %2729 = vst [vmem:[#allocation24_spill] sm:$0xff] %v1833_v7 }
  0x2d   :  { %389 = vmatpush.msrb.mxu0 %v1772_v49  ;;  %409 = vmatpush.msra.mxu1 %v1778_v51  ;;  %2730 = vst [vmem:[#allocation25_spill] sm:$0xff] %v1835_v8 }
  0x2e   :  { %448 = vmatpush.msra.mxu3 %v1774_v50  ;;  %428 = vmatpush.msra.mxu2 %v1780_v52  ;;  %2731 = vst [vmem:[#allocation26_spill] sm:$0xff] %v1837_v10 }
  0x2f   :  { %390 = vmatpush.msrb.mxu0 %v1782_v53  ;;  %410 = vmatpush.msra.mxu1 %v1790_v55  ;;  %2732 = vst [vmem:[#allocation27_spill] sm:$0xff] %v1845_v11 }
  0x30   :  { %449 = vmatpush.msra.mxu3 %v1786_v54  ;;  %429 = vmatpush.msra.mxu2 %v1792_v56  ;;  %2733 = vst [vmem:[#allocation28_spill] sm:$0xff] %v1849_v12 }
  0x31   :  { %391 = vmatpush.msrb.mxu0 %v1794_v57  ;;  %411 = vmatpush.msra.mxu1 %v1811_v61  ;;  %2734 = vst [vmem:[#allocation29_spill] sm:$0xff] %v1851_v18 }
  0x32   :  { %1313 = vmatmul.msk.f32.gmra.mxu1 %vm89_vm0, %v66_v44  ;;  %1306 = vmatmul.msk.f32.gmra.mxu0 %vm89_vm0, %v67_v58 }
  0x33   :  { %1321 = vmatmul.msk.f32.gmra.mxu2 %vm89_vm0, %v66_v44  ;;  %1329 = vmatmul.msk.f32.gmra.mxu3 %vm89_vm0, %v66_v44  ;;  %v1855_v44 = vld [vmem:[#allocation5 + $0x50] sm:$0xff] }
  0x34   :  { %392 = vmatpush.msrb.mxu0 %v1803_v59  ;;  %450 = vmatpush.msra.mxu3 %v1809_v60  ;;  %2735 = vst [vmem:[#allocation30_spill] sm:$0xff] %v1855_v44 }
  0x35   :  { %430 = vmatpush.msra.mxu2 %v1817_v63  ;;  %412 = vmatpush.msra.mxu1 %v1823_v1 }
  0x36   :  { %393 = vmatpush.msrb.mxu0 %v1815_v62  ;;  %451 = vmatpush.msra.mxu3 %v1821_v0 }
  0x37   :  { %431 = vmatpush.msra.mxu2 %v1829_v6  ;;  %413 = vmatpush.msra.mxu1 %v1835_v8  ;;  %v1865_v8 = vld [vmem:[#allocation5 + $0x30] sm:$0xff] }
  0x38   :  { %394 = vmatpush.msrb.mxu0 %v1825_v2  ;;  %452 = vmatpush.msra.mxu3 %v1833_v7  ;;  %v1859_v2 = vld [vmem:[#allocation5 + $0x38] sm:$0xff]  ;;  %2738 = vst [vmem:[#allocation33_spill] sm:$0xff] %v1865_v8 }
  0x39   :  { %432 = vmatpush.msra.mxu2 %v1845_v11  ;;  %2736 = vst [vmem:[#allocation31_spill] sm:$0xff] %v1859_v2  ;;  %414 = vmatpush.msra.mxu1 %v1851_v18  ;;  %v1868_v7 = vld [vmem:[#allocation5 + $0x18] sm:$0xff] }
  0x3a   :  { %395 = vmatpush.msrb.mxu0 %v1837_v10  ;;  %1314 = vmatmul.msk.f32.gmra.mxu1 %vm89_vm0, %v67_v58  ;;  %v1861_v10 = vld [vmem:[#allocation5 + $0x8] sm:$0xff]  ;;  %2739 = vst [vmem:[#allocation34_spill] sm:$0xff] %v1868_v7 }
  0x3b   :  { %1322 = vmatmul.msk.f32.gmra.mxu2 %vm89_vm0, %v67_v58  ;;  %396 = vmatmul.f32.vlgmr.msrb.gmra.mxu0 %v1557_v31  ;;  %2737 = vst [vmem:[#allocation32_spill] sm:$0xff] %v1861_v10 }
  0x3c   :  { %1330 = vmatmul.msk.f32.gmra.mxu3 %vm89_vm0, %v67_v58  ;;  %433 = vmatpush.msra.mxu2 %v1855_v44  ;;  %v1873_v58 = vld [vmem:[#allocation5 + $0x10] sm:$0xff] }
  0x3d   :  { %453 = vmatpush.msra.mxu3 %v1849_v12  ;;  %488 = vmatpush.msra.mxu0 %v1640_v9  ;;  %2740 = vst [vmem:[#allocation35_spill] sm:$0xff] %v1873_v58 }
  0x3e   :  { %415 = vmatpush.msra.mxu1 %v1861_v10  ;;  %434 = vmatpush.msra.mxu2 %v1865_v8 }
  0x3f   :  { %454 = vmatpush.msra.mxu3 %v1859_v2  ;;  %489 = vmatpush.msra.mxu0 %v1660_v15 }
  0x40   :  { %508 = vmatpush.msrb.mxu1 %v1655_v13  ;;  %435 = vmatpush.msra.mxu2 %v1873_v58 }
  0x41   :  { %455 = vmatpush.msra.mxu3 %v1868_v7  ;;  %490 = vmatpush.msra.mxu0 %v1675_v20 }
  0x42   :  { %1315 = vmatmul.msk.f32.gmra.mxu1 %vm89_vm0, %v1616_v3  ;;  %528 = vmatpush.msrb.mxu2 %v1664_v17 }
  0x43   :  { %1323 = vmatmul.msk.f32.gmra.mxu2 %vm89_vm0, %v1616_v3  ;;  %548 = vmatpush.msrb.mxu3 %v1657_v14 }
  0x44   :  { %1331 = vmatmul.msk.f32.gmra.mxu3 %vm89_vm0, %v1616_v3  ;;  %509 = vmatpush.msrb.mxu1 %v1662_v16  ;;  %v2741_v3 = vld [vmem:[#allocation24_spill] sm:$0xff] }
  0x45   :  { %549 = vmatpush.msrb.mxu3 %v1673_v19  ;;  %529 = vmatpush.msrb.mxu2 %v1682_v22 }
  0x46   :  { %510 = vmatpush.msrb.mxu1 %v1680_v21  ;;  %491 = vmatpush.msra.mxu0 %v1686_v23 }
  0x47   :  { %550 = vmatpush.msrb.mxu3 %v1688_v24  ;;  %530 = vmatpush.msrb.mxu2 %v1694_v26 }
  0x48   :  { %511 = vmatpush.msrb.mxu1 %v1692_v25  ;;  %492 = vmatpush.msra.mxu0 %v1697_v27 }
  0x49   :  { %551 = vmatpush.msrb.mxu3 %v1700_v28  ;;  %531 = vmatpush.msrb.mxu2 %v1706_v30 }
  0x4a   :  { %1316 = vmatmul.msk.f32.gmra.mxu1 %vm89_vm0, %v1621_v4  ;;  %493 = vmatpush.msra.mxu0 %v1715_v32 }
  0x4b   :  { %1324 = vmatmul.msk.f32.gmra.mxu2 %vm89_vm0, %v1621_v4  ;;  %512 = vmatpush.msrb.mxu1 %v1704_v29 }
  0x4c   :  { %1332 = vmatmul.msk.f32.gmra.mxu3 %vm89_vm0, %v1621_v4  ;;  %532 = vmatpush.msrb.mxu2 %v1725_v35  ;;  %v2742_v4 = vld [vmem:[#allocation25_spill] sm:$0xff] }
  0x4d   :  { %552 = vmatpush.msrb.mxu3 %v1718_v33  ;;  %513 = vmatpush.msrb.mxu1 %v1723_v34 }
  0x4e   :  { %533 = vmatpush.msrb.mxu2 %v1737_v39  ;;  %494 = vmatpush.msra.mxu0 %v1729_v36 }
  0x4f   :  { %553 = vmatpush.msrb.mxu3 %v1731_v37  ;;  %514 = vmatpush.msrb.mxu1 %v1735_v38 }
  0x50   :  { %534 = vmatpush.msrb.mxu2 %v1749_v43  ;;  %495 = vmatpush.msra.mxu0 %v1739_v40 }
  0x51   :  { %554 = vmatpush.msrb.mxu3 %v1743_v41  ;;  %515 = vmatpush.msrb.mxu1 %v1747_v42 }
  0x52   :  { %1317 = vmatmul.msk.f32.gmra.mxu1 %vm89_vm0, %v1626_v5  ;;  %535 = vmatpush.msrb.mxu2 %v1768_v48 }
  0x53   :  { %1325 = vmatmul.msk.f32.gmra.mxu2 %vm89_vm0, %v1626_v5  ;;  %555 = vmatpush.msrb.mxu3 %v1761_v46 }
  0x54   :  { %1333 = vmatmul.msk.f32.gmra.mxu3 %vm89_vm0, %v1626_v5  ;;  %496 = vmatpush.msra.mxu0 %v1758_v45  ;;  %v2743_v5 = vld [vmem:[#allocation22_spill] sm:$0xff] }
  0x55   :  { %516 = vmatpush.msrb.mxu1 %v1766_v47  ;;  %536 = vmatpush.msrb.mxu2 %v1780_v52 }
  0x56   :  { %556 = vmatpush.msrb.mxu3 %v1774_v50  ;;  %497 = vmatpush.msra.mxu0 %v1772_v49 }
  0x57   :  { %517 = vmatpush.msrb.mxu1 %v1778_v51  ;;  %537 = vmatpush.msrb.mxu2 %v1792_v56 }
  0x58   :  { %557 = vmatpush.msrb.mxu3 %v1786_v54  ;;  %498 = vmatpush.msra.mxu0 %v1782_v53 }
  0x59   :  { %538 = vmatpush.msrb.mxu2 %v1817_v63  ;;  %518 = vmatpush.msrb.mxu1 %v1790_v55 }
  0x5a   :  { %416 = vmatmul.f32.vlgmr.msra.gmra.mxu1 %v1557_v31  ;;  %499 = vmatpush.msra.mxu0 %v1794_v57 }
  0x5b   :  { %436 = vmatmul.f32.vlgmr.msra.gmra.mxu2 %v1557_v31  ;;  %558 = vmatpush.msrb.mxu3 %v1809_v60 }
  0x5c   :  { %456 = vmatmul.f32.vlgmr.msra.gmra.mxu3 %v1557_v31  ;;  %519 = vmatpush.msrb.mxu1 %v1811_v61  ;;  %v2744_v31 = vld [vmem:[#allocation26_spill] sm:$0xff] }
  0x5d   :  { %539 = vmatpush.msrb.mxu2 %v1829_v6  ;;  %500 = vmatpush.msra.mxu0 %v1803_v59 }
  0x5e   :  { %559 = vmatpush.msrb.mxu3 %v1821_v0  ;;  %520 = vmatpush.msrb.mxu1 %v1823_v1 }
  0x5f   :  { %540 = vmatpush.msrb.mxu2 %v1845_v11  ;;  %501 = vmatpush.msra.mxu0 %v1815_v62 }
  0x60   :  { %560 = vmatpush.msrb.mxu3 %v2741_v3  ;;  %521 = vmatpush.msrb.mxu1 %v2742_v4 }
  0x61   :  { %541 = vmatpush.msrb.mxu2 %v1855_v44  ;;  %502 = vmatpush.msra.mxu0 %v2743_v5 }
  0x62   :  { %561 = vmatpush.msrb.mxu3 %v1849_v12  ;;  %522 = vmatpush.msrb.mxu1 %v1851_v18 }
  0x63   :  { %542 = vmatpush.msrb.mxu2 %v1865_v8  ;;  %503 = vmatpush.msra.mxu0 %v2744_v31 }
  0x64   :  { %562 = vmatpush.msrb.mxu3 %v1859_v2  ;;  %523 = vmatpush.msrb.mxu1 %v1861_v10 }
  0x65   :  { %543 = vmatpush.msrb.mxu2 %v1873_v58  ;;  %597 = vmatpush.msrb.mxu0 %v1640_v9 }
  0x66   :  { %563 = vmatpush.msrb.mxu3 %v1868_v7  ;;  %617 = vmatpush.msra.mxu1 %v1655_v13 }
  0x67   :  { %637 = vmatpush.msra.mxu2 %v1664_v17  ;;  %598 = vmatpush.msrb.mxu0 %v1660_v15 }
  0x68   :  { %657 = vmatpush.msra.mxu3 %v1657_v14  ;;  %618 = vmatpush.msra.mxu1 %v1662_v16 }
  0x69   :  { %638 = vmatpush.msra.mxu2 %v1682_v22  ;;  %599 = vmatpush.msrb.mxu0 %v1675_v20 }
  0x6a   :  { %658 = vmatpush.msra.mxu3 %v1673_v19  ;;  %619 = vmatpush.msra.mxu1 %v1680_v21 }
  0x6b   :  { %639 = vmatpush.msra.mxu2 %v1694_v26  ;;  %600 = vmatpush.msrb.mxu0 %v1686_v23 }
  0x6c   :  { %659 = vmatpush.msra.mxu3 %v1688_v24  ;;  %620 = vmatpush.msra.mxu1 %v1692_v25 }
  0x6d   :  { %640 = vmatpush.msra.mxu2 %v1706_v30  ;;  %601 = vmatpush.msrb.mxu0 %v1697_v27 }
  0x6e   :  { %660 = vmatpush.msra.mxu3 %v1700_v28  ;;  %621 = vmatpush.msra.mxu1 %v1704_v29 }
  0x6f   :  { %641 = vmatpush.msra.mxu2 %v1725_v35  ;;  %602 = vmatpush.msrb.mxu0 %v1715_v32 }
  0x70   :  { %661 = vmatpush.msra.mxu3 %v1718_v33  ;;  %622 = vmatpush.msra.mxu1 %v1723_v34 }
  0x71   :  { %642 = vmatpush.msra.mxu2 %v1737_v39  ;;  %603 = vmatpush.msrb.mxu0 %v1729_v36 }
  0x72   :  { %662 = vmatpush.msra.mxu3 %v1731_v37  ;;  %623 = vmatpush.msra.mxu1 %v1735_v38 }
  0x73   :  { %643 = vmatpush.msra.mxu2 %v1749_v43  ;;  %604 = vmatpush.msrb.mxu0 %v1739_v40 }
  0x74   :  { %663 = vmatpush.msra.mxu3 %v1743_v41  ;;  %624 = vmatpush.msra.mxu1 %v1747_v42 }
  0x75   :  { %644 = vmatpush.msra.mxu2 %v1768_v48  ;;  %605 = vmatpush.msrb.mxu0 %v1758_v45 }
  0x76   :  { %664 = vmatpush.msra.mxu3 %v1761_v46  ;;  %625 = vmatpush.msra.mxu1 %v1766_v47 }
  0x77   :  { %645 = vmatpush.msra.mxu2 %v1780_v52  ;;  %606 = vmatpush.msrb.mxu0 %v1772_v49 }
  0x78   :  { %665 = vmatpush.msra.mxu3 %v1774_v50  ;;  %626 = vmatpush.msra.mxu1 %v1778_v51 }
  0x79   :  { %646 = vmatpush.msra.mxu2 %v1792_v56  ;;  %607 = vmatpush.msrb.mxu0 %v1782_v53 }
  0x7a   :  { %666 = vmatpush.msra.mxu3 %v1786_v54  ;;  %627 = vmatpush.msra.mxu1 %v1790_v55 }
  0x7b   :  { %647 = vmatpush.msra.mxu2 %v1817_v63  ;;  %608 = vmatpush.msrb.mxu0 %v1794_v57 }
  0x7c   :  { %667 = vmatpush.msra.mxu3 %v1809_v60  ;;  %628 = vmatpush.msra.mxu1 %v1811_v61 }
  0x7d   :  { %648 = vmatpush.msra.mxu2 %v1829_v6  ;;  %609 = vmatpush.msrb.mxu0 %v1803_v59 }
  0x7e   :  { %668 = vmatpush.msra.mxu3 %v1821_v0  ;;  %629 = vmatpush.msra.mxu1 %v1823_v1 }
  0x7f   :  { %649 = vmatpush.msra.mxu2 %v1845_v11  ;;  %610 = vmatpush.msrb.mxu0 %v1815_v62 }
  0x80   :  { %669 = vmatpush.msra.mxu3 %v2741_v3  ;;  %630 = vmatpush.msra.mxu1 %v2742_v4 }
  0x81   :  { %650 = vmatpush.msra.mxu2 %v1855_v44  ;;  %611 = vmatpush.msrb.mxu0 %v2743_v5 }
  0x82   :  { %670 = vmatpush.msra.mxu3 %v1849_v12  ;;  %631 = vmatpush.msra.mxu1 %v1851_v18  ;;  %v79_v12 = vld [vmem:[%s2618_s3] sm:$0xf] }
  0x83   :  { %651 = vmatpush.msra.mxu2 %v1865_v8  ;;  %612 = vmatpush.msrb.mxu0 %v2744_v31  ;;  %v81_v44 = vperm.slane %v79_v12, 0 }
  0x84   :  { %671 = vmatpush.msra.mxu3 %v1859_v2  ;;  %632 = vmatpush.msra.mxu1 %v1861_v10 }
  0x85   :  { %652 = vmatpush.msra.mxu2 %v1873_v58 }
  0x86   :  { %672 = vmatpush.msra.mxu3 %v1868_v7  ;;  %v82_v7 = vperm.slane %v79_v12, 1 }
  0x8e   :  { %v131_v5 = vpop.f32.mrf.mxu0  ;;  %v146_v4 = vpop.f32.mrf.mxu1 }
  0x8f   :  { %v2029_v18 = vadd.f32 %v146_v4, %v81_v44  ;;  %v83_v4 = vperm.slane %v79_v12, 2  ;;  %v132_v53 = vadd.f32 %v131_v5, %v81_v44 }
  0x91   :  { %2745 = vst [vmem:[#allocation36_spill] sm:$0xff] %v2029_v18  ;;  %v84_v18 = vperm.slane %v79_v12, 3 }
  0x95   :  { %v149_v8 = vpop.f32.mrf.mxu2  ;;  %v152_v62 = vpop.f32.mrf.mxu3 }
  0x96   :  { %v2031_v2 = vadd.f32 %v149_v8, %v81_v44  ;;  %v2033_v31 = vadd.f32 %v152_v62, %v81_v44  ;;  %v134_v10 = vpop.f32.mrf.mxu0 }
  0x97   :  { %v172_v3 = vpop.f32.mrf.mxu1  ;;  %v2035_v58 = vadd.f32 %v134_v10, %v81_v44 }
  0x98   :  { %2746 = vst [vmem:[#allocation37_spill] sm:$0xff] %v2031_v2 }
  0x99   :  { %2747 = vst [vmem:[#allocation38_spill] sm:$0xff] %v2033_v31 }
  0x9a   :  { %2748 = vst [vmem:[#allocation39_spill] sm:$0xff] %v2035_v58 }
  0x9d   :  { %v213_v11 = vpop.f32.mrf.mxu2 }
  0x9e   :  { %v254_v1 = vpop.f32.mrf.mxu3  ;;  %v137_v59 = vpop.f32.mrf.mxu0 }
  0x9f   :  { %v175_v0 = vpop.f32.mrf.mxu1  ;;  %v2037_v6 = vadd.f32 %v137_v59, %v81_v44 }
  0xa0   :  { %v2039_v61 = vadd.f32 %v175_v0, %v82_v7 }
  0xa1   :  { %2749 = vst [vmem:[#allocation40_spill] sm:$0xff] %v2037_v6 }
  0xa2   :  { %2750 = vst [vmem:[#allocation41_spill] sm:$0xff] %v2039_v61 }
  0xa5   :  { %v216_v57 = vpop.f32.mrf.mxu2 }
  0xa6   :  { %v257_v8 = vpop.f32.mrf.mxu3  ;;  %v2041_v2 = vadd.f32 %v216_v57, %v83_v4  ;;  %v140_v31 = vpop.f32.mrf.mxu0 }
  0xa7   :  { %v2043_v62 = vadd.f32 %v257_v8, %v84_v18  ;;  %v178_v10 = vpop.f32.mrf.mxu1  ;;  %v2045_v58 = vadd.f32 %v140_v31, %v81_v44 }
  0xa8   :  { %2751 = vst [vmem:[#allocation42_spill] sm:$0xff] %v2041_v2  ;;  %v2047_v60 = vadd.f32 %v178_v10, %v82_v7 }
  0xa9   :  { %2752 = vst [vmem:[#allocation43_spill] sm:$0xff] %v2043_v62 }
  0xaa   :  { %2753 = vst [vmem:[#allocation44_spill] sm:$0xff] %v2045_v58 }
  0xab   :  { %2754 = vst [vmem:[#allocation45_spill] sm:$0xff] %v2047_v60 }
  0xad   :  { %v219_v63 = vpop.f32.mrf.mxu2 }
  0xae   :  { %v260_v55 = vpop.f32.mrf.mxu3  ;;  %v2049_v59 = vadd.f32 %v219_v63, %v83_v4 }
  0xaf   :  { %v2051_v0 = vadd.f32 %v260_v55, %v84_v18  ;;  %v181_v6 = vpop.f32.mrf.mxu1  ;;  %v143_v12 = vpop.f32.mrf.mxu0 }
  0xb0   :  { %2755 = vst [vmem:[#allocation46_spill] sm:$0xff] %v2049_v59  ;;  %v2053_v61 = vadd.f32 %v181_v6, %v82_v7  ;;  %v2055_v57 = vadd.f32 %v143_v12, %v81_v44  ;;  %v255_v44 = vadd.f32 %v254_v1, %v84_v18 }
  0xb1   :  { %2756 = vst [vmem:[#allocation47_spill] sm:$0xff] %v2051_v0 }
  0xb2   :  { %2757 = vst [vmem:[#allocation48_spill] sm:$0xff] %v2053_v61 }
  0xb3   :  { %2758 = vst [vmem:[#allocation49_spill] sm:$0xff] %v2055_v57 }
  0xb6   :  { %v222_v8 = vpop.f32.mrf.mxu2  ;;  %v263_v2 = vpop.f32.mrf.mxu3 }
  0xb7   :  { %v2057_v62 = vadd.f32 %v222_v8, %v83_v4  ;;  %v184_v31 = vpop.f32.mrf.mxu1  ;;  %v2059_v58 = vadd.f32 %v263_v2, %v84_v18 }
  0xb8   :  { %v2061_v10 = vadd.f32 %v184_v31, %v82_v7  ;;  %v397_v31 = vpop.f32.mrf.mxu0 }
  0xb9   :  { %2759 = vst [vmem:[#allocation50_spill] sm:$0xff] %v2057_v62 }
  0xba   :  { %2760 = vst [vmem:[#allocation51_spill] sm:$0xff] %v2059_v58 }
  0xbb   :  { %2761 = vst [vmem:[#allocation52_spill] sm:$0xff] %v2061_v10 }
  0xbe   :  { %v225_v60 = vpop.f32.mrf.mxu2 }
  0xbf   :  { %v2063_v63 = vadd.f32 %v225_v60, %v83_v4  ;;  %v266_v55 = vpop.f32.mrf.mxu3  ;;  %v187_v0 = vpop.f32.mrf.mxu1 }
  0xc0   :  { %v2065_v59 = vadd.f32 %v266_v55, %v84_v18  ;;  %v2067_v6 = vadd.f32 %v187_v0, %v82_v7 }
  0xc1   :  { %2762 = vst [vmem:[#allocation53_spill] sm:$0xff] %v2063_v63 }
  0xc2   :  { %2763 = vst [vmem:[#allocation54_spill] sm:$0xff] %v2065_v59 }
  0xc3   :  { %2764 = vst [vmem:[#allocation55_spill] sm:$0xff] %v2067_v6  ;;  %v460_v6 = vadd.f32 %v397_v31, %v132_v53 }
  0xc6   :  { %v228_v12 = vpop.f32.mrf.mxu2 }
  0xc7   :  { %v2069_v57 = vadd.f32 %v228_v12, %v83_v4  ;;  %v269_v8 = vpop.f32.mrf.mxu3  ;;  %v190_v62 = vpop.f32.mrf.mxu1  ;;  %v173_v12 = vadd.f32 %v172_v3, %v82_v7 }
  0xc8   :  { %v2071_v61 = vadd.f32 %v269_v8, %v84_v18  ;;  %v2073_v2 = vadd.f32 %v190_v62, %v82_v7 }
  0xc9   :  { %2765 = vst [vmem:[#allocation56_spill] sm:$0xff] %v2069_v57  ;;  %v464_v57 = vmul.f32 0.5, %v460_v6 }
  0xca   :  { %2766 = vst [vmem:[#allocation57_spill] sm:$0xff] %v2071_v61 }
  0xcb   :  { %2767 = vst [vmem:[#allocation58_spill] sm:$0xff] %v2073_v2  ;;  %1355 = vtanh.f32 %v464_v57 }
  0xce   :  { %v231_v10 = vpop.f32.mrf.mxu2 }
  0xcf   :  { %v2075_v58 = vadd.f32 %v231_v10, %v83_v4  ;;  %v272_v60 = vpop.f32.mrf.mxu3  ;;  %v193_v63 = vpop.f32.mrf.mxu1 }
  0xd0   :  { %v2077_v55 = vadd.f32 %v272_v60, %v84_v18  ;;  %v2079_v0 = vadd.f32 %v193_v63, %v82_v7 }
  0xd1   :  { %2768 = vst [vmem:[#allocation59_spill] sm:$0xff] %v2075_v58  ;;  %v214_v58 = vadd.f32 %v213_v11, %v83_v4 }
  0xd2   :  { %2769 = vst [vmem:[#allocation60_spill] sm:$0xff] %v2077_v55  ;;  %v2796_v55 = vld [vmem:[#allocation35_spill] sm:$0xff] }
  0xd3   :  { %2770 = vst [vmem:[#allocation61_spill] sm:$0xff] %v2079_v0  ;;  %v1356_v0 = vpop.eup %1355 }
  0xd6   :  { %v234_v59 = vpop.f32.mrf.mxu2 }
  0xd7   :  { %v2081_v54 = vadd.f32 %v234_v59, %v83_v4  ;;  %v275_v8 = vpop.f32.mrf.mxu3  ;;  %v417_v62 = vpop.f32.mrf.mxu1  ;;  %v470_v59 = vadd.f32 1.0, %v1356_v0  ;;  %v2773_v4 = vld [vmem:[#allocation12_spill] sm:$0xff]  ;;  %v2775_v0 = vld [vmem:[#allocation13_spill] sm:$0xff] }
  0xd8   :  { %v2083_v2 = vadd.f32 %v275_v8, %v84_v18  ;;  %v461_v61 = vadd.f32 %v417_v62, %v173_v12 }
  0xd9   :  { %2771 = vst [vmem:[#allocation62_spill] sm:$0xff] %v2081_v54  ;;  %v473_v8 = vmul.f32 0.5, %v470_v59  ;;  %v2784_v59 = vld [vmem:[#allocation27_spill] sm:$0xff]  ;;  %v2795_v54 = vld [vmem:[#allocation32_spill] sm:$0xff] }
  0xda   :  { %2772 = vst [vmem:[#allocation63_spill] sm:$0xff] %v2083_v2  ;;  %v465_v10 = vmul.f32 0.5, %v461_v61 }
  0xdc   :  { %1357 = vtanh.f32 %v465_v10  ;;  %v2776_v10 = vld [vmem:[#allocation19_spill] sm:$0xff] }
  0xde   :  { %v437_v5 = vpop.f32.mrf.mxu2 }
  0xdf   :  { %v462_v60 = vadd.f32 %v437_v5, %v214_v58  ;;  %v457_v63 = vpop.f32.mrf.mxu3  ;;  %v2778_v5 = vld [vmem:[#allocation14_spill] sm:$0xff] }
  0xe0   :  { %v463_v53 = vadd.f32 %v457_v63, %v255_v44  ;;  %v2777_v44 = vld [vmem:[#allocation16_spill] sm:$0xff]  ;;  %v2780_v63 = vld [vmem:[#allocation23_spill] sm:$0xff] }
  0xe1   :  { %v466_v7 = vmul.f32 0.5, %v462_v60  ;;  %v2779_v60 = vld [vmem:[#allocation17_spill] sm:$0xff] }
  0xe2   :  { %v1358_v3 = vpop.eup %1357  ;;  %1359 = vtanh.f32 %v463_v53  ;;  %v2781_v53 = vld [vmem:[#allocation20_spill] sm:$0xff] }
  0xe3   :  { %v471_v6 = vadd.f32 1.0, %v1358_v3  ;;  %1361 = vtanh.f32 %v466_v7  ;;  %v2782_v7 = vld [vmem:[#allocation15_spill] sm:$0xff]  ;;  %v2783_v3 = vld [vmem:[#allocation21_spill] sm:$0xff] }
  0xe5   :  { %v474_v31 = vmul.f32 0.5, %v471_v6  ;;  %v2785_v6 = vld [vmem:[#allocation24_spill] sm:$0xff] }
  0xe7   :  { %v477_v2 = vmul.f32 0.0, %v474_v31  ;;  %v2786_v31 = vld [vmem:[#allocation18_spill] sm:$0xff] }
  0xe8   :  { %v1360_v12 = vpop.eup %1359 }
  0xe9   :  { %v478_v57 = vmul.f32 %v1360_v12, %v473_v8  ;;  %v1362_v61 = vpop.eup %1361  ;;  %v2787_v8 = vld [vmem:[#allocation25_spill] sm:$0xff]  ;;  %v2788_v12 = vld [vmem:[#allocation30_spill] sm:$0xff] }
  0xea   :  { %v472_v1 = vadd.f32 1.0, %v1362_v61  ;;  %v2790_v61 = vld [vmem:[#allocation22_spill] sm:$0xff] }
  0xeb   :  { %v2085_v62 = vadd.f32 %v478_v57, %v477_v2  ;;  %v2774_v2 = vld [vmem:[#allocation11_spill] sm:$0xff]  ;;  %v2789_v57 = vld [vmem:[#allocation28_spill] sm:$0xff] }
  0xec   :  { %v475_v11 = vmul.f32 0.5, %v472_v1  ;;  %v2791_v1 = vld [vmem:[#allocation29_spill] sm:$0xff] }
  0xed   :  { %1363 = vtanh.f32 %v2085_v62 }
  0xf3   :  { %v1364_v18 = vpop.eup %1363 }
  0xf4   :  { %v481_v58 = vmul.f32 %v1364_v18, %v475_v11  ;;  %v2792_v11 = vld [vmem:[#allocation33_spill] sm:$0xff]  ;;  %v2793_v18 = vld [vmem:[#allocation31_spill] sm:$0xff] }
  0xf6   :  { %482 = vst [vmem:[%s2621_s6] sm:$0xff] %v481_v58  ;;  %504 = vmatmul.f32.vlgmr.msra.gmra.mxu0 %v481_v58  ;;  %524 = vmatmul.f32.vlgmr.msrb.gmra.mxu1 %v481_v58 }
  0xf7   :  { %544 = vmatmul.f32.vlgmr.msrb.gmra.mxu2 %v481_v58  ;;  %564 = vmatmul.f32.vlgmr.msrb.gmra.mxu3 %v481_v58  ;;  %v2794_v58 = vld [vmem:[#allocation26_spill] sm:$0xff] }
  0xf8   :  { %706 = vmatpush.msra.mxu0 %v1640_v9  ;;  %726 = vmatpush.msrb.mxu1 %v1655_v13 }
  0xf9   :  { %746 = vmatpush.msrb.mxu2 %v1664_v17  ;;  %766 = vmatpush.msrb.mxu3 %v1657_v14 }
  0xfa   :  { %707 = vmatpush.msra.mxu0 %v1660_v15  ;;  %727 = vmatpush.msrb.mxu1 %v1662_v16 }
  0xfb   :  { %747 = vmatpush.msrb.mxu2 %v1682_v22  ;;  %767 = vmatpush.msrb.mxu3 %v1673_v19 }
  0xfc   :  { %708 = vmatpush.msra.mxu0 %v1675_v20  ;;  %728 = vmatpush.msrb.mxu1 %v1680_v21 }
  0xfd   :  { %748 = vmatpush.msrb.mxu2 %v1694_v26  ;;  %768 = vmatpush.msrb.mxu3 %v1688_v24 }
  0xfe   :  { %709 = vmatpush.msra.mxu0 %v1686_v23  ;;  %729 = vmatpush.msrb.mxu1 %v1692_v25 }
  0xff   :  { %749 = vmatpush.msrb.mxu2 %v1706_v30  ;;  %769 = vmatpush.msrb.mxu3 %v1700_v28 }
 0x100   :  { %710 = vmatpush.msra.mxu0 %v1697_v27  ;;  %730 = vmatpush.msrb.mxu1 %v1704_v29 }
 0x101   :  { %750 = vmatpush.msrb.mxu2 %v1725_v35  ;;  %770 = vmatpush.msrb.mxu3 %v1718_v33 }
 0x102   :  { %711 = vmatpush.msra.mxu0 %v1715_v32  ;;  %731 = vmatpush.msrb.mxu1 %v1723_v34 }
 0x103   :  { %751 = vmatpush.msrb.mxu2 %v1737_v39  ;;  %771 = vmatpush.msrb.mxu3 %v1731_v37 }
 0x104   :  { %712 = vmatpush.msra.mxu0 %v1729_v36  ;;  %732 = vmatpush.msrb.mxu1 %v1735_v38 }
 0x105   :  { %752 = vmatpush.msrb.mxu2 %v1749_v43  ;;  %772 = vmatpush.msrb.mxu3 %v1743_v41 }
 0x106   :  { %713 = vmatpush.msra.mxu0 %v1739_v40  ;;  %733 = vmatpush.msrb.mxu1 %v1747_v42 }
 0x107   :  { %753 = vmatpush.msrb.mxu2 %v1768_v48  ;;  %773 = vmatpush.msrb.mxu3 %v1761_v46 }
 0x108   :  { %714 = vmatpush.msra.mxu0 %v1758_v45  ;;  %734 = vmatpush.msrb.mxu1 %v1766_v47 }
 0x109   :  { %754 = vmatpush.msrb.mxu2 %v1780_v52  ;;  %774 = vmatpush.msrb.mxu3 %v1774_v50 }
 0x10a   :  { %715 = vmatpush.msra.mxu0 %v1772_v49  ;;  %735 = vmatpush.msrb.mxu1 %v1778_v51 }
 0x10b   :  { %755 = vmatpush.msrb.mxu2 %v1792_v56  ;;  %775 = vmatpush.msrb.mxu3 %v2773_v4 }
 0x10c   :  { %716 = vmatpush.msra.mxu0 %v2774_v2  ;;  %736 = vmatpush.msrb.mxu1 %v2775_v0 }
 0x10d   :  { %756 = vmatpush.msrb.mxu2 %v2776_v10  ;;  %776 = vmatpush.msrb.mxu3 %v2777_v44 }
 0x10e   :  { %717 = vmatpush.msra.mxu0 %v2778_v5  ;;  %737 = vmatpush.msrb.mxu1 %v2779_v60 }
 0x10f   :  { %757 = vmatpush.msrb.mxu2 %v2780_v63  ;;  %777 = vmatpush.msrb.mxu3 %v2781_v53  ;;  %v2801_v53 = vld [vmem:[#allocation43_spill] sm:$0xff] }
 0x110   :  { %718 = vmatpush.msra.mxu0 %v2782_v7  ;;  %738 = vmatpush.msrb.mxu1 %v2783_v3  ;;  %v2800_v7 = vld [vmem:[#allocation42_spill] sm:$0xff] }
 0x111   :  { %758 = vmatpush.msrb.mxu2 %v2784_v59  ;;  %778 = vmatpush.msrb.mxu3 %v2785_v6  ;;  %v2798_v6 = vld [vmem:[#allocation39_spill] sm:$0xff]  ;;  %v2799_v59 = vld [vmem:[#allocation41_spill] sm:$0xff] }
 0x112   :  { %719 = vmatpush.msra.mxu0 %v2786_v31  ;;  %739 = vmatpush.msrb.mxu1 %v2787_v8  ;;  %v2797_v31 = vld [vmem:[#allocation34_spill] sm:$0xff] }
 0x113   :  { %759 = vmatpush.msrb.mxu2 %v2788_v12  ;;  %779 = vmatpush.msrb.mxu3 %v2789_v57 }
 0x114   :  { %720 = vmatpush.msra.mxu0 %v2790_v61  ;;  %740 = vmatpush.msrb.mxu1 %v2791_v1 }
 0x115   :  { %760 = vmatpush.msrb.mxu2 %v2792_v11  ;;  %780 = vmatpush.msrb.mxu3 %v2793_v18 }
 0x116   :  { %721 = vmatpush.msra.mxu0 %v2794_v58  ;;  %741 = vmatpush.msrb.mxu1 %v2795_v54 }
 0x117   :  { %761 = vmatpush.msrb.mxu2 %v2796_v55  ;;  %781 = vmatpush.msrb.mxu3 %v2797_v31 }
 0x173   :  { %v505_v8 = vpop.f32.mrf.mxu0  ;;  %v525_v12 = vpop.f32.mrf.mxu1 }
 0x174   :  { %v568_v57 = vadd.f32 %v505_v8, %v2798_v6  ;;  %v569_v61 = vadd.f32 %v525_v12, %v2799_v59 }
 0x176   :  { %v572_v3 = vmul.f32 0.5, %v568_v57  ;;  %v573_v1 = vmul.f32 0.5, %v569_v61 }
 0x178   :  { %1365 = vtanh.f32 %v572_v3 }
 0x179   :  { %1367 = vtanh.f32 %v573_v1 }
 0x17a   :  { %v545_v11 = vpop.f32.mrf.mxu2  ;;  %v565_v18 = vpop.f32.mrf.mxu3 }
 0x17b   :  { %v570_v58 = vadd.f32 %v545_v11, %v2800_v7  ;;  %v571_v54 = vadd.f32 %v565_v18, %v2801_v53  ;;  %v2241_v11 = vld [vmem:[#allocation5 + $0x1e0] sm:$0xff]  ;;  %v2244_v18 = vld [vmem:[#allocation5 + $0x1e8] sm:$0xff] }
 0x17d   :  { %v574_v63 = vmul.f32 0.5, %v570_v58  ;;  %1369 = vtanh.f32 %v571_v54  ;;  %v2247_v58 = vld [vmem:[#allocation5 + $0x1f0] sm:$0xff] }
 0x17e   :  { %v1366_v55 = vpop.eup %1365 }
 0x17f   :  { %v1368_v31 = vpop.eup %1367  ;;  %v578_v60 = vadd.f32 1.0, %v1366_v55  ;;  %1371 = vtanh.f32 %v574_v63 }
 0x180   :  { %v579_v5 = vadd.f32 1.0, %v1368_v31 }
 0x181   :  { %v581_v6 = vmul.f32 0.5, %v578_v60 }
 0x182   :  { %v582_v8 = vmul.f32 0.5, %v579_v5 }
 0x183   :  { %v1370_v59 = vpop.eup %1369 }
 0x184   :  { %v585_v12 = vmul.f32 %v582_v8, %v2085_v62  ;;  %v586_v3 = vmul.f32 %v1370_v59, %v581_v6  ;;  %v2250_v6 = vld [vmem:[#allocation5 + $0x1f8] sm:$0xff]  ;;  %v2253_v8 = vld [vmem:[#allocation5 + $0x1c0] sm:$0xff]  ;;  %v2256_v59 = vld [vmem:[#allocation5 + $0x1c8] sm:$0xff] }
 0x185   :  { %v1372_v57 = vpop.eup %1371 }
 0x186   :  { %v2160_v61 = vadd.f32 %v586_v3, %v585_v12  ;;  %v580_v7 = vadd.f32 1.0, %v1372_v57  ;;  %v2259_v12 = vld [vmem:[#allocation5 + $0x1d0] sm:$0xff]  ;;  %v2262_v3 = vld [vmem:[#allocation5 + $0x1d8] sm:$0xff]  ;;  %v2265_v57 = vld [vmem:[#allocation5 + $0x1a0] sm:$0xff] }
 0x188   :  { %1373 = vtanh.f32 %v2160_v61  ;;  %v583_v53 = vmul.f32 0.5, %v580_v7  ;;  %v2271_v7 = vld [vmem:[#allocation5 + $0x1b0] sm:$0xff] }
 0x18e   :  { %v1374_v1 = vpop.eup %1373 }
 0x18f   :  { %v589_v54 = vmul.f32 %v1374_v1, %v583_v53  ;;  %v2274_v53 = vld [vmem:[#allocation5 + $0x1b8] sm:$0xff]  ;;  %v2277_v1 = vld [vmem:[#allocation5 + $0x180] sm:$0xff] }
 0x191   :  { %1334 = vst [vmem:[%s2621_s6 + $0x8] sm:$0xff] %v589_v54  ;;  %613 = vmatmul.f32.vlgmr.msrb.gmra.mxu0 %v589_v54  ;;  %633 = vmatmul.f32.vlgmr.msra.gmra.mxu1 %v589_v54 }
 0x192   :  { %653 = vmatmul.f32.vlgmr.msra.gmra.mxu2 %v589_v54  ;;  %673 = vmatmul.f32.vlgmr.msra.gmra.mxu3 %v589_v54  ;;  %v2280_v54 = vld [vmem:[#allocation5 + $0x188] sm:$0xff] }
 0x193   :  { %815 = vmatpush.msrb.mxu0 %v1640_v9  ;;  %835 = vmatpush.msra.mxu1 %v1655_v13  ;;  %v2802_v9 = vld [vmem:[#allocation14_spill] sm:$0xff]  ;;  %v2803_v13 = vld [vmem:[#allocation17_spill] sm:$0xff] }
 0x194   :  { %855 = vmatpush.msra.mxu2 %v1664_v17  ;;  %875 = vmatpush.msra.mxu3 %v1657_v14  ;;  %v2804_v14 = vld [vmem:[#allocation23_spill] sm:$0xff]  ;;  %v2807_v17 = vld [vmem:[#allocation21_spill] sm:$0xff] }
 0x195   :  { %816 = vmatpush.msrb.mxu0 %v1660_v15  ;;  %836 = vmatpush.msra.mxu1 %v1662_v16  ;;  %v2805_v15 = vld [vmem:[#allocation20_spill] sm:$0xff]  ;;  %v2806_v16 = vld [vmem:[#allocation15_spill] sm:$0xff] }
 0x196   :  { %856 = vmatpush.msra.mxu2 %v1682_v22  ;;  %876 = vmatpush.msra.mxu3 %v1673_v19  ;;  %v2808_v19 = vld [vmem:[#allocation27_spill] sm:$0xff]  ;;  %v2811_v22 = vld [vmem:[#allocation25_spill] sm:$0xff] }
 0x197   :  { %817 = vmatpush.msrb.mxu0 %v1675_v20  ;;  %837 = vmatpush.msra.mxu1 %v1680_v21  ;;  %v2809_v20 = vld [vmem:[#allocation24_spill] sm:$0xff]  ;;  %v2810_v21 = vld [vmem:[#allocation18_spill] sm:$0xff] }
 0x198   :  { %857 = vmatpush.msra.mxu2 %v1694_v26  ;;  %877 = vmatpush.msra.mxu3 %v1688_v24  ;;  %v2813_v24 = vld [vmem:[#allocation28_spill] sm:$0xff]  ;;  %v2815_v26 = vld [vmem:[#allocation29_spill] sm:$0xff] }
 0x199   :  { %818 = vmatpush.msrb.mxu0 %v1686_v23  ;;  %838 = vmatpush.msra.mxu1 %v1692_v25  ;;  %v2812_v23 = vld [vmem:[#allocation30_spill] sm:$0xff] }
 0x19a   :  { %858 = vmatpush.msra.mxu2 %v1706_v30  ;;  %878 = vmatpush.msra.mxu3 %v1700_v28  ;;  %v2814_v25 = vld [vmem:[#allocation22_spill] sm:$0xff]  ;;  %v2817_v28 = vld [vmem:[#allocation31_spill] sm:$0xff]  ;;  %v2819_v30 = vld [vmem:[#allocation32_spill] sm:$0xff] }
 0x19b   :  { %819 = vmatpush.msrb.mxu0 %v1697_v27  ;;  %839 = vmatpush.msra.mxu1 %v1704_v29  ;;  %v2816_v27 = vld [vmem:[#allocation33_spill] sm:$0xff]  ;;  %v2818_v29 = vld [vmem:[#allocation26_spill] sm:$0xff] }
 0x19c   :  { %859 = vmatpush.msra.mxu2 %v1725_v35  ;;  %879 = vmatpush.msra.mxu3 %v1718_v33  ;;  %v2821_v33 = vld [vmem:[#allocation34_spill] sm:$0xff] }
 0x19d   :  { %820 = vmatpush.msrb.mxu0 %v1715_v32  ;;  %840 = vmatpush.msra.mxu1 %v1723_v34  ;;  %v2820_v32 = vld [vmem:[#allocation35_spill] sm:$0xff] }
 0x19e   :  { %860 = vmatpush.msra.mxu2 %v1737_v39  ;;  %880 = vmatpush.msra.mxu3 %v1731_v37 }
 0x19f   :  { %821 = vmatpush.msrb.mxu0 %v1729_v36  ;;  %841 = vmatpush.msra.mxu1 %v1735_v38  ;;  %v2822_v36 = vld [vmem:[#allocation40_spill] sm:$0xff]  ;;  %v2823_v38 = vld [vmem:[#allocation45_spill] sm:$0xff] }
 0x1a0   :  { %861 = vmatpush.msra.mxu2 %v1749_v43  ;;  %881 = vmatpush.msra.mxu3 %v1743_v41 }
 0x1a1   :  { %822 = vmatpush.msrb.mxu0 %v1739_v40  ;;  %842 = vmatpush.msra.mxu1 %v1747_v42 }
 0x1a2   :  { %862 = vmatpush.msra.mxu2 %v1768_v48  ;;  %882 = vmatpush.msra.mxu3 %v1761_v46 }
 0x1a3   :  { %823 = vmatpush.msrb.mxu0 %v1758_v45  ;;  %843 = vmatpush.msra.mxu1 %v1766_v47  ;;  %v2824_v45 = vld [vmem:[#allocation46_spill] sm:$0xff]  ;;  %v2825_v47 = vld [vmem:[#allocation47_spill] sm:$0xff] }
 0x1a4   :  { %863 = vmatpush.msra.mxu2 %v1780_v52  ;;  %883 = vmatpush.msra.mxu3 %v1774_v50 }
 0x1a5   :  { %824 = vmatpush.msrb.mxu0 %v1772_v49  ;;  %844 = vmatpush.msra.mxu1 %v1778_v51 }
 0x1a6   :  { %864 = vmatpush.msra.mxu2 %v1792_v56  ;;  %884 = vmatpush.msra.mxu3 %v2773_v4 }
 0x1a7   :  { %825 = vmatpush.msrb.mxu0 %v2774_v2  ;;  %845 = vmatpush.msra.mxu1 %v2775_v0 }
 0x1a8   :  { %865 = vmatpush.msra.mxu2 %v2776_v10  ;;  %885 = vmatpush.msra.mxu3 %v2777_v44 }
 0x1a9   :  { %826 = vmatpush.msrb.mxu0 %v2802_v9  ;;  %846 = vmatpush.msra.mxu1 %v2803_v13  ;;  %v2283_v9 = vld [vmem:[#allocation5 + $0x190] sm:$0xff]  ;;  %v2286_v13 = vld [vmem:[#allocation5 + $0x198] sm:$0xff] }
 0x1aa   :  { %866 = vmatpush.msra.mxu2 %v2804_v14  ;;  %886 = vmatpush.msra.mxu3 %v2805_v15  ;;  %v2289_v14 = vld [vmem:[#allocation5 + $0x160] sm:$0xff]  ;;  %v2292_v15 = vld [vmem:[#allocation5 + $0x168] sm:$0xff] }
 0x1ab   :  { %827 = vmatpush.msrb.mxu0 %v2806_v16  ;;  %847 = vmatpush.msra.mxu1 %v2807_v17  ;;  %v2295_v16 = vld [vmem:[#allocation5 + $0x170] sm:$0xff]  ;;  %v2298_v17 = vld [vmem:[#allocation5 + $0x178] sm:$0xff] }
 0x1ac   :  { %867 = vmatpush.msra.mxu2 %v2808_v19  ;;  %887 = vmatpush.msra.mxu3 %v2809_v20  ;;  %v2301_v19 = vld [vmem:[#allocation5 + $0x140] sm:$0xff]  ;;  %v2304_v20 = vld [vmem:[#allocation5 + $0x148] sm:$0xff] }
 0x1ad   :  { %828 = vmatpush.msrb.mxu0 %v2810_v21  ;;  %848 = vmatpush.msra.mxu1 %v2811_v22  ;;  %v2307_v21 = vld [vmem:[#allocation5 + $0x150] sm:$0xff]  ;;  %v2310_v22 = vld [vmem:[#allocation5 + $0x158] sm:$0xff] }
 0x1ae   :  { %868 = vmatpush.msra.mxu2 %v2812_v23  ;;  %888 = vmatpush.msra.mxu3 %v2813_v24  ;;  %v2313_v23 = vld [vmem:[#allocation5 + $0x120] sm:$0xff]  ;;  %v2316_v24 = vld [vmem:[#allocation5 + $0x128] sm:$0xff] }
 0x1af   :  { %829 = vmatpush.msrb.mxu0 %v2814_v25  ;;  %849 = vmatpush.msra.mxu1 %v2815_v26  ;;  %v2319_v25 = vld [vmem:[#allocation5 + $0x130] sm:$0xff]  ;;  %v2322_v26 = vld [vmem:[#allocation5 + $0x138] sm:$0xff] }
 0x1b0   :  { %869 = vmatpush.msra.mxu2 %v2816_v27  ;;  %889 = vmatpush.msra.mxu3 %v2817_v28  ;;  %v2325_v27 = vld [vmem:[#allocation5 + $0x100] sm:$0xff]  ;;  %v2328_v28 = vld [vmem:[#allocation5 + $0x108] sm:$0xff] }
 0x1b1   :  { %830 = vmatpush.msrb.mxu0 %v2818_v29  ;;  %850 = vmatpush.msra.mxu1 %v2819_v30  ;;  %v2331_v29 = vld [vmem:[#allocation5 + $0x110] sm:$0xff]  ;;  %v2334_v30 = vld [vmem:[#allocation5 + $0x118] sm:$0xff] }
 0x1b2   :  { %870 = vmatpush.msra.mxu2 %v2820_v32  ;;  %890 = vmatpush.msra.mxu3 %v2821_v33  ;;  %v2337_v33 = vld [vmem:[#allocation5 + $0xe0] sm:$0xff] }
 0x20e   :  { %v614_v34 = vpop.f32.mrf.mxu0  ;;  %v634_v35 = vpop.f32.mrf.mxu1 }
 0x20f   :  { %v677_v37 = vadd.f32 %v614_v34, %v2822_v36  ;;  %v678_v39 = vadd.f32 %v634_v35, %v2823_v38  ;;  %v2340_v34 = vld [vmem:[#allocation5 + $0xe8] sm:$0xff]  ;;  %v2343_v35 = vld [vmem:[#allocation5 + $0xf0] sm:$0xff]  ;;  %v2346_v36 = vld [vmem:[#allocation5 + $0xf8] sm:$0xff] }
 0x210   :  { %v2352_v38 = vld [vmem:[#allocation5 + $0xc8] sm:$0xff] }
 0x211   :  { %v681_v40 = vmul.f32 0.5, %v677_v37  ;;  %v682_v41 = vmul.f32 0.5, %v678_v39  ;;  %v2349_v37 = vld [vmem:[#allocation5 + $0xc0] sm:$0xff]  ;;  %v2355_v39 = vld [vmem:[#allocation5 + $0xd0] sm:$0xff] }
 0x213   :  { %1375 = vtanh.f32 %v681_v40  ;;  %v2358_v40 = vld [vmem:[#allocation5 + $0xd8] sm:$0xff] }
 0x214   :  { %1377 = vtanh.f32 %v682_v41  ;;  %v2361_v41 = vld [vmem:[#allocation5 + $0xa0] sm:$0xff] }
 0x215   :  { %v654_v42 = vpop.f32.mrf.mxu2  ;;  %v674_v43 = vpop.f32.mrf.mxu3 }
 0x216   :  { %v679_v46 = vadd.f32 %v654_v42, %v2824_v45  ;;  %v680_v48 = vadd.f32 %v674_v43, %v2825_v47  ;;  %v2364_v42 = vld [vmem:[#allocation5 + $0xa8] sm:$0xff]  ;;  %v2367_v43 = vld [vmem:[#allocation5 + $0xb0] sm:$0xff]  ;;  %v2370_v45 = vld [vmem:[#allocation5 + $0xb8] sm:$0xff] }
 0x217   :  { %v2376_v47 = vld [vmem:[#allocation5 + $0x88] sm:$0xff] }
 0x218   :  { %v683_v49 = vmul.f32 0.5, %v679_v46  ;;  %1379 = vtanh.f32 %v680_v48  ;;  %v2373_v46 = vld [vmem:[#allocation5 + $0x80] sm:$0xff]  ;;  %2827 = vst [vmem:[#allocation11_spill] sm:$0xff] %v2376_v47  ;;  %v2379_v48 = vld [vmem:[#allocation5 + $0x90] sm:$0xff] }
 0x219   :  { %v1376_v50 = vpop.eup %1375  ;;  %2826 = vst [vmem:[#allocation12_spill] sm:$0xff] %v2373_v46 }
 0x21a   :  { %v1378_v51 = vpop.eup %1377  ;;  %v687_v52 = vadd.f32 1.0, %v1376_v50  ;;  %1381 = vtanh.f32 %v683_v49  ;;  %2828 = vst [vmem:[#allocation13_spill] sm:$0xff] %v2379_v48  ;;  %v2382_v49 = vld [vmem:[#allocation5 + $0x98] sm:$0xff]  ;;  %v2385_v50 = vld [vmem:[#allocation5 + $0x60] sm:$0xff] }
 0x21b   :  { %v688_v56 = vadd.f32 1.0, %v1378_v51  ;;  %2829 = vst [vmem:[#allocation19_spill] sm:$0xff] %v2382_v49  ;;  %v2388_v51 = vld [vmem:[#allocation5 + $0x68] sm:$0xff] }
 0x21c   :  { %v690_v55 = vmul.f32 0.5, %v687_v52  ;;  %2830 = vst [vmem:[#allocation16_spill] sm:$0xff] %v2385_v50  ;;  %v2391_v52 = vld [vmem:[#allocation5 + $0x70] sm:$0xff] }
 0x21d   :  { %v691_v62 = vmul.f32 0.5, %v688_v56  ;;  %2831 = vst [vmem:[#allocation39_spill] sm:$0xff] %v2388_v51  ;;  %v2394_v56 = vld [vmem:[#allocation5 + $0x78] sm:$0xff] }
 0x21e   :  { %v1380_v4 = vpop.eup %1379  ;;  %2832 = vst [vmem:[#allocation41_spill] sm:$0xff] %v2391_v52 }
 0x21f   :  { %v694_v2 = vmul.f32 %v691_v62, %v2160_v61  ;;  %v695_v0 = vmul.f32 %v1380_v4, %v690_v55  ;;  %v2268_v61 = vld [vmem:[#allocation5 + $0x1a8] sm:$0xff]  ;;  %2833 = vst [vmem:[#allocation42_spill] sm:$0xff] %v2394_v56  ;;  %v2397_v55 = vld [vmem:[#allocation5 + $0x40] sm:$0xff]  ;;  %v2403_v4 = vld [vmem:[#allocation5 + $0x50] sm:$0xff] }
 0x220   :  { %v1382_v10 = vpop.eup %1381  ;;  %2834 = vst [vmem:[#allocation43_spill] sm:$0xff] %v2397_v55  ;;  %v2400_v62 = vld [vmem:[#allocation5 + $0x48] sm:$0xff] }
 0x221   :  { %v2235_v44 = vadd.f32 %v695_v0, %v694_v2  ;;  %v689_v5 = vadd.f32 1.0, %v1382_v10  ;;  %2835 = vst [vmem:[#allocation14_spill] sm:$0xff] %v2400_v62  ;;  %v2406_v2 = vld [vmem:[#allocation5 + $0x58] sm:$0xff]  ;;  %v2409_v0 = vld [vmem:[#allocation5 + $0x20] sm:$0xff]  ;;  %v2412_v10 = vld [vmem:[#allocation5 + $0x28] sm:$0xff] }
 0x222   :  { %2836 = vst [vmem:[#allocation17_spill] sm:$0xff] %v2403_v4 }
 0x223   :  { %1383 = vtanh.f32 %v2235_v44  ;;  %v692_v60 = vmul.f32 0.5, %v689_v5  ;;  %2837 = vst [vmem:[#allocation23_spill] sm:$0xff] %v2406_v2  ;;  %v2415_v5 = vld [vmem:[#allocation5 + $0x30] sm:$0xff] }
 0x224   :  { %2838 = vst [vmem:[#allocation20_spill] sm:$0xff] %v2409_v0 }
 0x225   :  { %2839 = vst [vmem:[#allocation15_spill] sm:$0xff] %v2412_v10 }
 0x226   :  { %2840 = vst [vmem:[#allocation21_spill] sm:$0xff] %v2415_v5 }
 0x229   :  { %v1384_v63 = vpop.eup %1383 }
 0x22a   :  { %v698_v31 = vmul.f32 %v1384_v63, %v692_v60  ;;  %v2418_v60 = vld [vmem:[#allocation5 + $0x38] sm:$0xff]  ;;  %v2421_v63 = vld [vmem:[#allocation5] sm:$0xff] }
 0x22b   :  { %2841 = vst [vmem:[#allocation27_spill] sm:$0xff] %v2418_v60 }
 0x22c   :  { %1335 = vst [vmem:[%s2621_s6 + $0x10] sm:$0xff] %v698_v31  ;;  %722 = vmatmul.f32.vlgmr.msra.gmra.mxu0 %v698_v31  ;;  %742 = vmatmul.f32.vlgmr.msrb.gmra.mxu1 %v698_v31 }
 0x22d   :  { %762 = vmatmul.f32.vlgmr.msrb.gmra.mxu2 %v698_v31  ;;  %782 = vmatmul.f32.vlgmr.msrb.gmra.mxu3 %v698_v31  ;;  %2842 = vst [vmem:[#allocation24_spill] sm:$0xff] %v2421_v63  ;;  %v2424_v31 = vld [vmem:[#allocation5 + $0x8] sm:$0xff] }
 0x22e   :  { %924 = vmatpush.msra.mxu0 %v2241_v11  ;;  %944 = vmatpush.msrb.mxu1 %v2244_v18  ;;  %2843 = vst [vmem:[#allocation18_spill] sm:$0xff] %v2424_v31 }
 0x22f   :  { %964 = vmatpush.msrb.mxu2 %v2247_v58  ;;  %984 = vmatpush.msrb.mxu3 %v2250_v6 }
 0x230   :  { %925 = vmatpush.msra.mxu0 %v2253_v8  ;;  %945 = vmatpush.msrb.mxu1 %v2256_v59 }
 0x231   :  { %965 = vmatpush.msrb.mxu2 %v2259_v12  ;;  %985 = vmatpush.msrb.mxu3 %v2262_v3 }
 0x232   :  { %926 = vmatpush.msra.mxu0 %v2265_v57  ;;  %946 = vmatpush.msrb.mxu1 %v2268_v61 }
 0x233   :  { %966 = vmatpush.msrb.mxu2 %v2271_v7  ;;  %986 = vmatpush.msrb.mxu3 %v2274_v53 }
 0x234   :  { %927 = vmatpush.msra.mxu0 %v2277_v1  ;;  %947 = vmatpush.msrb.mxu1 %v2280_v54 }
 0x235   :  { %967 = vmatpush.msrb.mxu2 %v2283_v9  ;;  %987 = vmatpush.msrb.mxu3 %v2286_v13 }
 0x236   :  { %928 = vmatpush.msra.mxu0 %v2289_v14  ;;  %948 = vmatpush.msrb.mxu1 %v2292_v15 }
 0x237   :  { %968 = vmatpush.msrb.mxu2 %v2295_v16  ;;  %988 = vmatpush.msrb.mxu3 %v2298_v17 }
 0x238   :  { %929 = vmatpush.msra.mxu0 %v2301_v19  ;;  %949 = vmatpush.msrb.mxu1 %v2304_v20 }
 0x239   :  { %969 = vmatpush.msrb.mxu2 %v2307_v21  ;;  %989 = vmatpush.msrb.mxu3 %v2310_v22 }
 0x23a   :  { %930 = vmatpush.msra.mxu0 %v2313_v23  ;;  %950 = vmatpush.msrb.mxu1 %v2316_v24 }
 0x23b   :  { %970 = vmatpush.msrb.mxu2 %v2319_v25  ;;  %990 = vmatpush.msrb.mxu3 %v2322_v26 }
 0x23c   :  { %931 = vmatpush.msra.mxu0 %v2325_v27  ;;  %951 = vmatpush.msrb.mxu1 %v2328_v28 }
 0x23d   :  { %971 = vmatpush.msrb.mxu2 %v2331_v29  ;;  %991 = vmatpush.msrb.mxu3 %v2334_v30 }
 0x23e   :  { %932 = vmatpush.msra.mxu0 %v2337_v33  ;;  %952 = vmatpush.msrb.mxu1 %v2340_v34 }
 0x23f   :  { %972 = vmatpush.msrb.mxu2 %v2343_v35  ;;  %992 = vmatpush.msrb.mxu3 %v2346_v36 }
 0x240   :  { %933 = vmatpush.msra.mxu0 %v2349_v37  ;;  %953 = vmatpush.msrb.mxu1 %v2352_v38 }
 0x241   :  { %973 = vmatpush.msrb.mxu2 %v2355_v39  ;;  %993 = vmatpush.msrb.mxu3 %v2358_v40 }
 0x242   :  { %934 = vmatpush.msra.mxu0 %v2361_v41  ;;  %954 = vmatpush.msrb.mxu1 %v2364_v42 }
 0x243   :  { %974 = vmatpush.msrb.mxu2 %v2367_v43  ;;  %994 = vmatpush.msrb.mxu3 %v2370_v45 }
 0x244   :  { %935 = vmatpush.msra.mxu0 %v2373_v46  ;;  %955 = vmatpush.msrb.mxu1 %v2376_v47 }
 0x245   :  { %975 = vmatpush.msrb.mxu2 %v2379_v48  ;;  %995 = vmatpush.msrb.mxu3 %v2382_v49 }
 0x246   :  { %936 = vmatpush.msra.mxu0 %v2385_v50  ;;  %956 = vmatpush.msrb.mxu1 %v2388_v51  ;;  %v2847_v51 = vld [vmem:[#allocation50_spill] sm:$0xff]  ;;  %v2848_v50 = vld [vmem:[#allocation51_spill] sm:$0xff] }
 0x247   :  { %976 = vmatpush.msrb.mxu2 %v2391_v52  ;;  %996 = vmatpush.msrb.mxu3 %v2394_v56 }
 0x248   :  { %937 = vmatpush.msra.mxu0 %v2397_v55  ;;  %957 = vmatpush.msrb.mxu1 %v2400_v62  ;;  %v2846_v62 = vld [vmem:[#allocation48_spill] sm:$0xff] }
 0x249   :  { %977 = vmatpush.msrb.mxu2 %v2403_v4  ;;  %997 = vmatpush.msrb.mxu3 %v2406_v2  ;;  %v2845_v2 = vld [vmem:[#allocation44_spill] sm:$0xff] }
 0x24a   :  { %938 = vmatpush.msra.mxu0 %v2409_v0  ;;  %958 = vmatpush.msrb.mxu1 %v2412_v10  ;;  %v2428_v0 = vld [vmem:[#allocation5 + $0x18] sm:$0xff] }
 0x24b   :  { %978 = vmatpush.msrb.mxu2 %v2415_v5  ;;  %998 = vmatpush.msrb.mxu3 %v2418_v60  ;;  %2844 = vst [vmem:[#allocation25_spill] sm:$0xff] %v2428_v0 }
 0x24c   :  { %939 = vmatpush.msra.mxu0 %v2421_v63  ;;  %959 = vmatpush.msrb.mxu1 %v2424_v31 }
 0x24d   :  { %979 = vmatpush.msrb.mxu2 %v2820_v32  ;;  %999 = vmatpush.msrb.mxu3 %v2428_v0 }
 0x2a9   :  { %v723_v10 = vpop.f32.mrf.mxu0  ;;  %v743_v5 = vpop.f32.mrf.mxu1 }
 0x2aa   :  { %v786_v4 = vadd.f32 %v723_v10, %v2845_v2  ;;  %v787_v60 = vadd.f32 %v743_v5, %v2846_v62 }
 0x2ac   :  { %v790_v55 = vmul.f32 0.5, %v786_v4  ;;  %v791_v56 = vmul.f32 0.5, %v787_v60 }
 0x2ae   :  { %1385 = vtanh.f32 %v790_v55 }
 0x2af   :  { %1387 = vtanh.f32 %v791_v56 }
 0x2b0   :  { %v763_v63 = vpop.f32.mrf.mxu2  ;;  %v783_v52 = vpop.f32.mrf.mxu3 }
 0x2b1   :  { %v788_v31 = vadd.f32 %v763_v63, %v2847_v51  ;;  %v789_v32 = vadd.f32 %v783_v52, %v2848_v50  ;;  %v2855_v63 = vld [vmem:[#allocation41_spill] sm:$0xff] }
 0x2b3   :  { %v792_v49 = vmul.f32 0.5, %v788_v31  ;;  %1389 = vtanh.f32 %v789_v32  ;;  %v2856_v31 = vld [vmem:[#allocation42_spill] sm:$0xff]  ;;  %v2857_v32 = vld [vmem:[#allocation43_spill] sm:$0xff] }
 0x2b4   :  { %v1386_v48 = vpop.eup %1385 }
 0x2b5   :  { %v1388_v0 = vpop.eup %1387  ;;  %v796_v47 = vadd.f32 1.0, %v1386_v48  ;;  %1391 = vtanh.f32 %v792_v49  ;;  %v2852_v48 = vld [vmem:[#allocation19_spill] sm:$0xff]  ;;  %v2853_v49 = vld [vmem:[#allocation16_spill] sm:$0xff] }
 0x2b6   :  { %v797_v46 = vadd.f32 1.0, %v1388_v0  ;;  %v2854_v0 = vld [vmem:[#allocation39_spill] sm:$0xff] }
 0x2b7   :  { %v799_v2 = vmul.f32 0.5, %v796_v47  ;;  %v2851_v47 = vld [vmem:[#allocation13_spill] sm:$0xff] }
 0x2b8   :  { %v800_v10 = vmul.f32 0.5, %v797_v46  ;;  %v2850_v46 = vld [vmem:[#allocation11_spill] sm:$0xff] }
 0x2b9   :  { %v1390_v62 = vpop.eup %1389 }
 0x2ba   :  { %v803_v4 = vmul.f32 %v800_v10, %v2235_v44  ;;  %v804_v55 = vmul.f32 %v1390_v62, %v799_v2  ;;  %v2849_v44 = vld [vmem:[#allocation12_spill] sm:$0xff]  ;;  %v2858_v2 = vld [vmem:[#allocation14_spill] sm:$0xff]  ;;  %v2859_v10 = vld [vmem:[#allocation17_spill] sm:$0xff] }
 0x2bb   :  { %v1392_v56 = vpop.eup %1391  ;;  %v2860_v62 = vld [vmem:[#allocation23_spill] sm:$0xff] }
 0x2bc   :  { %v2436_v5 = vadd.f32 %v804_v55, %v803_v4  ;;  %v798_v51 = vadd.f32 1.0, %v1392_v56  ;;  %v2861_v4 = vld [vmem:[#allocation20_spill] sm:$0xff]  ;;  %v2862_v55 = vld [vmem:[#allocation15_spill] sm:$0xff]  ;;  %v2863_v56 = vld [vmem:[#allocation21_spill] sm:$0xff] }
 0x2be   :  { %1393 = vtanh.f32 %v2436_v5  ;;  %v801_v50 = vmul.f32 0.5, %v798_v51  ;;  %v2864_v51 = vld [vmem:[#allocation27_spill] sm:$0xff] }
 0x2c4   :  { %v1394_v52 = vpop.eup %1393 }
 0x2c5   :  { %v807_v60 = vmul.f32 %v1394_v52, %v801_v50  ;;  %v2865_v50 = vld [vmem:[#allocation24_spill] sm:$0xff]  ;;  %v2866_v52 = vld [vmem:[#allocation18_spill] sm:$0xff] }
 0x2c7   :  { %1336 = vst [vmem:[%s2621_s6 + $0x18] sm:$0xff] %v807_v60  ;;  %831 = vmatmul.f32.vlgmr.msrb.gmra.mxu0 %v807_v60  ;;  %851 = vmatmul.f32.vlgmr.msra.gmra.mxu1 %v807_v60 }
 0x2c8   :  { %871 = vmatmul.f32.vlgmr.msra.gmra.mxu2 %v807_v60  ;;  %891 = vmatmul.f32.vlgmr.msra.gmra.mxu3 %v807_v60  ;;  %v2504_v60 = vld [vmem:[#allocation5 + $0x10] sm:$0xff] }
 0x2c9   :  { %1033 = vmatpush.msrb.mxu0 %v2241_v11  ;;  %1053 = vmatpush.msra.mxu1 %v2244_v18  ;;  %2867 = vst [vmem:[#allocation30_spill] sm:$0xff] %v2504_v60 }
 0x2ca   :  { %1073 = vmatpush.msra.mxu2 %v2247_v58  ;;  %1093 = vmatpush.msra.mxu3 %v2250_v6 }
 0x2cb   :  { %1034 = vmatpush.msrb.mxu0 %v2253_v8  ;;  %1054 = vmatpush.msra.mxu1 %v2256_v59 }
 0x2cc   :  { %1074 = vmatpush.msra.mxu2 %v2259_v12  ;;  %1094 = vmatpush.msra.mxu3 %v2262_v3 }
 0x2cd   :  { %1035 = vmatpush.msrb.mxu0 %v2265_v57  ;;  %1055 = vmatpush.msra.mxu1 %v2268_v61 }
 0x2ce   :  { %1075 = vmatpush.msra.mxu2 %v2271_v7  ;;  %1095 = vmatpush.msra.mxu3 %v2274_v53 }
 0x2cf   :  { %1036 = vmatpush.msrb.mxu0 %v2277_v1  ;;  %1056 = vmatpush.msra.mxu1 %v2280_v54 }
 0x2d0   :  { %1076 = vmatpush.msra.mxu2 %v2283_v9  ;;  %1096 = vmatpush.msra.mxu3 %v2286_v13 }
 0x2d1   :  { %1037 = vmatpush.msrb.mxu0 %v2289_v14  ;;  %1057 = vmatpush.msra.mxu1 %v2292_v15 }
 0x2d2   :  { %1077 = vmatpush.msra.mxu2 %v2295_v16  ;;  %1097 = vmatpush.msra.mxu3 %v2298_v17 }
 0x2d3   :  { %1038 = vmatpush.msrb.mxu0 %v2301_v19  ;;  %1058 = vmatpush.msra.mxu1 %v2304_v20 }
 0x2d4   :  { %1078 = vmatpush.msra.mxu2 %v2307_v21  ;;  %1098 = vmatpush.msra.mxu3 %v2310_v22 }
 0x2d5   :  { %1039 = vmatpush.msrb.mxu0 %v2313_v23  ;;  %1059 = vmatpush.msra.mxu1 %v2316_v24 }
 0x2d6   :  { %1079 = vmatpush.msra.mxu2 %v2319_v25  ;;  %1099 = vmatpush.msra.mxu3 %v2322_v26 }
 0x2d7   :  { %1040 = vmatpush.msrb.mxu0 %v2325_v27  ;;  %1060 = vmatpush.msra.mxu1 %v2328_v28 }
 0x2d8   :  { %1080 = vmatpush.msra.mxu2 %v2331_v29  ;;  %1100 = vmatpush.msra.mxu3 %v2334_v30 }
 0x2d9   :  { %1041 = vmatpush.msrb.mxu0 %v2337_v33  ;;  %1061 = vmatpush.msra.mxu1 %v2340_v34 }
 0x2da   :  { %1081 = vmatpush.msra.mxu2 %v2343_v35  ;;  %1101 = vmatpush.msra.mxu3 %v2346_v36 }
 0x2db   :  { %1042 = vmatpush.msrb.mxu0 %v2349_v37  ;;  %1062 = vmatpush.msra.mxu1 %v2352_v38 }
 0x2dc   :  { %1082 = vmatpush.msra.mxu2 %v2355_v39  ;;  %1102 = vmatpush.msra.mxu3 %v2358_v40 }
 0x2dd   :  { %1043 = vmatpush.msrb.mxu0 %v2361_v41  ;;  %1063 = vmatpush.msra.mxu1 %v2364_v42 }
 0x2de   :  { %1083 = vmatpush.msra.mxu2 %v2367_v43  ;;  %1103 = vmatpush.msra.mxu3 %v2370_v45 }
 0x2df   :  { %1044 = vmatpush.msrb.mxu0 %v2849_v44  ;;  %1064 = vmatpush.msra.mxu1 %v2850_v46 }
 0x2e0   :  { %1084 = vmatpush.msra.mxu2 %v2851_v47  ;;  %1104 = vmatpush.msra.mxu3 %v2852_v48 }
 0x2e1   :  { %1045 = vmatpush.msrb.mxu0 %v2853_v49  ;;  %1065 = vmatpush.msra.mxu1 %v2854_v0  ;;  %v2871_v0 = vld [vmem:[#allocation53_spill] sm:$0xff]  ;;  %v2872_v49 = vld [vmem:[#allocation54_spill] sm:$0xff] }
 0x2e2   :  { %1085 = vmatpush.msra.mxu2 %v2855_v63  ;;  %1105 = vmatpush.msra.mxu3 %v2856_v31  ;;  %v2870_v31 = vld [vmem:[#allocation52_spill] sm:$0xff] }
 0x2e3   :  { %1046 = vmatpush.msrb.mxu0 %v2857_v32  ;;  %1066 = vmatpush.msra.mxu1 %v2858_v2  ;;  %v2868_v2 = vld [vmem:[#allocation25_spill] sm:$0xff] }
 0x2e4   :  { %1086 = vmatpush.msra.mxu2 %v2859_v10  ;;  %1106 = vmatpush.msra.mxu3 %v2860_v62  ;;  %v2869_v32 = vld [vmem:[#allocation49_spill] sm:$0xff] }
 0x2e5   :  { %1047 = vmatpush.msrb.mxu0 %v2861_v4  ;;  %1067 = vmatpush.msra.mxu1 %v2862_v55 }
 0x2e6   :  { %1087 = vmatpush.msra.mxu2 %v2863_v56  ;;  %1107 = vmatpush.msra.mxu3 %v2864_v51 }
 0x2e7   :  { %1048 = vmatpush.msrb.mxu0 %v2865_v50  ;;  %1068 = vmatpush.msra.mxu1 %v2866_v52 }
 0x2e8   :  { %1088 = vmatpush.msra.mxu2 %v2504_v60  ;;  %1108 = vmatpush.msra.mxu3 %v2868_v2 }
 0x344   :  { %v832_v10 = vpop.f32.mrf.mxu0  ;;  %v852_v62 = vpop.f32.mrf.mxu1 }
 0x345   :  { %v895_v4 = vadd.f32 %v832_v10, %v2869_v32  ;;  %v896_v55 = vadd.f32 %v852_v62, %v2870_v31 }
 0x347   :  { %v899_v63 = vmul.f32 0.5, %v895_v4  ;;  %v900_v56 = vmul.f32 0.5, %v896_v55 }
 0x349   :  { %1395 = vtanh.f32 %v899_v63 }
 0x34a   :  { %1397 = vtanh.f32 %v900_v56 }
 0x34b   :  { %v872_v51 = vpop.f32.mrf.mxu2  ;;  %v892_v50 = vpop.f32.mrf.mxu3 }
 0x34c   :  { %v897_v52 = vadd.f32 %v872_v51, %v2871_v0  ;;  %v898_v48 = vadd.f32 %v892_v50, %v2872_v49  ;;  %v1266_v50 = vld [vmem:[#allocation7 + $0x78] sm:$0xff] }
 0x34e   :  { %v901_v47 = vmul.f32 0.5, %v897_v52  ;;  %1399 = vtanh.f32 %v898_v48 }
 0x34f   :  { %v1396_v60 = vpop.eup %1395 }
 0x350   :  { %v1398_v2 = vpop.eup %1397  ;;  %v905_v46 = vadd.f32 1.0, %v1396_v60  ;;  %1401 = vtanh.f32 %v901_v47 }
 0x351   :  { %v906_v44 = vadd.f32 1.0, %v1398_v2 }
 0x352   :  { %v908_v32 = vmul.f32 0.5, %v905_v46 }
 0x353   :  { %v909_v10 = vmul.f32 0.5, %v906_v44 }
 0x354   :  { %v1400_v31 = vpop.eup %1399 }
 0x355   :  { %v912_v62 = vmul.f32 %v909_v10, %v2436_v5  ;;  %v913_v63 = vmul.f32 %v1400_v31, %v908_v32  ;;  %v2897_v32 = vld [vmem:[#allocation37_spill] sm:$0xff]  ;;  %v2898_v31 = vld [vmem:[#allocation58_spill] sm:$0xff] }
 0x356   :  { %v1402_v4 = vpop.eup %1401 }
 0x357   :  { %v2513_v55 = vadd.f32 %v913_v63, %v912_v62  ;;  %v907_v0 = vadd.f32 1.0, %v1402_v4 }
 0x359   :  { %1403 = vtanh.f32 %v2513_v55  ;;  %v910_v49 = vmul.f32 0.5, %v907_v0 }
 0x35f   :  { %v1404_v56 = vpop.eup %1403 }
 0x360   :  { %v916_v48 = vmul.f32 %v1404_v56, %v910_v49  ;;  %v2899_v49 = vld [vmem:[#allocation59_spill] sm:$0xff] }
 0x362   :  { %1337 = vst [vmem:[%s2621_s6 + $0x20] sm:$0xff] %v916_v48  ;;  %940 = vmatmul.f32.vlgmr.msra.gmra.mxu0 %v916_v48  ;;  %960 = vmatmul.f32.vlgmr.msrb.gmra.mxu1 %v916_v48 }
 0x363   :  { %980 = vmatmul.f32.vlgmr.msrb.gmra.mxu2 %v916_v48  ;;  %1000 = vmatmul.f32.vlgmr.msrb.gmra.mxu3 %v916_v48  ;;  %v2900_v48 = vld [vmem:[#allocation60_spill] sm:$0xff] }
 0x364   :  { %1142 = vmatpush.msra.mxu0 %v2241_v11  ;;  %1162 = vmatpush.msrb.mxu1 %v2244_v18  ;;  %v2873_v11 = vld [vmem:[#allocation12_spill] sm:$0xff]  ;;  %v2874_v18 = vld [vmem:[#allocation11_spill] sm:$0xff] }
 0x365   :  { %1182 = vmatpush.msrb.mxu2 %v2247_v58  ;;  %1202 = vmatpush.msrb.mxu3 %v2250_v6  ;;  %v2875_v58 = vld [vmem:[#allocation13_spill] sm:$0xff]  ;;  %v2876_v6 = vld [vmem:[#allocation19_spill] sm:$0xff] }
 0x366   :  { %1143 = vmatpush.msra.mxu0 %v2253_v8  ;;  %1163 = vmatpush.msrb.mxu1 %v2256_v59  ;;  %v2877_v8 = vld [vmem:[#allocation16_spill] sm:$0xff]  ;;  %v2878_v59 = vld [vmem:[#allocation39_spill] sm:$0xff] }
 0x367   :  { %1183 = vmatpush.msrb.mxu2 %v2259_v12  ;;  %1203 = vmatpush.msrb.mxu3 %v2262_v3  ;;  %v2879_v12 = vld [vmem:[#allocation41_spill] sm:$0xff]  ;;  %v2880_v3 = vld [vmem:[#allocation42_spill] sm:$0xff] }
 0x368   :  { %1144 = vmatpush.msra.mxu0 %v2265_v57  ;;  %1164 = vmatpush.msrb.mxu1 %v2268_v61  ;;  %v2881_v57 = vld [vmem:[#allocation43_spill] sm:$0xff]  ;;  %v2882_v61 = vld [vmem:[#allocation14_spill] sm:$0xff] }
 0x369   :  { %1184 = vmatpush.msrb.mxu2 %v2271_v7  ;;  %1204 = vmatpush.msrb.mxu3 %v2274_v53  ;;  %v2883_v7 = vld [vmem:[#allocation17_spill] sm:$0xff]  ;;  %v2884_v53 = vld [vmem:[#allocation23_spill] sm:$0xff] }
 0x36a   :  { %1145 = vmatpush.msra.mxu0 %v2277_v1  ;;  %1165 = vmatpush.msrb.mxu1 %v2280_v54  ;;  %v2885_v1 = vld [vmem:[#allocation20_spill] sm:$0xff]  ;;  %v2886_v54 = vld [vmem:[#allocation15_spill] sm:$0xff] }
 0x36b   :  { %1185 = vmatpush.msrb.mxu2 %v2283_v9  ;;  %1205 = vmatpush.msrb.mxu3 %v2286_v13  ;;  %v2887_v9 = vld [vmem:[#allocation21_spill] sm:$0xff]  ;;  %v2888_v13 = vld [vmem:[#allocation27_spill] sm:$0xff] }
 0x36c   :  { %1146 = vmatpush.msra.mxu0 %v2289_v14  ;;  %1166 = vmatpush.msrb.mxu1 %v2292_v15  ;;  %v2889_v14 = vld [vmem:[#allocation24_spill] sm:$0xff]  ;;  %v2890_v15 = vld [vmem:[#allocation18_spill] sm:$0xff] }
 0x36d   :  { %1186 = vmatpush.msrb.mxu2 %v2295_v16  ;;  %1206 = vmatpush.msrb.mxu3 %v2298_v17  ;;  %v2891_v16 = vld [vmem:[#allocation30_spill] sm:$0xff]  ;;  %v2892_v17 = vld [vmem:[#allocation25_spill] sm:$0xff] }
 0x36e   :  { %1147 = vmatpush.msra.mxu0 %v2301_v19  ;;  %1167 = vmatpush.msrb.mxu1 %v2304_v20 }
 0x36f   :  { %1187 = vmatpush.msrb.mxu2 %v2307_v21  ;;  %1207 = vmatpush.msrb.mxu3 %v2310_v22  ;;  %v2893_v21 = vld [vmem:[#allocation36_spill] sm:$0xff] }
 0x370   :  { %1148 = vmatpush.msra.mxu0 %v2313_v23  ;;  %1168 = vmatpush.msrb.mxu1 %v2316_v24  ;;  %v2894_v23 = vld [vmem:[#allocation55_spill] sm:$0xff] }
 0x371   :  { %1188 = vmatpush.msrb.mxu2 %v2319_v25  ;;  %1208 = vmatpush.msrb.mxu3 %v2322_v26 }
 0x372   :  { %1149 = vmatpush.msra.mxu0 %v2325_v27  ;;  %1169 = vmatpush.msrb.mxu1 %v2328_v28 }
 0x373   :  { %1189 = vmatpush.msrb.mxu2 %v2331_v29  ;;  %1209 = vmatpush.msrb.mxu3 %v2334_v30  ;;  %v2895_v29 = vld [vmem:[#allocation56_spill] sm:$0xff] }
 0x374   :  { %1150 = vmatpush.msra.mxu0 %v2337_v33  ;;  %1170 = vmatpush.msrb.mxu1 %v2340_v34  ;;  %v2896_v33 = vld [vmem:[#allocation57_spill] sm:$0xff] }
 0x375   :  { %1190 = vmatpush.msrb.mxu2 %v2343_v35  ;;  %1210 = vmatpush.msrb.mxu3 %v2346_v36 }
 0x376   :  { %1151 = vmatpush.msra.mxu0 %v2349_v37  ;;  %1171 = vmatpush.msrb.mxu1 %v2352_v38 }
 0x377   :  { %1191 = vmatpush.msrb.mxu2 %v2355_v39  ;;  %1211 = vmatpush.msrb.mxu3 %v2358_v40 }
 0x378   :  { %1152 = vmatpush.msra.mxu0 %v2361_v41  ;;  %1172 = vmatpush.msrb.mxu1 %v2364_v42 }
 0x379   :  { %1192 = vmatpush.msrb.mxu2 %v2367_v43  ;;  %1212 = vmatpush.msrb.mxu3 %v2370_v45 }
 0x37a   :  { %1153 = vmatpush.msra.mxu0 %v2873_v11  ;;  %1173 = vmatpush.msrb.mxu1 %v2874_v18 }
 0x37b   :  { %1193 = vmatpush.msrb.mxu2 %v2875_v58  ;;  %1213 = vmatpush.msrb.mxu3 %v2876_v6 }
 0x37c   :  { %1154 = vmatpush.msra.mxu0 %v2877_v8  ;;  %1174 = vmatpush.msrb.mxu1 %v2878_v59 }
 0x37d   :  { %1194 = vmatpush.msrb.mxu2 %v2879_v12  ;;  %1214 = vmatpush.msrb.mxu3 %v2880_v3 }
 0x37e   :  { %1155 = vmatpush.msra.mxu0 %v2881_v57  ;;  %1175 = vmatpush.msrb.mxu1 %v2882_v61 }
 0x37f   :  { %1195 = vmatpush.msrb.mxu2 %v2883_v7  ;;  %1215 = vmatpush.msrb.mxu3 %v2884_v53 }
 0x380   :  { %1156 = vmatpush.msra.mxu0 %v2885_v1  ;;  %1176 = vmatpush.msrb.mxu1 %v2886_v54 }
 0x381   :  { %1196 = vmatpush.msrb.mxu2 %v2887_v9  ;;  %1216 = vmatpush.msrb.mxu3 %v2888_v13 }
 0x382   :  { %1157 = vmatpush.msra.mxu0 %v2889_v14  ;;  %1177 = vmatpush.msrb.mxu1 %v2890_v15  ;;  %v1265_v15 = vld [vmem:[#allocation7 + $0x70] sm:$0xff] }
 0x383   :  { %1197 = vmatpush.msrb.mxu2 %v2891_v16  ;;  %1217 = vmatpush.msrb.mxu3 %v2892_v17  ;;  %v1264_v16 = vld [vmem:[#allocation7 + $0x68] sm:$0xff]  ;;  %v1263_v17 = vld [vmem:[#allocation7 + $0x60] sm:$0xff] }
 0x3df   :  { %v941_v19 = vpop.f32.mrf.mxu0  ;;  %v961_v20 = vpop.f32.mrf.mxu1 }
 0x3e0   :  { %v1004_v22 = vadd.f32 %v941_v19, %v2893_v21  ;;  %v1005_v24 = vadd.f32 %v961_v20, %v2894_v23  ;;  %v1262_v19 = vld [vmem:[#allocation7 + $0x58] sm:$0xff]  ;;  %v1261_v20 = vld [vmem:[#allocation7 + $0x50] sm:$0xff]  ;;  %v1260_v21 = vld [vmem:[#allocation7 + $0x48] sm:$0xff] }
 0x3e1   :  { %v1258_v23 = vld [vmem:[#allocation7 + $0x38] sm:$0xff] }
 0x3e2   :  { %v1008_v25 = vmul.f32 0.5, %v1004_v22  ;;  %v1009_v26 = vmul.f32 0.5, %v1005_v24  ;;  %v1259_v22 = vld [vmem:[#allocation7 + $0x40] sm:$0xff]  ;;  %v1257_v24 = vld [vmem:[#allocation7 + $0x30] sm:$0xff] }
 0x3e4   :  { %1405 = vtanh.f32 %v1008_v25  ;;  %v1256_v25 = vld [vmem:[#allocation7 + $0x28] sm:$0xff] }
 0x3e5   :  { %1407 = vtanh.f32 %v1009_v26  ;;  %v1255_v26 = vld [vmem:[#allocation7 + $0x20] sm:$0xff] }
 0x3e6   :  { %v981_v27 = vpop.f32.mrf.mxu2  ;;  %v1001_v28 = vpop.f32.mrf.mxu3 }
 0x3e7   :  { %v1006_v30 = vadd.f32 %v981_v27, %v2895_v29  ;;  %v1007_v34 = vadd.f32 %v1001_v28, %v2896_v33  ;;  %v1254_v27 = vld [vmem:[#allocation7 + $0x18] sm:$0xff]  ;;  %v1253_v28 = vld [vmem:[#allocation7 + $0x10] sm:$0xff]  ;;  %v1252_v29 = vld [vmem:[#allocation7 + $0x8] sm:$0xff] }
 0x3e9   :  { %v1010_v35 = vmul.f32 0.5, %v1006_v30  ;;  %1409 = vtanh.f32 %v1007_v34  ;;  %v1251_v30 = vld [vmem:[#allocation7] sm:$0xff] }
 0x3ea   :  { %v1406_v36 = vpop.eup %1405 }
 0x3eb   :  { %v1408_v37 = vpop.eup %1407  ;;  %v1014_v38 = vadd.f32 1.0, %v1406_v36  ;;  %1411 = vtanh.f32 %v1010_v35  ;;  %v2901_v35 = vld [vmem:[#allocation38_spill] sm:$0xff] }
 0x3ec   :  { %v1015_v39 = vadd.f32 1.0, %v1408_v37  ;;  %v2902_v37 = vld [vmem:[#allocation61_spill] sm:$0xff] }
 0x3ed   :  { %v1017_v40 = vmul.f32 0.5, %v1014_v38 }
 0x3ee   :  { %v1018_v41 = vmul.f32 0.5, %v1015_v39 }
 0x3ef   :  { %v1410_v42 = vpop.eup %1409 }
 0x3f0   :  { %v1021_v43 = vmul.f32 %v1018_v41, %v2513_v55  ;;  %v1022_v45 = vmul.f32 %v1410_v42, %v1017_v40 }
 0x3f1   :  { %v1412_v5 = vpop.eup %1411 }
 0x3f2   :  { %v1023_v44 = vadd.f32 %v1022_v45, %v1021_v43  ;;  %v1016_v46 = vadd.f32 1.0, %v1412_v5  ;;  %v2903_v43 = vld [vmem:[#allocation62_spill] sm:$0xff]  ;;  %v2904_v5 = vld [vmem:[#allocation63_spill] sm:$0xff] }
 0x3f4   :  { %1413 = vtanh.f32 %v1023_v44  ;;  %v1019_v47 = vmul.f32 0.5, %v1016_v46 }
 0x3fa   :  { %v1414_v2 = vpop.eup %1413 }
 0x3fb   :  { %v1025_v51 = vmul.f32 %v1414_v2, %v1019_v47 }
 0x3fd   :  { %1338 = vst [vmem:[%s2621_s6 + $0x28] sm:$0xff] %v1025_v51  ;;  %1049 = vmatmul.f32.vlgmr.msrb.gmra.mxu0 %v1025_v51  ;;  %1069 = vmatmul.f32.vlgmr.msra.gmra.mxu1 %v1025_v51 }
 0x3fe   :  { %1089 = vmatmul.f32.vlgmr.msra.gmra.mxu2 %v1025_v51  ;;  %1109 = vmatmul.f32.vlgmr.msra.gmra.mxu3 %v1025_v51 }
 0x3ff   :  { %1271 = vmatpush.msrb.mxu0 %v1266_v50 }
 0x401   :  { %1272 = vmatpush.msrb.mxu0 %v1265_v15 }
 0x403   :  { %1273 = vmatpush.msrb.mxu0 %v1264_v16 }
 0x405   :  { %1274 = vmatpush.msrb.mxu0 %v1263_v17 }
 0x407   :  { %1275 = vmatpush.msrb.mxu0 %v1262_v19 }
 0x409   :  { %1276 = vmatpush.msrb.mxu0 %v1261_v20 }
 0x40b   :  { %1277 = vmatpush.msrb.mxu0 %v1260_v21 }
 0x40d   :  { %1278 = vmatpush.msrb.mxu0 %v1259_v22 }
 0x40f   :  { %1279 = vmatpush.msrb.mxu0 %v1258_v23 }
 0x411   :  { %1280 = vmatpush.msrb.mxu0 %v1257_v24 }
 0x413   :  { %1281 = vmatpush.msrb.mxu0 %v1256_v25 }
 0x415   :  { %1282 = vmatpush.msrb.mxu0 %v1255_v26 }
 0x417   :  { %1283 = vmatpush.msrb.mxu0 %v1254_v27 }
 0x419   :  { %1284 = vmatpush.msrb.mxu0 %v1253_v28 }
 0x41b   :  { %1285 = vmatpush.msrb.mxu0 %v1252_v29 }
 0x41d   :  { %1286 = vmatpush.msrb.mxu0 %v1251_v30 }
 0x47a   :  { %v1050_v52 = vpop.f32.mrf.mxu0  ;;  %v1070_v60 = vpop.f32.mrf.mxu1 }
 0x47b   :  { %v1113_v10 = vadd.f32 %v1050_v52, %v2897_v32  ;;  %v1114_v62 = vadd.f32 %v1070_v60, %v2898_v31 }
 0x47d   :  { %v1117_v63 = vmul.f32 0.5, %v1113_v10  ;;  %v1118_v4 = vmul.f32 0.5, %v1114_v62 }
 0x47f   :  { %1415 = vtanh.f32 %v1117_v63 }
 0x480   :  { %1417 = vtanh.f32 %v1118_v4 }
 0x481   :  { %v1090_v55 = vpop.f32.mrf.mxu2  ;;  %v1110_v0 = vpop.f32.mrf.mxu3 }
 0x482   :  { %v1115_v56 = vadd.f32 %v1090_v55, %v2899_v49  ;;  %v1116_v11 = vadd.f32 %v1110_v0, %v2900_v48 }
 0x484   :  { %v1119_v18 = vmul.f32 0.5, %v1115_v56  ;;  %1419 = vtanh.f32 %v1116_v11  ;;  %v1354_v56 = vld [vmem:[%s2620_s5] ss:$0 sm:$0xff] }
 0x485   :  { %v1416_v58 = vpop.eup %1415 }
 0x486   :  { %v1418_v6 = vpop.eup %1417  ;;  %v1123_v8 = vadd.f32 1.0, %v1416_v58  ;;  %1421 = vtanh.f32 %v1119_v18 }
 0x487   :  { %v1124_v59 = vadd.f32 1.0, %v1418_v6 }
 0x488   :  { %v1126_v12 = vmul.f32 0.5, %v1123_v8 }
 0x489   :  { %v1127_v3 = vmul.f32 0.5, %v1124_v59 }
 0x48a   :  { %v1420_v57 = vpop.eup %1419 }
 0x48b   :  { %v1130_v61 = vmul.f32 %v1127_v3, %v1023_v44  ;;  %v1131_v7 = vmul.f32 %v1420_v57, %v1126_v12 }
 0x48c   :  { %v1422_v53 = vpop.eup %1421 }
 0x48d   :  { %v2595_v1 = vadd.f32 %v1131_v7, %v1130_v61  ;;  %v1125_v54 = vadd.f32 1.0, %v1422_v53 }
 0x48f   :  { %1423 = vtanh.f32 %v2595_v1  ;;  %v1128_v9 = vmul.f32 0.5, %v1125_v54 }
 0x495   :  { %v1424_v13 = vpop.eup %1423 }
 0x496   :  { %v1134_v14 = vmul.f32 %v1424_v13, %v1128_v9 }
 0x498   :  { %1339 = vst [vmem:[%s2621_s6 + $0x30] sm:$0xff] %v1134_v14  ;;  %1158 = vmatmul.f32.vlgmr.msra.gmra.mxu0 %v1134_v14  ;;  %1178 = vmatmul.f32.vlgmr.msrb.gmra.mxu1 %v1134_v14 }
 0x499   :  { %1198 = vmatmul.f32.vlgmr.msrb.gmra.mxu2 %v1134_v14  ;;  %1218 = vmatmul.f32.vlgmr.msrb.gmra.mxu3 %v1134_v14 }
 0x515   :  { %v1159_v33 = vpop.f32.mrf.mxu0  ;;  %v1179_v34 = vpop.f32.mrf.mxu1 }
 0x516   :  { %v1222_v36 = vadd.f32 %v1159_v33, %v2901_v35  ;;  %v1223_v38 = vadd.f32 %v1179_v34, %v2902_v37 }
 0x518   :  { %v1226_v39 = vmul.f32 0.5, %v1222_v36  ;;  %v1227_v40 = vmul.f32 0.5, %v1223_v38 }
 0x51a   :  { %1425 = vtanh.f32 %v1226_v39 }
 0x51b   :  { %1427 = vtanh.f32 %v1227_v40 }
 0x51c   :  { %v1199_v41 = vpop.f32.mrf.mxu2  ;;  %v1219_v42 = vpop.f32.mrf.mxu3 }
 0x51d   :  { %v1224_v45 = vadd.f32 %v1199_v41, %v2903_v43  ;;  %v1225_v44 = vadd.f32 %v1219_v42, %v2904_v5 }
 0x51f   :  { %v1228_v46 = vmul.f32 0.5, %v1224_v45  ;;  %1429 = vtanh.f32 %v1225_v44 }
 0x520   :  { %v1426_v47 = vpop.eup %1425 }
 0x521   :  { %v1428_v2 = vpop.eup %1427  ;;  %v1232_v51 = vadd.f32 1.0, %v1426_v47  ;;  %1431 = vtanh.f32 %v1228_v46 }
 0x522   :  { %v1233_v50 = vadd.f32 1.0, %v1428_v2 }
 0x523   :  { %v1235_v52 = vmul.f32 0.5, %v1232_v51 }
 0x524   :  { %v1236_v60 = vmul.f32 0.5, %v1233_v50 }
 0x525   :  { %v1430_v32 = vpop.eup %1429 }
 0x526   :  { %v1239_v10 = vmul.f32 %v1236_v60, %v2595_v1  ;;  %v1240_v31 = vmul.f32 %v1430_v32, %v1235_v52 }
 0x527   :  { %v1432_v62 = vpop.eup %1431 }
 0x528   :  { %v1241_v63 = vadd.f32 %v1240_v31, %v1239_v10  ;;  %v1234_v4 = vadd.f32 1.0, %v1432_v62 }
 0x52a   :  { %1433 = vtanh.f32 %v1241_v63  ;;  %v1237_v55 = vmul.f32 0.5, %v1234_v4 }
 0x530   :  { %v1434_v0 = vpop.eup %1433 }
 0x531   :  { %v1243_v49 = vmul.f32 %v1434_v0, %v1237_v55 }
 0x533   :  { %1340 = vst [vmem:[%s2621_s6 + $0x38] sm:$0xff] %v1243_v49  ;;  %1287 = vmatmul.f32.vlgmr.msrb.gmra.mxu0 %v1243_v49 }
 0x5b0   :  { %v1288_v48 = vpop.f32.mrf.mxu0 }
 0x5b1   :  { %v1289_v11 = vadd.f32 %v1354_v56, %v1288_v48 }
 0x5b3   :  { %1291 = vst [vmem:[%s2622_s7] sm:$0xff] %v1289_v11 }
 0x5b4   :  { %1300 = vsyncpa [#allocation6], 1 }
 0x5b5   :  { %1301 = vsyncpa [#allocation8], 1 }

</bundles_post_ra>
